<compile_context>
chip_gen: v6e
topology: v6e:2x2x1
jax: 0.10.0
libtpu: 0.0.40
codegen_flags: <defaults>
</compile_context>

<pallas_src>
import functools
import math

import numpy as np
import jax
import jax.numpy as jnp
from jax.experimental import pallas as pl
from jax.experimental.pallas import tpu as pltpu

LAYER_NORM_EPS = 1e-5
MASK_BIG = 1e20   # == -neginf(float32) in ParlAI


def _layer_norm(x, gamma, beta):
    # f32 statistics (keep LN in f32 even though matmul operands are bf16).
    mu = jnp.mean(x, axis=-1, keepdims=True)
    var = jnp.mean((x - mu) ** 2, axis=-1, keepdims=True)
    return (x - mu) * jax.lax.rsqrt(var + LAYER_NORM_EPS) * gamma + beta


def _layer_body(x_ref, mk_ref, mq_ref,
                wq_ref, bq_ref, wk_ref, bk_ref, wv_ref, bv_ref,
                wo_ref, bo_ref,
                g1_ref, be1_ref,
                w1_ref, b1_ref, w2_ref, b2_ref,
                g2_ref, be2_ref,
                *, n_heads, ffn_chunk):
    """Shared per-batch-element encoder-layer math. Returns masked f32 [S, D]."""
    x_bf = x_ref[0]          # [S, D] bf16 activations
    mk = mk_ref[0]           # [1, S] f32 (1.0 = attend, 0.0 = masked key)
    mq = mq_ref[0]           # [S, 1] f32
    S, D = x_bf.shape
    dh = D // n_heads

    # --- QKV projections: bf16 operands, f32 accumulation --------------------
    # (1/sqrt(dh) scale is folded into wq/bq at init time.)
    q = jnp.dot(x_bf, wq_ref[...], preferred_element_type=jnp.float32) + bq_ref[...]
    k = jnp.dot(x_bf, wk_ref[...], preferred_element_type=jnp.float32) + bk_ref[...]
    v = jnp.dot(x_bf, wv_ref[...], preferred_element_type=jnp.float32) + bv_ref[...]
    q_bf = q.astype(jnp.bfloat16)
    k_bf = k.astype(jnp.bfloat16)
    v_bf = v.astype(jnp.bfloat16)

    # Additive key mask, hoisted out of the head loop:
    # masked key -> -1e20, valid key -> 0.0
    add_mask = (mk - 1.0) * jnp.float32(MASK_BIG)   # [1, S]

    # --- multi-head attention -------------------------------------------------
    # Per-head scores/softmax/p@v; head outputs stay as bf16 register values
    # and are concatenated along the lane axis (no VMEM scratch round-trip),
    # so the out-projection below is a single full-K matmul.
    # TODO(synk): flash-tile over keys for large S instead of [S,S] per head.
    heads = []
    for h in range(n_heads):
        sl = slice(h * dh, (h + 1) * dh)
        s = jax.lax.dot_general(q_bf[:, sl], k_bf[:, sl], (((1,), (1,)), ((), ())),
                                preferred_element_type=jnp.float32)   # [S, S]
        s = s + add_mask
        s = s - jnp.max(s, axis=-1, keepdims=True)
        p = jnp.exp(s)
        # Rows whose keys are all masked get a uniform (garbage) softmax here;
        # they are zeroed by the `t * mq` below, so downstream is unaffected.
        p = p * pl.reciprocal(jnp.sum(p, axis=-1, keepdims=True), approx=True)
        oh = jnp.dot(p.astype(jnp.bfloat16), v_bf[:, sl],
                     preferred_element_type=jnp.float32)              # [S, dh]
        heads.append(oh.astype(jnp.bfloat16))
    attn_bf = jnp.concatenate(heads, axis=-1)                         # [S, D] bf16

    attn_out = (jnp.dot(attn_bf, wo_ref[...],
                        preferred_element_type=jnp.float32) + bo_ref[...])

    # --- residual + post-LN (variant 'aiayn') ---------------------------------
    t = x_bf.astype(jnp.float32) + attn_out
    t = _layer_norm(t, g1_ref[...], be1_ref[...])

    # --- FFN (relu) tiled over Fh, residual, post-LN ---------------------------
    t_bf = t.astype(jnp.bfloat16)
    Fh = w1_ref.shape[1]
    ffn = None
    for c in range(Fh // ffn_chunk):
        cs = slice(c * ffn_chunk, (c + 1) * ffn_chunk)
        h1 = jnp.maximum(
            jnp.dot(t_bf, w1_ref[:, cs], preferred_element_type=jnp.float32)
            + b1_ref[:, cs], 0.0)
        part = jnp.dot(h1.astype(jnp.bfloat16), w2_ref[cs, :],
                       preferred_element_type=jnp.float32)
        ffn = part if ffn is None else ffn + part
    ffn = ffn + b2_ref[...]

    t = t + ffn
    t = _layer_norm(t, g2_ref[...], be2_ref[...])

    # tensor *= mask.unsqueeze(-1)
    return t * mq


def _encoder_layer_kernel(*refs, n_heads, ffn_chunk):
    *in_refs, o_ref, osum_ref = refs
    t = _layer_body(*in_refs, n_heads=n_heads, ffn_chunk=ffn_chunk)
    o_ref[0] = t.astype(o_ref.dtype)          # bf16 inter-layer activations
    osum_ref[0] = jnp.sum(t, axis=0, keepdims=True).astype(osum_ref.dtype)


def _encoder_last_layer_kernel(*refs, n_heads, ffn_chunk):
    # Last layer: only the fused masked column-sum is consumed downstream —
    # skip the full [S, D] HBM writeback entirely.
    *in_refs, osum_ref = refs
    t = _layer_body(*in_refs, n_heads=n_heads, ffn_chunk=ffn_chunk)
    osum_ref[0] = jnp.sum(t, axis=0, keepdims=True).astype(osum_ref.dtype)


def _const_spec(shape, buffered):
    """BlockSpec for a grid-invariant (constant index_map) operand."""
    idx = lambda b: (0,) * len(shape)
    if buffered and hasattr(pl, "Buffered"):
        try:
            # Single-buffered: index_map is constant, double-buffering only
            # wastes VMEM.
            return pl.BlockSpec(shape, idx, pipeline_mode=pl.Buffered(1))
        except TypeError:
            pass
    return pl.BlockSpec(shape, idx)


def _pick_ffn_chunk(Fh, max_chunk=2048):
    if Fh <= max_chunk:
        return Fh
    c = max_chunk - (max_chunk % 128)
    while c >= 128:
        if Fh % c == 0:
            return c
        c -= 128
    return Fh


def _vmem_limit_bytes(S, D, Fh, ffn_chunk, buffered):
    """Conservative scoped-VMEM budget for one layer invocation."""
    bf, f4 = 2, 4
    wcopies = 1 if buffered else 2
    weights = wcopies * bf * (4 * D * D + 2 * D * Fh)       # bf16 weights
    small = 2 * f4 * (6 * D + Fh + 8 * 128)                 # biases / LN params / padding slack
    io = 2 * bf * S * D * 2                                 # x in + out blocks, double-buffered
    io += 2 * f4 * (2 * S + D + 256)                        # mask blocks + osum block
    live = f4 * S * D * 5 + bf * S * D * 4                  # q,k,v,t + bf16 copies
    live += f4 * S * S * 2                                  # per-head scores + probs
    live += (f4 + bf) * S * ffn_chunk                       # FFN chunk intermediate
    total = weights + small + io + live
    return int(min(total * 2 + (8 << 20), 112 << 20))


def encoder_layer(x, mask_k, mask_q, p, n_heads, *, last=False):
    B, S, D = x.shape
    Fh = p["w1"].shape[1]
    ffn_chunk = _pick_ffn_chunk(Fh)

    args = (x, mask_k, mask_q,
            p["wq"], p["bq"], p["wk"], p["bk"], p["wv"], p["bv"], p["wo"], p["bo"],
            p["ln1_g"], p["ln1_b"], p["w1"], p["b1"], p["w2"], p["b2"],
            p["ln2_g"], p["ln2_b"])

    def run(buffered):
        cs = lambda shape: _const_spec(shape, buffered)
        in_specs = [
            pl.BlockSpec((1, S, D), lambda b: (b, 0, 0)),   # x (bf16)
            pl.BlockSpec((1, 1, S), lambda b: (b, 0, 0)),   # key mask
            pl.BlockSpec((1, S, 1), lambda b: (b, 0, 0)),   # query mask
            cs((D, D)), cs((1, D)),                         # wq, bq
            cs((D, D)), cs((1, D)),                         # wk, bk
            cs((D, D)), cs((1, D)),                         # wv, bv
            cs((D, D)), cs((1, D)),                         # wo, bo
            cs((1, D)), cs((1, D)),                         # ln1 gamma, beta
            cs((D, Fh)), cs((1, Fh)),                       # w1, b1
            cs((Fh, D)), cs((1, D)),                        # w2, b2
            cs((1, D)), cs((1, D)),                         # ln2 gamma, beta
        ]
        compiler_params = pltpu.CompilerParams(
            dimension_semantics=("parallel",),
            vmem_limit_bytes=_vmem_limit_bytes(S, D, Fh, ffn_chunk, buffered))

        if last:
            kernel = functools.partial(_encoder_last_layer_kernel,
                                       n_heads=n_heads, ffn_chunk=ffn_chunk)
            out_sum = pl.pallas_call(
                kernel,
                grid=(B,),
                in_specs=in_specs,
                out_specs=pl.BlockSpec((1, 1, D), lambda b: (b, 0, 0)),
                out_shape=jax.ShapeDtypeStruct((B, 1, D), jnp.float32),
                compiler_params=compiler_params,
            )(*args)
            return None, out_sum

        kernel = functools.partial(_encoder_layer_kernel,
                                   n_heads=n_heads, ffn_chunk=ffn_chunk)
        out, out_sum = pl.pallas_call(
            kernel,
            grid=(B,),
            in_specs=in_specs,
            out_specs=[pl.BlockSpec((1, S, D), lambda b: (b, 0, 0)),
                       pl.BlockSpec((1, 1, D), lambda b: (b, 0, 0))],
            out_shape=(jax.ShapeDtypeStruct((B, S, D), jnp.bfloat16),
                       jax.ShapeDtypeStruct((B, 1, D), jnp.float32)),
            compiler_params=compiler_params,
        )(*args)
        return out, out_sum

    try:
        return run(buffered=True)
    except Exception:
        # Fallback if this Pallas build does not support Buffered(1) specs.
        return run(buffered=False)


def create_position_codes(n_pos, dim):
    position_enc = np.array(
        [[pos / np.power(10000, 2 * j / dim) for j in range(dim // 2)]
         for pos in range(n_pos)])
    out = np.zeros((n_pos, dim), np.float32)
    out[:, 0::2] = np.sin(position_enc)
    out[:, 1::2] = np.cos(position_enc)
    return jnp.asarray(out)


def init_params(key, vocab, D, Fh, n_layers, n_positions, n_heads, padding_idx=0):
    keys = jax.random.split(key, 1 + n_layers)
    emb = jax.random.normal(keys[0], (vocab, D), jnp.float32) * (D ** -0.5)
    emb = emb.at[padding_idx].set(0.0)
    pos = create_position_codes(n_positions, D)  # learn_positional_embeddings=False

    dh = D // n_heads
    inv_scale = 1.0 / math.sqrt(dh)

    def xavier_normal(k, fi, fo, scale=1.0):
        w = jax.random.normal(k, (fi, fo), jnp.float32) * math.sqrt(2.0 / (fi + fo))
        return (w * scale).astype(jnp.bfloat16)   # bf16 MXU operands

    def xavier_uniform(k, fi, fo):
        b = math.sqrt(6.0 / (fi + fo))
        w = jax.random.uniform(k, (fi, fo), jnp.float32, -b, b)
        return w.astype(jnp.bfloat16)

    def lin_bias(k, fi, fo, scale=1.0):
        b = 1.0 / math.sqrt(fi)
        return jax.random.uniform(k, (1, fo), jnp.float32, -b, b) * scale

    layers = []
    for i in range(n_layers):
        lk = jax.random.split(keys[1 + i], 12)
        layers.append(dict(
            # 1/sqrt(dh) query scale folded into wq/bq (init-time fold).
            wq=xavier_normal(lk[0], D, D, scale=inv_scale),
            bq=lin_bias(lk[1], D, D, scale=inv_scale),
            wk=xavier_normal(lk[2], D, D), bk=lin_bias(lk[3], D, D),
            wv=xavier_normal(lk[4], D, D), bv=lin_bias(lk[5], D, D),
            wo=xavier_normal(lk[6], D, D), bo=lin_bias(lk[7], D, D),
            ln1_g=jnp.ones((1, D), jnp.float32), ln1_b=jnp.zeros((1, D), jnp.float32),
            w1=xavier_uniform(lk[8], D, Fh), b1=lin_bias(lk[9], D, Fh),
            w2=xavier_uniform(lk[10], Fh, D), b2=lin_bias(lk[11], Fh, D),
            ln2_g=jnp.ones((1, D), jnp.float32), ln2_b=jnp.zeros((1, D), jnp.float32),
        ))
    return dict(emb=emb, pos=pos, layers=layers)


def transformer_encoder_forward(params, input_ids, *, n_heads,
                                embeddings_scale=True, output_scaling=1.0,
                                padding_idx=0):
    """Forward pass. variant='aiayn', n_segments=0, reduction_type='mean',
    all dropout p=0 (identity)."""
    B, S = input_ids.shape
    D = params["emb"].shape[1]

    mask = (input_ids != padding_idx)
    positions = jnp.clip(jnp.cumsum(mask.astype(jnp.int32), axis=1) - 1, 0, None)

    tensor = jnp.take(params["emb"], input_ids, axis=0)              # [B, S, D]
    if embeddings_scale:
        tensor = tensor * np.sqrt(D)
    tensor = tensor + jnp.take(params["pos"], positions, axis=0)
    # variant 'aiayn': no embedding layer-norm; dropout(p=0) is identity.

    maskf = mask.astype(jnp.float32)
    # Inter-layer activations travel in bf16 (halves HBM traffic); f32 math
    # (residual / LN / softmax stats) happens inside the kernels.
    tensor = (tensor * maskf[:, :, None]).astype(jnp.bfloat16)
    mask_k = maskf[:, None, :]   # [B, 1, S]
    mask_q = maskf[:, :, None]   # [B, S, 1]

    n_layers = len(params["layers"])
    sums = None
    for i, lp in enumerate(params["layers"]):
        is_last = (i == n_layers - 1)
        tensor, sums = encoder_layer(tensor, mask_k, mask_q, lp, n_heads,
                                     last=is_last)

    # reduction_type == 'mean' (fused: the last layer already produced the
    # masked column sum; masked positions are zero so sum == masked sum).
    denom = jnp.maximum(jnp.sum(maskf, axis=1, keepdims=True), 1.0)  # [B, 1]
    return sums[:, 0, :] * jnp.float32(output_scaling) / denom


if __name__ == "__main__":
    B, S = 2, 8
    D, H, Fh = 32, 4, 64
    vocab, n_layers, n_positions = 50, 2, 64

    params = init_params(jax.random.PRNGKey(0), vocab, D, Fh, n_layers,
                         n_positions, n_heads=H)

    ids = jax.random.randint(jax.random.PRNGKey(1), (B, S), 1, vocab, dtype=jnp.int32)
    ids = ids.at[1, 6:].set(0)   # add some padding to exercise the mask path

    out = transformer_encoder_forward(params, ids, n_heads=H)
    out = jax.block_until_ready(out)
    assert out.shape == (B, D) and out.dtype == jnp.float32
    assert bool(jnp.all(jnp.isfinite(out)))
    print("KERNEL_OK")
</pallas_src>

<mosaic_0001>
module attributes {stable_mosaic.version = 11 : i64} {
  func.func @_encoder_layer_kernel(%arg0: i32, %arg1: memref<1x8x32xbf16, #tpu.memory_space<vmem>>, %arg2: memref<1x1x8xf32, #tpu.memory_space<vmem>>, %arg3: memref<1x8x1xf32, #tpu.memory_space<vmem>>, %arg4: memref<32x32xbf16, #tpu.memory_space<vmem>>, %arg5: memref<1x32xf32, #tpu.memory_space<vmem>>, %arg6: memref<32x32xbf16, #tpu.memory_space<vmem>>, %arg7: memref<1x32xf32, #tpu.memory_space<vmem>>, %arg8: memref<32x32xbf16, #tpu.memory_space<vmem>>, %arg9: memref<1x32xf32, #tpu.memory_space<vmem>>, %arg10: memref<32x32xbf16, #tpu.memory_space<vmem>>, %arg11: memref<1x32xf32, #tpu.memory_space<vmem>>, %arg12: memref<1x32xf32, #tpu.memory_space<vmem>>, %arg13: memref<1x32xf32, #tpu.memory_space<vmem>>, %arg14: memref<32x64xbf16, #tpu.memory_space<vmem>>, %arg15: memref<1x64xf32, #tpu.memory_space<vmem>>, %arg16: memref<64x32xbf16, #tpu.memory_space<vmem>>, %arg17: memref<1x32xf32, #tpu.memory_space<vmem>>, %arg18: memref<1x32xf32, #tpu.memory_space<vmem>>, %arg19: memref<1x32xf32, #tpu.memory_space<vmem>>, %arg20: memref<1x8x32xbf16, #tpu.memory_space<vmem>>, %arg21: memref<1x1x32xf32, #tpu.memory_space<vmem>>) attributes {dimension_semantics = [#tpu.dimension_semantics<parallel>], iteration_bounds = array<i64: 2>, scalar_prefetch = 0 : i64, scratch_operands = 0 : i64, tpu.core_type = #tpu.core_type<tc>, window_params = [{transform_indices = @transform_0, window_bounds = array<i64: 1, 8, 32>}, {transform_indices = @transform_1, window_bounds = array<i64: 1, 1, 8>}, {transform_indices = @transform_2, window_bounds = array<i64: 1, 8, 1>}, {pipeline_mode = #tpu.pipeline_mode<synchronous>, transform_indices = @transform_3, window_bounds = array<i64: 32, 32>}, {pipeline_mode = #tpu.pipeline_mode<synchronous>, transform_indices = @transform_4, window_bounds = array<i64: 1, 32>}, {pipeline_mode = #tpu.pipeline_mode<synchronous>, transform_indices = @transform_5, window_bounds = array<i64: 32, 32>}, {pipeline_mode = #tpu.pipeline_mode<synchronous>, transform_indices = @transform_6, window_bounds = array<i64: 1, 32>}, {pipeline_mode = #tpu.pipeline_mode<synchronous>, transform_indices = @transform_7, window_bounds = array<i64: 32, 32>}, {pipeline_mode = #tpu.pipeline_mode<synchronous>, transform_indices = @transform_8, window_bounds = array<i64: 1, 32>}, {pipeline_mode = #tpu.pipeline_mode<synchronous>, transform_indices = @transform_9, window_bounds = array<i64: 32, 32>}, {pipeline_mode = #tpu.pipeline_mode<synchronous>, transform_indices = @transform_10, window_bounds = array<i64: 1, 32>}, {pipeline_mode = #tpu.pipeline_mode<synchronous>, transform_indices = @transform_11, window_bounds = array<i64: 1, 32>}, {pipeline_mode = #tpu.pipeline_mode<synchronous>, transform_indices = @transform_12, window_bounds = array<i64: 1, 32>}, {pipeline_mode = #tpu.pipeline_mode<synchronous>, transform_indices = @transform_13, window_bounds = array<i64: 32, 64>}, {pipeline_mode = #tpu.pipeline_mode<synchronous>, transform_indices = @transform_14, window_bounds = array<i64: 1, 64>}, {pipeline_mode = #tpu.pipeline_mode<synchronous>, transform_indices = @transform_15, window_bounds = array<i64: 64, 32>}, {pipeline_mode = #tpu.pipeline_mode<synchronous>, transform_indices = @transform_16, window_bounds = array<i64: 1, 32>}, {pipeline_mode = #tpu.pipeline_mode<synchronous>, transform_indices = @transform_17, window_bounds = array<i64: 1, 32>}, {pipeline_mode = #tpu.pipeline_mode<synchronous>, transform_indices = @transform_18, window_bounds = array<i64: 1, 32>}, {transform_indices = @transform_19, window_bounds = array<i64: 1, 8, 32>}, {transform_indices = @transform_20, window_bounds = array<i64: 1, 1, 32>}]} {
    %c0 = arith.constant 0 : index
    %c0_0 = arith.constant 0 : index
    %c0_1 = arith.constant 0 : index
    %0 = vector.load %arg1[%c0, %c0_0, %c0_1] : memref<1x8x32xbf16, #tpu.memory_space<vmem>>, vector<1x8x32xbf16>
    %1 = vector.shape_cast %0 : vector<1x8x32xbf16> to vector<8x32xbf16>
    %c0_2 = arith.constant 0 : index
    %c0_3 = arith.constant 0 : index
    %c0_4 = arith.constant 0 : index
    %2 = vector.load %arg2[%c0_2, %c0_3, %c0_4] : memref<1x1x8xf32, #tpu.memory_space<vmem>>, vector<1x1x8xf32>
    %3 = vector.shape_cast %2 : vector<1x1x8xf32> to vector<1x8xf32>
    %c0_5 = arith.constant 0 : index
    %c0_6 = arith.constant 0 : index
    %c0_7 = arith.constant 0 : index
    %4 = vector.load %arg3[%c0_5, %c0_6, %c0_7] : memref<1x8x1xf32, #tpu.memory_space<vmem>>, vector<1x8x1xf32>
    %5 = vector.shape_cast %4 : vector<1x8x1xf32> to vector<8x1xf32>
    %c0_8 = arith.constant 0 : index
    %c0_9 = arith.constant 0 : index
    %6 = vector.load %arg4[%c0_8, %c0_9] : memref<32x32xbf16, #tpu.memory_space<vmem>>, vector<32x32xbf16>
    %cst = arith.constant dense<0.000000e+00> : vector<8x32xf32>
    %7 = tpu.matmul %1, %6, %cst {dimension_numbers = #tpu.dot_dimension_numbers<[1], [0], [0], [1], [0, 0, 1, 1], [], []>} : vector<8x32xbf16>, vector<32x32xbf16>, vector<8x32xf32> -> vector<8x32xf32>
    %c0_10 = arith.constant 0 : index
    %c0_11 = arith.constant 0 : index
    %8 = vector.load %arg5[%c0_10, %c0_11] : memref<1x32xf32, #tpu.memory_space<vmem>>, vector<1x32xf32>
    %9 = vector.broadcast %8 : vector<1x32xf32> to vector<8x32xf32>
    %10 = arith.addf %7, %9 : vector<8x32xf32>
    %c0_12 = arith.constant 0 : index
    %c0_13 = arith.constant 0 : index
    %11 = vector.load %arg6[%c0_12, %c0_13] : memref<32x32xbf16, #tpu.memory_space<vmem>>, vector<32x32xbf16>
    %cst_14 = arith.constant dense<0.000000e+00> : vector<8x32xf32>
    %12 = tpu.matmul %1, %11, %cst_14 {dimension_numbers = #tpu.dot_dimension_numbers<[1], [0], [0], [1], [0, 0, 1, 1], [], []>} : vector<8x32xbf16>, vector<32x32xbf16>, vector<8x32xf32> -> vector<8x32xf32>
    %c0_15 = arith.constant 0 : index
    %c0_16 = arith.constant 0 : index
    %13 = vector.load %arg7[%c0_15, %c0_16] : memref<1x32xf32, #tpu.memory_space<vmem>>, vector<1x32xf32>
    %14 = vector.broadcast %13 : vector<1x32xf32> to vector<8x32xf32>
    %15 = arith.addf %12, %14 : vector<8x32xf32>
    %c0_17 = arith.constant 0 : index
    %c0_18 = arith.constant 0 : index
    %16 = vector.load %arg8[%c0_17, %c0_18] : memref<32x32xbf16, #tpu.memory_space<vmem>>, vector<32x32xbf16>
    %cst_19 = arith.constant dense<0.000000e+00> : vector<8x32xf32>
    %17 = tpu.matmul %1, %16, %cst_19 {dimension_numbers = #tpu.dot_dimension_numbers<[1], [0], [0], [1], [0, 0, 1, 1], [], []>} : vector<8x32xbf16>, vector<32x32xbf16>, vector<8x32xf32> -> vector<8x32xf32>
    %c0_20 = arith.constant 0 : index
    %c0_21 = arith.constant 0 : index
    %18 = vector.load %arg9[%c0_20, %c0_21] : memref<1x32xf32, #tpu.memory_space<vmem>>, vector<1x32xf32>
    %19 = vector.broadcast %18 : vector<1x32xf32> to vector<8x32xf32>
    %20 = arith.addf %17, %19 : vector<8x32xf32>
    %21 = arith.truncf %10 : vector<8x32xf32> to vector<8x32xbf16>
    %22 = arith.truncf %15 : vector<8x32xf32> to vector<8x32xbf16>
    %23 = arith.truncf %20 : vector<8x32xf32> to vector<8x32xbf16>
    %cst_22 = arith.constant 1.000000e+00 : f32
    %24 = vector.broadcast %cst_22 : f32 to vector<1x8xf32>
    %25 = arith.subf %3, %24 : vector<1x8xf32>
    %cst_23 = arith.constant 1.000000e+20 : f32
    %26 = vector.broadcast %cst_23 : f32 to vector<1x8xf32>
    %27 = arith.mulf %25, %26 : vector<1x8xf32>
    %28 = vector.extract_strided_slice %21 {offsets = [0, 0], sizes = [8, 8], strides = [1, 1]} : vector<8x32xbf16> to vector<8x8xbf16>
    %29 = vector.extract_strided_slice %22 {offsets = [0, 0], sizes = [8, 8], strides = [1, 1]} : vector<8x32xbf16> to vector<8x8xbf16>
    %cst_24 = arith.constant dense<0.000000e+00> : vector<8x8xf32>
    %30 = tpu.matmul %28, %29, %cst_24 {dimension_numbers = #tpu.dot_dimension_numbers<[1], [1], [0], [0], [0, 0, 1, 0], [], []>} : vector<8x8xbf16>, vector<8x8xbf16>, vector<8x8xf32> -> vector<8x8xf32>
    %31 = vector.broadcast %27 : vector<1x8xf32> to vector<8x8xf32>
    %32 = arith.addf %30, %31 : vector<8x8xf32>
    %cst_25 = arith.constant dense<0xFF800000> : vector<8xf32>
    %33 = vector.multi_reduction <maximumf>, %32, %cst_25 [1] : vector<8x8xf32> to vector<8xf32>
    %34 = vector.shape_cast %33 : vector<8xf32> to vector<8x1xf32>
    %35 = vector.broadcast %34 : vector<8x1xf32> to vector<8x8xf32>
    %36 = arith.subf %32, %35 : vector<8x8xf32>
    %37 = math.exp %36 : vector<8x8xf32>
    %cst_26 = arith.constant dense<0.000000e+00> : vector<8xf32>
    %38 = vector.multi_reduction <add>, %37, %cst_26 [1] : vector<8x8xf32> to vector<8xf32>
    %39 = vector.shape_cast %38 : vector<8xf32> to vector<8x1xf32>
    %40 = tpu.reciprocal %39 {approx = true} : vector<8x1xf32> -> vector<8x1xf32>
    %41 = vector.broadcast %40 : vector<8x1xf32> to vector<8x8xf32>
    %42 = arith.mulf %37, %41 : vector<8x8xf32>
    %43 = arith.truncf %42 : vector<8x8xf32> to vector<8x8xbf16>
    %44 = vector.extract_strided_slice %23 {offsets = [0, 0], sizes = [8, 8], strides = [1, 1]} : vector<8x32xbf16> to vector<8x8xbf16>
    %cst_27 = arith.constant dense<0.000000e+00> : vector<8x8xf32>
    %45 = tpu.matmul %43, %44, %cst_27 {dimension_numbers = #tpu.dot_dimension_numbers<[1], [0], [0], [1], [0, 0, 1, 1], [], []>} : vector<8x8xbf16>, vector<8x8xbf16>, vector<8x8xf32> -> vector<8x8xf32>
    %46 = arith.truncf %45 : vector<8x8xf32> to vector<8x8xbf16>
    %47 = vector.extract_strided_slice %21 {offsets = [0, 8], sizes = [8, 8], strides = [1, 1]} : vector<8x32xbf16> to vector<8x8xbf16>
    %48 = vector.extract_strided_slice %22 {offsets = [0, 8], sizes = [8, 8], strides = [1, 1]} : vector<8x32xbf16> to vector<8x8xbf16>
    %cst_28 = arith.constant dense<0.000000e+00> : vector<8x8xf32>
    %49 = tpu.matmul %47, %48, %cst_28 {dimension_numbers = #tpu.dot_dimension_numbers<[1], [1], [0], [0], [0, 0, 1, 0], [], []>} : vector<8x8xbf16>, vector<8x8xbf16>, vector<8x8xf32> -> vector<8x8xf32>
    %50 = vector.broadcast %27 : vector<1x8xf32> to vector<8x8xf32>
    %51 = arith.addf %49, %50 : vector<8x8xf32>
    %cst_29 = arith.constant dense<0xFF800000> : vector<8xf32>
    %52 = vector.multi_reduction <maximumf>, %51, %cst_29 [1] : vector<8x8xf32> to vector<8xf32>
    %53 = vector.shape_cast %52 : vector<8xf32> to vector<8x1xf32>
    %54 = vector.broadcast %53 : vector<8x1xf32> to vector<8x8xf32>
    %55 = arith.subf %51, %54 : vector<8x8xf32>
    %56 = math.exp %55 : vector<8x8xf32>
    %cst_30 = arith.constant dense<0.000000e+00> : vector<8xf32>
    %57 = vector.multi_reduction <add>, %56, %cst_30 [1] : vector<8x8xf32> to vector<8xf32>
    %58 = vector.shape_cast %57 : vector<8xf32> to vector<8x1xf32>
    %59 = tpu.reciprocal %58 {approx = true} : vector<8x1xf32> -> vector<8x1xf32>
    %60 = vector.broadcast %59 : vector<8x1xf32> to vector<8x8xf32>
    %61 = arith.mulf %56, %60 : vector<8x8xf32>
    %62 = arith.truncf %61 : vector<8x8xf32> to vector<8x8xbf16>
    %63 = vector.extract_strided_slice %23 {offsets = [0, 8], sizes = [8, 8], strides = [1, 1]} : vector<8x32xbf16> to vector<8x8xbf16>
    %cst_31 = arith.constant dense<0.000000e+00> : vector<8x8xf32>
    %64 = tpu.matmul %62, %63, %cst_31 {dimension_numbers = #tpu.dot_dimension_numbers<[1], [0], [0], [1], [0, 0, 1, 1], [], []>} : vector<8x8xbf16>, vector<8x8xbf16>, vector<8x8xf32> -> vector<8x8xf32>
    %65 = arith.truncf %64 : vector<8x8xf32> to vector<8x8xbf16>
    %66 = vector.extract_strided_slice %21 {offsets = [0, 16], sizes = [8, 8], strides = [1, 1]} : vector<8x32xbf16> to vector<8x8xbf16>
    %67 = vector.extract_strided_slice %22 {offsets = [0, 16], sizes = [8, 8], strides = [1, 1]} : vector<8x32xbf16> to vector<8x8xbf16>
    %cst_32 = arith.constant dense<0.000000e+00> : vector<8x8xf32>
    %68 = tpu.matmul %66, %67, %cst_32 {dimension_numbers = #tpu.dot_dimension_numbers<[1], [1], [0], [0], [0, 0, 1, 0], [], []>} : vector<8x8xbf16>, vector<8x8xbf16>, vector<8x8xf32> -> vector<8x8xf32>
    %69 = vector.broadcast %27 : vector<1x8xf32> to vector<8x8xf32>
    %70 = arith.addf %68, %69 : vector<8x8xf32>
    %cst_33 = arith.constant dense<0xFF800000> : vector<8xf32>
    %71 = vector.multi_reduction <maximumf>, %70, %cst_33 [1] : vector<8x8xf32> to vector<8xf32>
    %72 = vector.shape_cast %71 : vector<8xf32> to vector<8x1xf32>
    %73 = vector.broadcast %72 : vector<8x1xf32> to vector<8x8xf32>
    %74 = arith.subf %70, %73 : vector<8x8xf32>
    %75 = math.exp %74 : vector<8x8xf32>
    %cst_34 = arith.constant dense<0.000000e+00> : vector<8xf32>
    %76 = vector.multi_reduction <add>, %75, %cst_34 [1] : vector<8x8xf32> to vector<8xf32>
    %77 = vector.shape_cast %76 : vector<8xf32> to vector<8x1xf32>
    %78 = tpu.reciprocal %77 {approx = true} : vector<8x1xf32> -> vector<8x1xf32>
    %79 = vector.broadcast %78 : vector<8x1xf32> to vector<8x8xf32>
    %80 = arith.mulf %75, %79 : vector<8x8xf32>
    %81 = arith.truncf %80 : vector<8x8xf32> to vector<8x8xbf16>
    %82 = vector.extract_strided_slice %23 {offsets = [0, 16], sizes = [8, 8], strides = [1, 1]} : vector<8x32xbf16> to vector<8x8xbf16>
    %cst_35 = arith.constant dense<0.000000e+00> : vector<8x8xf32>
    %83 = tpu.matmul %81, %82, %cst_35 {dimension_numbers = #tpu.dot_dimension_numbers<[1], [0], [0], [1], [0, 0, 1, 1], [], []>} : vector<8x8xbf16>, vector<8x8xbf16>, vector<8x8xf32> -> vector<8x8xf32>
    %84 = arith.truncf %83 : vector<8x8xf32> to vector<8x8xbf16>
    %85 = vector.extract_strided_slice %21 {offsets = [0, 24], sizes = [8, 8], strides = [1, 1]} : vector<8x32xbf16> to vector<8x8xbf16>
    %86 = vector.extract_strided_slice %22 {offsets = [0, 24], sizes = [8, 8], strides = [1, 1]} : vector<8x32xbf16> to vector<8x8xbf16>
    %cst_36 = arith.constant dense<0.000000e+00> : vector<8x8xf32>
    %87 = tpu.matmul %85, %86, %cst_36 {dimension_numbers = #tpu.dot_dimension_numbers<[1], [1], [0], [0], [0, 0, 1, 0], [], []>} : vector<8x8xbf16>, vector<8x8xbf16>, vector<8x8xf32> -> vector<8x8xf32>
    %88 = vector.broadcast %27 : vector<1x8xf32> to vector<8x8xf32>
    %89 = arith.addf %87, %88 : vector<8x8xf32>
    %cst_37 = arith.constant dense<0xFF800000> : vector<8xf32>
    %90 = vector.multi_reduction <maximumf>, %89, %cst_37 [1] : vector<8x8xf32> to vector<8xf32>
    %91 = vector.shape_cast %90 : vector<8xf32> to vector<8x1xf32>
    %92 = vector.broadcast %91 : vector<8x1xf32> to vector<8x8xf32>
    %93 = arith.subf %89, %92 : vector<8x8xf32>
    %94 = math.exp %93 : vector<8x8xf32>
    %cst_38 = arith.constant dense<0.000000e+00> : vector<8xf32>
    %95 = vector.multi_reduction <add>, %94, %cst_38 [1] : vector<8x8xf32> to vector<8xf32>
    %96 = vector.shape_cast %95 : vector<8xf32> to vector<8x1xf32>
    %97 = tpu.reciprocal %96 {approx = true} : vector<8x1xf32> -> vector<8x1xf32>
    %98 = vector.broadcast %97 : vector<8x1xf32> to vector<8x8xf32>
    %99 = arith.mulf %94, %98 : vector<8x8xf32>
    %100 = arith.truncf %99 : vector<8x8xf32> to vector<8x8xbf16>
    %101 = vector.extract_strided_slice %23 {offsets = [0, 24], sizes = [8, 8], strides = [1, 1]} : vector<8x32xbf16> to vector<8x8xbf16>
    %cst_39 = arith.constant dense<0.000000e+00> : vector<8x8xf32>
    %102 = tpu.matmul %100, %101, %cst_39 {dimension_numbers = #tpu.dot_dimension_numbers<[1], [0], [0], [1], [0, 0, 1, 1], [], []>} : vector<8x8xbf16>, vector<8x8xbf16>, vector<8x8xf32> -> vector<8x8xf32>
    %103 = arith.truncf %102 : vector<8x8xf32> to vector<8x8xbf16>
    %104 = tpu.concatenate %46, %65, %84, %103 in 1 : vector<8x8xbf16>, vector<8x8xbf16>, vector<8x8xbf16>, vector<8x8xbf16> -> vector<8x32xbf16>
    %c0_40 = arith.constant 0 : index
    %c0_41 = arith.constant 0 : index
    %105 = vector.load %arg10[%c0_40, %c0_41] : memref<32x32xbf16, #tpu.memory_space<vmem>>, vector<32x32xbf16>
    %cst_42 = arith.constant dense<0.000000e+00> : vector<8x32xf32>
    %106 = tpu.matmul %104, %105, %cst_42 {dimension_numbers = #tpu.dot_dimension_numbers<[1], [0], [0], [1], [0, 0, 1, 1], [], []>} : vector<8x32xbf16>, vector<32x32xbf16>, vector<8x32xf32> -> vector<8x32xf32>
    %c0_43 = arith.constant 0 : index
    %c0_44 = arith.constant 0 : index
    %107 = vector.load %arg11[%c0_43, %c0_44] : memref<1x32xf32, #tpu.memory_space<vmem>>, vector<1x32xf32>
    %108 = vector.broadcast %107 : vector<1x32xf32> to vector<8x32xf32>
    %109 = arith.addf %106, %108 : vector<8x32xf32>
    %110 = arith.extf %1 : vector<8x32xbf16> to vector<8x32xf32>
    %111 = arith.addf %110, %109 : vector<8x32xf32>
    %c0_45 = arith.constant 0 : index
    %c0_46 = arith.constant 0 : index
    %112 = vector.load %arg12[%c0_45, %c0_46] : memref<1x32xf32, #tpu.memory_space<vmem>>, vector<1x32xf32>
    %c0_47 = arith.constant 0 : index
    %c0_48 = arith.constant 0 : index
    %113 = vector.load %arg13[%c0_47, %c0_48] : memref<1x32xf32, #tpu.memory_space<vmem>>, vector<1x32xf32>
    %cst_49 = arith.constant dense<0.000000e+00> : vector<8xf32>
    %114 = vector.multi_reduction <add>, %111, %cst_49 [1] : vector<8x32xf32> to vector<8xf32>
    %115 = vector.shape_cast %114 : vector<8xf32> to vector<8x1xf32>
    %cst_50 = arith.constant 3.200000e+01 : f32
    %116 = vector.broadcast %cst_50 : f32 to vector<8x1xf32>
    %117 = arith.divf %115, %116 : vector<8x1xf32>
    %118 = vector.broadcast %117 : vector<8x1xf32> to vector<8x32xf32>
    %119 = arith.subf %111, %118 : vector<8x32xf32>
    %120 = arith.mulf %119, %119 : vector<8x32xf32>
    %cst_51 = arith.constant dense<0.000000e+00> : vector<8xf32>
    %121 = vector.multi_reduction <add>, %120, %cst_51 [1] : vector<8x32xf32> to vector<8xf32>
    %122 = vector.shape_cast %121 : vector<8xf32> to vector<8x1xf32>
    %cst_52 = arith.constant 3.200000e+01 : f32
    %123 = vector.broadcast %cst_52 : f32 to vector<8x1xf32>
    %124 = arith.divf %122, %123 : vector<8x1xf32>
    %125 = vector.broadcast %117 : vector<8x1xf32> to vector<8x32xf32>
    %126 = arith.subf %111, %125 : vector<8x32xf32>
    %cst_53 = arith.constant 9.99999974E-6 : f32
    %127 = vector.broadcast %cst_53 : f32 to vector<8x1xf32>
    %128 = arith.addf %124, %127 : vector<8x1xf32>
    %129 = math.rsqrt %128 : vector<8x1xf32>
    %130 = vector.broadcast %129 : vector<8x1xf32> to vector<8x32xf32>
    %131 = arith.mulf %126, %130 : vector<8x32xf32>
    %132 = vector.broadcast %112 : vector<1x32xf32> to vector<8x32xf32>
    %133 = arith.mulf %131, %132 : vector<8x32xf32>
    %134 = vector.broadcast %113 : vector<1x32xf32> to vector<8x32xf32>
    %135 = arith.addf %133, %134 : vector<8x32xf32>
    %136 = arith.truncf %135 : vector<8x32xf32> to vector<8x32xbf16>
    %c0_54 = arith.constant 0 : index
    %c0_55 = arith.constant 0 : index
    %137 = vector.load %arg14[%c0_54, %c0_55] : memref<32x64xbf16, #tpu.memory_space<vmem>>, vector<32x64xbf16>
    %cst_56 = arith.constant dense<0.000000e+00> : vector<8x64xf32>
    %138 = tpu.matmul %136, %137, %cst_56 {dimension_numbers = #tpu.dot_dimension_numbers<[1], [0], [0], [1], [0, 0, 1, 1], [], []>} : vector<8x32xbf16>, vector<32x64xbf16>, vector<8x64xf32> -> vector<8x64xf32>
    %c0_57 = arith.constant 0 : index
    %c0_58 = arith.constant 0 : index
    %139 = vector.load %arg15[%c0_57, %c0_58] : memref<1x64xf32, #tpu.memory_space<vmem>>, vector<1x64xf32>
    %140 = vector.broadcast %139 : vector<1x64xf32> to vector<8x64xf32>
    %141 = arith.addf %138, %140 : vector<8x64xf32>
    %cst_59 = arith.constant 0.000000e+00 : f32
    %142 = vector.broadcast %cst_59 : f32 to vector<8x64xf32>
    %143 = arith.maximumf %141, %142 : vector<8x64xf32>
    %144 = arith.truncf %143 : vector<8x64xf32> to vector<8x64xbf16>
    %c0_60 = arith.constant 0 : index
    %c0_61 = arith.constant 0 : index
    %145 = vector.load %arg16[%c0_60, %c0_61] : memref<64x32xbf16, #tpu.memory_space<vmem>>, vector<64x32xbf16>
    %cst_62 = arith.constant dense<0.000000e+00> : vector<8x32xf32>
    %146 = tpu.matmul %144, %145, %cst_62 {dimension_numbers = #tpu.dot_dimension_numbers<[1], [0], [0], [1], [0, 0, 1, 1], [], []>} : vector<8x64xbf16>, vector<64x32xbf16>, vector<8x32xf32> -> vector<8x32xf32>
    %c0_63 = arith.constant 0 : index
    %c0_64 = arith.constant 0 : index
    %147 = vector.load %arg17[%c0_63, %c0_64] : memref<1x32xf32, #tpu.memory_space<vmem>>, vector<1x32xf32>
    %148 = vector.broadcast %147 : vector<1x32xf32> to vector<8x32xf32>
    %149 = arith.addf %146, %148 : vector<8x32xf32>
    %150 = arith.addf %135, %149 : vector<8x32xf32>
    %c0_65 = arith.constant 0 : index
    %c0_66 = arith.constant 0 : index
    %151 = vector.load %arg18[%c0_65, %c0_66] : memref<1x32xf32, #tpu.memory_space<vmem>>, vector<1x32xf32>
    %c0_67 = arith.constant 0 : index
    %c0_68 = arith.constant 0 : index
    %152 = vector.load %arg19[%c0_67, %c0_68] : memref<1x32xf32, #tpu.memory_space<vmem>>, vector<1x32xf32>
    %cst_69 = arith.constant dense<0.000000e+00> : vector<8xf32>
    %153 = vector.multi_reduction <add>, %150, %cst_69 [1] : vector<8x32xf32> to vector<8xf32>
    %154 = vector.shape_cast %153 : vector<8xf32> to vector<8x1xf32>
    %cst_70 = arith.constant 3.200000e+01 : f32
    %155 = vector.broadcast %cst_70 : f32 to vector<8x1xf32>
    %156 = arith.divf %154, %155 : vector<8x1xf32>
    %157 = vector.broadcast %156 : vector<8x1xf32> to vector<8x32xf32>
    %158 = arith.subf %150, %157 : vector<8x32xf32>
    %159 = arith.mulf %158, %158 : vector<8x32xf32>
    %cst_71 = arith.constant dense<0.000000e+00> : vector<8xf32>
    %160 = vector.multi_reduction <add>, %159, %cst_71 [1] : vector<8x32xf32> to vector<8xf32>
    %161 = vector.shape_cast %160 : vector<8xf32> to vector<8x1xf32>
    %cst_72 = arith.constant 3.200000e+01 : f32
    %162 = vector.broadcast %cst_72 : f32 to vector<8x1xf32>
    %163 = arith.divf %161, %162 : vector<8x1xf32>
    %164 = vector.broadcast %156 : vector<8x1xf32> to vector<8x32xf32>
    %165 = arith.subf %150, %164 : vector<8x32xf32>
    %cst_73 = arith.constant 9.99999974E-6 : f32
    %166 = vector.broadcast %cst_73 : f32 to vector<8x1xf32>
    %167 = arith.addf %163, %166 : vector<8x1xf32>
    %168 = math.rsqrt %167 : vector<8x1xf32>
    %169 = vector.broadcast %168 : vector<8x1xf32> to vector<8x32xf32>
    %170 = arith.mulf %165, %169 : vector<8x32xf32>
    %171 = vector.broadcast %151 : vector<1x32xf32> to vector<8x32xf32>
    %172 = arith.mulf %170, %171 : vector<8x32xf32>
    %173 = vector.broadcast %152 : vector<1x32xf32> to vector<8x32xf32>
    %174 = arith.addf %172, %173 : vector<8x32xf32>
    %175 = vector.broadcast %5 : vector<8x1xf32> to vector<8x32xf32>
    %176 = arith.mulf %174, %175 : vector<8x32xf32>
    %177 = arith.truncf %176 : vector<8x32xf32> to vector<8x32xbf16>
    %c0_74 = arith.constant 0 : index
    %c0_75 = arith.constant 0 : index
    %c0_76 = arith.constant 0 : index
    %178 = vector.load %arg20[%c0_74, %c0_75, %c0_76] : memref<1x8x32xbf16, #tpu.memory_space<vmem>>, vector<1x8x32xbf16>
    %179 = vector.shape_cast %178 : vector<1x8x32xbf16> to vector<8x32xbf16>
    %180 = vector.shape_cast %177 : vector<8x32xbf16> to vector<1x8x32xbf16>
    tpu.vector_store %arg20[%c0_74, %c0_75, %c0_76], %180 {strides = array<i32>} : memref<1x8x32xbf16, #tpu.memory_space<vmem>>, vector<1x8x32xbf16>,
    %cst_77 = arith.constant dense<0.000000e+00> : vector<32xf32>
    %181 = vector.multi_reduction <add>, %176, %cst_77 [0] : vector<8x32xf32> to vector<32xf32>
    %182 = vector.shape_cast %181 : vector<32xf32> to vector<1x32xf32>
    %c0_78 = arith.constant 0 : index
    %c0_79 = arith.constant 0 : index
    %c0_80 = arith.constant 0 : index
    %183 = vector.load %arg21[%c0_78, %c0_79, %c0_80] : memref<1x1x32xf32, #tpu.memory_space<vmem>>, vector<1x1x32xf32>
    %184 = vector.shape_cast %183 : vector<1x1x32xf32> to vector<1x32xf32>
    %185 = vector.shape_cast %182 : vector<1x32xf32> to vector<1x1x32xf32>
    tpu.vector_store %arg21[%c0_78, %c0_79, %c0_80], %185 {strides = array<i32>} : memref<1x1x32xf32, #tpu.memory_space<vmem>>, vector<1x1x32xf32>,
    return
  }
  func.func @transform_0(%arg0: i32) -> (i32, i32, i32) {
    %c0_i32 = arith.constant 0 : i32
    %c0_i32_0 = arith.constant 0 : i32
    %c0_i32_1 = arith.constant 0 : i32
    return %arg0, %c0_i32, %c0_i32_0 : i32, i32, i32
  }
  func.func @transform_1(%arg0: i32) -> (i32, i32, i32) {
    %c0_i32 = arith.constant 0 : i32
    %c0_i32_0 = arith.constant 0 : i32
    %c0_i32_1 = arith.constant 0 : i32
    return %arg0, %c0_i32, %c0_i32_0 : i32, i32, i32
  }
  func.func @transform_2(%arg0: i32) -> (i32, i32, i32) {
    %c0_i32 = arith.constant 0 : i32
    %c0_i32_0 = arith.constant 0 : i32
    %c0_i32_1 = arith.constant 0 : i32
    return %arg0, %c0_i32, %c0_i32_0 : i32, i32, i32
  }
  func.func @transform_3(%arg0: i32) -> (i32, i32) {
    %c0_i32 = arith.constant 0 : i32
    %c0_i32_0 = arith.constant 0 : i32
    %c0_i32_1 = arith.constant 0 : i32
    return %c0_i32, %c0_i32_0 : i32, i32
  }
  func.func @transform_4(%arg0: i32) -> (i32, i32) {
    %c0_i32 = arith.constant 0 : i32
    %c0_i32_0 = arith.constant 0 : i32
    %c0_i32_1 = arith.constant 0 : i32
    return %c0_i32, %c0_i32_0 : i32, i32
  }
  func.func @transform_5(%arg0: i32) -> (i32, i32) {
    %c0_i32 = arith.constant 0 : i32
    %c0_i32_0 = arith.constant 0 : i32
    %c0_i32_1 = arith.constant 0 : i32
    return %c0_i32, %c0_i32_0 : i32, i32
  }
  func.func @transform_6(%arg0: i32) -> (i32, i32) {
    %c0_i32 = arith.constant 0 : i32
    %c0_i32_0 = arith.constant 0 : i32
    %c0_i32_1 = arith.constant 0 : i32
    return %c0_i32, %c0_i32_0 : i32, i32
  }
  func.func @transform_7(%arg0: i32) -> (i32, i32) {
    %c0_i32 = arith.constant 0 : i32
    %c0_i32_0 = arith.constant 0 : i32
    %c0_i32_1 = arith.constant 0 : i32
    return %c0_i32, %c0_i32_0 : i32, i32
  }
  func.func @transform_8(%arg0: i32) -> (i32, i32) {
    %c0_i32 = arith.constant 0 : i32
    %c0_i32_0 = arith.constant 0 : i32
    %c0_i32_1 = arith.constant 0 : i32
    return %c0_i32, %c0_i32_0 : i32, i32
  }
  func.func @transform_9(%arg0: i32) -> (i32, i32) {
    %c0_i32 = arith.constant 0 : i32
    %c0_i32_0 = arith.constant 0 : i32
    %c0_i32_1 = arith.constant 0 : i32
    return %c0_i32, %c0_i32_0 : i32, i32
  }
  func.func @transform_10(%arg0: i32) -> (i32, i32) {
    %c0_i32 = arith.constant 0 : i32
    %c0_i32_0 = arith.constant 0 : i32
    %c0_i32_1 = arith.constant 0 : i32
    return %c0_i32, %c0_i32_0 : i32, i32
  }
  func.func @transform_11(%arg0: i32) -> (i32, i32) {
    %c0_i32 = arith.constant 0 : i32
    %c0_i32_0 = arith.constant 0 : i32
    %c0_i32_1 = arith.constant 0 : i32
    return %c0_i32, %c0_i32_0 : i32, i32
  }
  func.func @transform_12(%arg0: i32) -> (i32, i32) {
    %c0_i32 = arith.constant 0 : i32
    %c0_i32_0 = arith.constant 0 : i32
    %c0_i32_1 = arith.constant 0 : i32
    return %c0_i32, %c0_i32_0 : i32, i32
  }
  func.func @transform_13(%arg0: i32) -> (i32, i32) {
    %c0_i32 = arith.constant 0 : i32
    %c0_i32_0 = arith.constant 0 : i32
    %c0_i32_1 = arith.constant 0 : i32
    return %c0_i32, %c0_i32_0 : i32, i32
  }
  func.func @transform_14(%arg0: i32) -> (i32, i32) {
    %c0_i32 = arith.constant 0 : i32
    %c0_i32_0 = arith.constant 0 : i32
    %c0_i32_1 = arith.constant 0 : i32
    return %c0_i32, %c0_i32_0 : i32, i32
  }
  func.func @transform_15(%arg0: i32) -> (i32, i32) {
    %c0_i32 = arith.constant 0 : i32
    %c0_i32_0 = arith.constant 0 : i32
    %c0_i32_1 = arith.constant 0 : i32
    return %c0_i32, %c0_i32_0 : i32, i32
  }
  func.func @transform_16(%arg0: i32) -> (i32, i32) {
    %c0_i32 = arith.constant 0 : i32
    %c0_i32_0 = arith.constant 0 : i32
    %c0_i32_1 = arith.constant 0 : i32
    return %c0_i32, %c0_i32_0 : i32, i32
  }
  func.func @transform_17(%arg0: i32) -> (i32, i32) {
    %c0_i32 = arith.constant 0 : i32
    %c0_i32_0 = arith.constant 0 : i32
    %c0_i32_1 = arith.constant 0 : i32
    return %c0_i32, %c0_i32_0 : i32, i32
  }
  func.func @transform_18(%arg0: i32) -> (i32, i32) {
    %c0_i32 = arith.constant 0 : i32
    %c0_i32_0 = arith.constant 0 : i32
    %c0_i32_1 = arith.constant 0 : i32
    return %c0_i32, %c0_i32_0 : i32, i32
  }
  func.func @transform_19(%arg0: i32) -> (i32, i32, i32) {
    %c0_i32 = arith.constant 0 : i32
    %c0_i32_0 = arith.constant 0 : i32
    %c0_i32_1 = arith.constant 0 : i32
    return %arg0, %c0_i32, %c0_i32_0 : i32, i32, i32
  }
  func.func @transform_20(%arg0: i32) -> (i32, i32, i32) {
    %c0_i32 = arith.constant 0 : i32
    %c0_i32_0 = arith.constant 0 : i32
    %c0_i32_1 = arith.constant 0 : i32
    return %arg0, %c0_i32, %c0_i32_0 : i32, i32, i32
  }
}

module attributes {stable_mosaic.version = 11 : i64} {
  func.func @_encoder_layer_kernel(%arg0: i32, %arg1: memref<1x8x32xbf16, #tpu.memory_space<vmem>>, %arg2: memref<1x1x8xf32, #tpu.memory_space<vmem>>, %arg3: memref<1x8x1xf32, #tpu.memory_space<vmem>>, %arg4: memref<32x32xbf16, #tpu.memory_space<vmem>>, %arg5: memref<1x32xf32, #tpu.memory_space<vmem>>, %arg6: memref<32x32xbf16, #tpu.memory_space<vmem>>, %arg7: memref<1x32xf32, #tpu.memory_space<vmem>>, %arg8: memref<32x32xbf16, #tpu.memory_space<vmem>>, %arg9: memref<1x32xf32, #tpu.memory_space<vmem>>, %arg10: memref<32x32xbf16, #tpu.memory_space<vmem>>, %arg11: memref<1x32xf32, #tpu.memory_space<vmem>>, %arg12: memref<1x32xf32, #tpu.memory_space<vmem>>, %arg13: memref<1x32xf32, #tpu.memory_space<vmem>>, %arg14: memref<32x64xbf16, #tpu.memory_space<vmem>>, %arg15: memref<1x64xf32, #tpu.memory_space<vmem>>, %arg16: memref<64x32xbf16, #tpu.memory_space<vmem>>, %arg17: memref<1x32xf32, #tpu.memory_space<vmem>>, %arg18: memref<1x32xf32, #tpu.memory_space<vmem>>, %arg19: memref<1x32xf32, #tpu.memory_space<vmem>>, %arg20: memref<1x8x32xbf16, #tpu.memory_space<vmem>>, %arg21: memref<1x1x32xf32, #tpu.memory_space<vmem>>) attributes {dimension_semantics = [#tpu.dimension_semantics<parallel>], iteration_bounds = array<i64: 2>, scalar_prefetch = 0 : i64, scratch_operands = 0 : i64, tpu.core_type = #tpu.core_type<tc>, window_params = [{transform_indices = @transform_0, window_bounds = array<i64: 1, 8, 32>}, {transform_indices = @transform_1, window_bounds = array<i64: 1, 1, 8>}, {transform_indices = @transform_2, window_bounds = array<i64: 1, 8, 1>}, {pipeline_mode = #tpu.pipeline_mode<synchronous>, transform_indices = @transform_3, window_bounds = array<i64: 32, 32>}, {pipeline_mode = #tpu.pipeline_mode<synchronous>, transform_indices = @transform_4, window_bounds = array<i64: 1, 32>}, {pipeline_mode = #tpu.pipeline_mode<synchronous>, transform_indices = @transform_5, window_bounds = array<i64: 32, 32>}, {pipeline_mode = #tpu.pipeline_mode<synchronous>, transform_indices = @transform_6, window_bounds = array<i64: 1, 32>}, {pipeline_mode = #tpu.pipeline_mode<synchronous>, transform_indices = @transform_7, window_bounds = array<i64: 32, 32>}, {pipeline_mode = #tpu.pipeline_mode<synchronous>, transform_indices = @transform_8, window_bounds = array<i64: 1, 32>}, {pipeline_mode = #tpu.pipeline_mode<synchronous>, transform_indices = @transform_9, window_bounds = array<i64: 32, 32>}, {pipeline_mode = #tpu.pipeline_mode<synchronous>, transform_indices = @transform_10, window_bounds = array<i64: 1, 32>}, {pipeline_mode = #tpu.pipeline_mode<synchronous>, transform_indices = @transform_11, window_bounds = array<i64: 1, 32>}, {pipeline_mode = #tpu.pipeline_mode<synchronous>, transform_indices = @transform_12, window_bounds = array<i64: 1, 32>}, {pipeline_mode = #tpu.pipeline_mode<synchronous>, transform_indices = @transform_13, window_bounds = array<i64: 32, 64>}, {pipeline_mode = #tpu.pipeline_mode<synchronous>, transform_indices = @transform_14, window_bounds = array<i64: 1, 64>}, {pipeline_mode = #tpu.pipeline_mode<synchronous>, transform_indices = @transform_15, window_bounds = array<i64: 64, 32>}, {pipeline_mode = #tpu.pipeline_mode<synchronous>, transform_indices = @transform_16, window_bounds = array<i64: 1, 32>}, {pipeline_mode = #tpu.pipeline_mode<synchronous>, transform_indices = @transform_17, window_bounds = array<i64: 1, 32>}, {pipeline_mode = #tpu.pipeline_mode<synchronous>, transform_indices = @transform_18, window_bounds = array<i64: 1, 32>}, {transform_indices = @transform_19, window_bounds = array<i64: 1, 8, 32>}, {transform_indices = @transform_20, window_bounds = array<i64: 1, 1, 32>}]} {
    %c0 = arith.constant 0 : index
    %c0_0 = arith.constant 0 : index
    %c0_1 = arith.constant 0 : index
    %0 = vector.load %arg1[%c0, %c0_0, %c0_1] : memref<1x8x32xbf16, #tpu.memory_space<vmem>>, vector<1x8x32xbf16>
    %1 = vector.shape_cast %0 : vector<1x8x32xbf16> to vector<8x32xbf16>
    %c0_2 = arith.constant 0 : index
    %c0_3 = arith.constant 0 : index
    %c0_4 = arith.constant 0 : index
    %2 = vector.load %arg2[%c0_2, %c0_3, %c0_4] : memref<1x1x8xf32, #tpu.memory_space<vmem>>, vector<1x1x8xf32>
    %3 = vector.shape_cast %2 : vector<1x1x8xf32> to vector<1x8xf32>
    %c0_5 = arith.constant 0 : index
    %c0_6 = arith.constant 0 : index
    %c0_7 = arith.constant 0 : index
    %4 = vector.load %arg3[%c0_5, %c0_6, %c0_7] : memref<1x8x1xf32, #tpu.memory_space<vmem>>, vector<1x8x1xf32>
    %5 = vector.shape_cast %4 : vector<1x8x1xf32> to vector<8x1xf32>
    %c0_8 = arith.constant 0 : index
    %c0_9 = arith.constant 0 : index
    %6 = vector.load %arg4[%c0_8, %c0_9] : memref<32x32xbf16, #tpu.memory_space<vmem>>, vector<32x32xbf16>
    %cst = arith.constant dense<0.000000e+00> : vector<8x32xf32>
    %7 = tpu.matmul %1, %6, %cst {dimension_numbers = #tpu.dot_dimension_numbers<[1], [0], [0], [1], [0, 0, 1, 1], [], []>} : vector<8x32xbf16>, vector<32x32xbf16>, vector<8x32xf32> -> vector<8x32xf32>
    %c0_10 = arith.constant 0 : index
    %c0_11 = arith.constant 0 : index
    %8 = vector.load %arg5[%c0_10, %c0_11] : memref<1x32xf32, #tpu.memory_space<vmem>>, vector<1x32xf32>
    %9 = vector.broadcast %8 : vector<1x32xf32> to vector<8x32xf32>
    %10 = arith.addf %7, %9 : vector<8x32xf32>
    %c0_12 = arith.constant 0 : index
    %c0_13 = arith.constant 0 : index
    %11 = vector.load %arg6[%c0_12, %c0_13] : memref<32x32xbf16, #tpu.memory_space<vmem>>, vector<32x32xbf16>
    %cst_14 = arith.constant dense<0.000000e+00> : vector<8x32xf32>
    %12 = tpu.matmul %1, %11, %cst_14 {dimension_numbers = #tpu.dot_dimension_numbers<[1], [0], [0], [1], [0, 0, 1, 1], [], []>} : vector<8x32xbf16>, vector<32x32xbf16>, vector<8x32xf32> -> vector<8x32xf32>
    %c0_15 = arith.constant 0 : index
    %c0_16 = arith.constant 0 : index
    %13 = vector.load %arg7[%c0_15, %c0_16] : memref<1x32xf32, #tpu.memory_space<vmem>>, vector<1x32xf32>
    %14 = vector.broadcast %13 : vector<1x32xf32> to vector<8x32xf32>
    %15 = arith.addf %12, %14 : vector<8x32xf32>
    %c0_17 = arith.constant 0 : index
    %c0_18 = arith.constant 0 : index
    %16 = vector.load %arg8[%c0_17, %c0_18] : memref<32x32xbf16, #tpu.memory_space<vmem>>, vector<32x32xbf16>
    %cst_19 = arith.constant dense<0.000000e+00> : vector<8x32xf32>
    %17 = tpu.matmul %1, %16, %cst_19 {dimension_numbers = #tpu.dot_dimension_numbers<[1], [0], [0], [1], [0, 0, 1, 1], [], []>} : vector<8x32xbf16>, vector<32x32xbf16>, vector<8x32xf32> -> vector<8x32xf32>
    %c0_20 = arith.constant 0 : index
    %c0_21 = arith.constant 0 : index
    %18 = vector.load %arg9[%c0_20, %c0_21] : memref<1x32xf32, #tpu.memory_space<vmem>>, vector<1x32xf32>
    %19 = vector.broadcast %18 : vector<1x32xf32> to vector<8x32xf32>
    %20 = arith.addf %17, %19 : vector<8x32xf32>
    %21 = arith.truncf %10 : vector<8x32xf32> to vector<8x32xbf16>
    %22 = arith.truncf %15 : vector<8x32xf32> to vector<8x32xbf16>
    %23 = arith.truncf %20 : vector<8x32xf32> to vector<8x32xbf16>
    %cst_22 = arith.constant 1.000000e+00 : f32
    %24 = vector.broadcast %cst_22 : f32 to vector<1x8xf32>
    %25 = arith.subf %3, %24 : vector<1x8xf32>
    %cst_23 = arith.constant 1.000000e+20 : f32
    %26 = vector.broadcast %cst_23 : f32 to vector<1x8xf32>
    %27 = arith.mulf %25, %26 : vector<1x8xf32>
    %28 = vector.extract_strided_slice %21 {offsets = [0, 0], sizes = [8, 8], strides = [1, 1]} : vector<8x32xbf16> to vector<8x8xbf16>
    %29 = vector.extract_strided_slice %22 {offsets = [0, 0], sizes = [8, 8], strides = [1, 1]} : vector<8x32xbf16> to vector<8x8xbf16>
    %cst_24 = arith.constant dense<0.000000e+00> : vector<8x8xf32>
    %30 = tpu.matmul %28, %29, %cst_24 {dimension_numbers = #tpu.dot_dimension_numbers<[1], [1], [0], [0], [0, 0, 1, 0], [], []>} : vector<8x8xbf16>, vector<8x8xbf16>, vector<8x8xf32> -> vector<8x8xf32>
    %31 = vector.broadcast %27 : vector<1x8xf32> to vector<8x8xf32>
    %32 = arith.addf %30, %31 : vector<8x8xf32>
    %cst_25 = arith.constant dense<0xFF800000> : vector<8xf32>
    %33 = vector.multi_reduction <maximumf>, %32, %cst_25 [1] : vector<8x8xf32> to vector<8xf32>
    %34 = vector.shape_cast %33 : vector<8xf32> to vector<8x1xf32>
    %35 = vector.broadcast %34 : vector<8x1xf32> to vector<8x8xf32>
    %36 = arith.subf %32, %35 : vector<8x8xf32>
    %37 = math.exp %36 : vector<8x8xf32>
    %cst_26 = arith.constant dense<0.000000e+00> : vector<8xf32>
    %38 = vector.multi_reduction <add>, %37, %cst_26 [1] : vector<8x8xf32> to vector<8xf32>
    %39 = vector.shape_cast %38 : vector<8xf32> to vector<8x1xf32>
    %40 = tpu.reciprocal %39 {approx = true} : vector<8x1xf32> -> vector<8x1xf32>
    %41 = vector.broadcast %40 : vector<8x1xf32> to vector<8x8xf32>
    %42 = arith.mulf %37, %41 : vector<8x8xf32>
    %43 = arith.truncf %42 : vector<8x8xf32> to vector<8x8xbf16>
    %44 = vector.extract_strided_slice %23 {offsets = [0, 0], sizes = [8, 8], strides = [1, 1]} : vector<8x32xbf16> to vector<8x8xbf16>
    %cst_27 = arith.constant dense<0.000000e+00> : vector<8x8xf32>
    %45 = tpu.matmul %43, %44, %cst_27 {dimension_numbers = #tpu.dot_dimension_numbers<[1], [0], [0], [1], [0, 0, 1, 1], [], []>} : vector<8x8xbf16>, vector<8x8xbf16>, vector<8x8xf32> -> vector<8x8xf32>
    %46 = arith.truncf %45 : vector<8x8xf32> to vector<8x8xbf16>
    %47 = vector.extract_strided_slice %21 {offsets = [0, 8], sizes = [8, 8], strides = [1, 1]} : vector<8x32xbf16> to vector<8x8xbf16>
    %48 = vector.extract_strided_slice %22 {offsets = [0, 8], sizes = [8, 8], strides = [1, 1]} : vector<8x32xbf16> to vector<8x8xbf16>
    %cst_28 = arith.constant dense<0.000000e+00> : vector<8x8xf32>
    %49 = tpu.matmul %47, %48, %cst_28 {dimension_numbers = #tpu.dot_dimension_numbers<[1], [1], [0], [0], [0, 0, 1, 0], [], []>} : vector<8x8xbf16>, vector<8x8xbf16>, vector<8x8xf32> -> vector<8x8xf32>
    %50 = vector.broadcast %27 : vector<1x8xf32> to vector<8x8xf32>
    %51 = arith.addf %49, %50 : vector<8x8xf32>
    %cst_29 = arith.constant dense<0xFF800000> : vector<8xf32>
    %52 = vector.multi_reduction <maximumf>, %51, %cst_29 [1] : vector<8x8xf32> to vector<8xf32>
    %53 = vector.shape_cast %52 : vector<8xf32> to vector<8x1xf32>
    %54 = vector.broadcast %53 : vector<8x1xf32> to vector<8x8xf32>
    %55 = arith.subf %51, %54 : vector<8x8xf32>
    %56 = math.exp %55 : vector<8x8xf32>
    %cst_30 = arith.constant dense<0.000000e+00> : vector<8xf32>
    %57 = vector.multi_reduction <add>, %56, %cst_30 [1] : vector<8x8xf32> to vector<8xf32>
    %58 = vector.shape_cast %57 : vector<8xf32> to vector<8x1xf32>
    %59 = tpu.reciprocal %58 {approx = true} : vector<8x1xf32> -> vector<8x1xf32>
    %60 = vector.broadcast %59 : vector<8x1xf32> to vector<8x8xf32>
    %61 = arith.mulf %56, %60 : vector<8x8xf32>
    %62 = arith.truncf %61 : vector<8x8xf32> to vector<8x8xbf16>
    %63 = vector.extract_strided_slice %23 {offsets = [0, 8], sizes = [8, 8], strides = [1, 1]} : vector<8x32xbf16> to vector<8x8xbf16>
    %cst_31 = arith.constant dense<0.000000e+00> : vector<8x8xf32>
    %64 = tpu.matmul %62, %63, %cst_31 {dimension_numbers = #tpu.dot_dimension_numbers<[1], [0], [0], [1], [0, 0, 1, 1], [], []>} : vector<8x8xbf16>, vector<8x8xbf16>, vector<8x8xf32> -> vector<8x8xf32>
    %65 = arith.truncf %64 : vector<8x8xf32> to vector<8x8xbf16>
    %66 = vector.extract_strided_slice %21 {offsets = [0, 16], sizes = [8, 8], strides = [1, 1]} : vector<8x32xbf16> to vector<8x8xbf16>
    %67 = vector.extract_strided_slice %22 {offsets = [0, 16], sizes = [8, 8], strides = [1, 1]} : vector<8x32xbf16> to vector<8x8xbf16>
    %cst_32 = arith.constant dense<0.000000e+00> : vector<8x8xf32>
    %68 = tpu.matmul %66, %67, %cst_32 {dimension_numbers = #tpu.dot_dimension_numbers<[1], [1], [0], [0], [0, 0, 1, 0], [], []>} : vector<8x8xbf16>, vector<8x8xbf16>, vector<8x8xf32> -> vector<8x8xf32>
    %69 = vector.broadcast %27 : vector<1x8xf32> to vector<8x8xf32>
    %70 = arith.addf %68, %69 : vector<8x8xf32>
    %cst_33 = arith.constant dense<0xFF800000> : vector<8xf32>
    %71 = vector.multi_reduction <maximumf>, %70, %cst_33 [1] : vector<8x8xf32> to vector<8xf32>
    %72 = vector.shape_cast %71 : vector<8xf32> to vector<8x1xf32>
    %73 = vector.broadcast %72 : vector<8x1xf32> to vector<8x8xf32>
    %74 = arith.subf %70, %73 : vector<8x8xf32>
    %75 = math.exp %74 : vector<8x8xf32>
    %cst_34 = arith.constant dense<0.000000e+00> : vector<8xf32>
    %76 = vector.multi_reduction <add>, %75, %cst_34 [1] : vector<8x8xf32> to vector<8xf32>
    %77 = vector.shape_cast %76 : vector<8xf32> to vector<8x1xf32>
    %78 = tpu.reciprocal %77 {approx = true} : vector<8x1xf32> -> vector<8x1xf32>
    %79 = vector.broadcast %78 : vector<8x1xf32> to vector<8x8xf32>
    %80 = arith.mulf %75, %79 : vector<8x8xf32>
    %81 = arith.truncf %80 : vector<8x8xf32> to vector<8x8xbf16>
    %82 = vector.extract_strided_slice %23 {offsets = [0, 16], sizes = [8, 8], strides = [1, 1]} : vector<8x32xbf16> to vector<8x8xbf16>
    %cst_35 = arith.constant dense<0.000000e+00> : vector<8x8xf32>
    %83 = tpu.matmul %81, %82, %cst_35 {dimension_numbers = #tpu.dot_dimension_numbers<[1], [0], [0], [1], [0, 0, 1, 1], [], []>} : vector<8x8xbf16>, vector<8x8xbf16>, vector<8x8xf32> -> vector<8x8xf32>
    %84 = arith.truncf %83 : vector<8x8xf32> to vector<8x8xbf16>
    %85 = vector.extract_strided_slice %21 {offsets = [0, 24], sizes = [8, 8], strides = [1, 1]} : vector<8x32xbf16> to vector<8x8xbf16>
    %86 = vector.extract_strided_slice %22 {offsets = [0, 24], sizes = [8, 8], strides = [1, 1]} : vector<8x32xbf16> to vector<8x8xbf16>
    %cst_36 = arith.constant dense<0.000000e+00> : vector<8x8xf32>
    %87 = tpu.matmul %85, %86, %cst_36 {dimension_numbers = #tpu.dot_dimension_numbers<[1], [1], [0], [0], [0, 0, 1, 0], [], []>} : vector<8x8xbf16>, vector<8x8xbf16>, vector<8x8xf32> -> vector<8x8xf32>
    %88 = vector.broadcast %27 : vector<1x8xf32> to vector<8x8xf32>
    %89 = arith.addf %87, %88 : vector<8x8xf32>
    %cst_37 = arith.constant dense<0xFF800000> : vector<8xf32>
    %90 = vector.multi_reduction <maximumf>, %89, %cst_37 [1] : vector<8x8xf32> to vector<8xf32>
    %91 = vector.shape_cast %90 : vector<8xf32> to vector<8x1xf32>
    %92 = vector.broadcast %91 : vector<8x1xf32> to vector<8x8xf32>
    %93 = arith.subf %89, %92 : vector<8x8xf32>
    %94 = math.exp %93 : vector<8x8xf32>
    %cst_38 = arith.constant dense<0.000000e+00> : vector<8xf32>
    %95 = vector.multi_reduction <add>, %94, %cst_38 [1] : vector<8x8xf32> to vector<8xf32>
    %96 = vector.shape_cast %95 : vector<8xf32> to vector<8x1xf32>
    %97 = tpu.reciprocal %96 {approx = true} : vector<8x1xf32> -> vector<8x1xf32>
    %98 = vector.broadcast %97 : vector<8x1xf32> to vector<8x8xf32>
    %99 = arith.mulf %94, %98 : vector<8x8xf32>
    %100 = arith.truncf %99 : vector<8x8xf32> to vector<8x8xbf16>
    %101 = vector.extract_strided_slice %23 {offsets = [0, 24], sizes = [8, 8], strides = [1, 1]} : vector<8x32xbf16> to vector<8x8xbf16>
    %cst_39 = arith.constant dense<0.000000e+00> : vector<8x8xf32>
    %102 = tpu.matmul %100, %101, %cst_39 {dimension_numbers = #tpu.dot_dimension_numbers<[1], [0], [0], [1], [0, 0, 1, 1], [], []>} : vector<8x8xbf16>, vector<8x8xbf16>, vector<8x8xf32> -> vector<8x8xf32>
    %103 = arith.truncf %102 : vector<8x8xf32> to vector<8x8xbf16>
    %104 = tpu.concatenate %46, %65, %84, %103 in 1 : vector<8x8xbf16>, vector<8x8xbf16>, vector<8x8xbf16>, vector<8x8xbf16> -> vector<8x32xbf16>
    %c0_40 = arith.constant 0 : index
    %c0_41 = arith.constant 0 : index
    %105 = vector.load %arg10[%c0_40, %c0_41] : memref<32x32xbf16, #tpu.memory_space<vmem>>, vector<32x32xbf16>
    %cst_42 = arith.constant dense<0.000000e+00> : vector<8x32xf32>
    %106 = tpu.matmul %104, %105, %cst_42 {dimension_numbers = #tpu.dot_dimension_numbers<[1], [0], [0], [1], [0, 0, 1, 1], [], []>} : vector<8x32xbf16>, vector<32x32xbf16>, vector<8x32xf32> -> vector<8x32xf32>
    %c0_43 = arith.constant 0 : index
    %c0_44 = arith.constant 0 : index
    %107 = vector.load %arg11[%c0_43, %c0_44] : memref<1x32xf32, #tpu.memory_space<vmem>>, vector<1x32xf32>
    %108 = vector.broadcast %107 : vector<1x32xf32> to vector<8x32xf32>
    %109 = arith.addf %106, %108 : vector<8x32xf32>
    %110 = arith.extf %1 : vector<8x32xbf16> to vector<8x32xf32>
    %111 = arith.addf %110, %109 : vector<8x32xf32>
    %c0_45 = arith.constant 0 : index
    %c0_46 = arith.constant 0 : index
    %112 = vector.load %arg12[%c0_45, %c0_46] : memref<1x32xf32, #tpu.memory_space<vmem>>, vector<1x32xf32>
    %c0_47 = arith.constant 0 : index
    %c0_48 = arith.constant 0 : index
    %113 = vector.load %arg13[%c0_47, %c0_48] : memref<1x32xf32, #tpu.memory_space<vmem>>, vector<1x32xf32>
    %cst_49 = arith.constant dense<0.000000e+00> : vector<8xf32>
    %114 = vector.multi_reduction <add>, %111, %cst_49 [1] : vector<8x32xf32> to vector<8xf32>
    %115 = vector.shape_cast %114 : vector<8xf32> to vector<8x1xf32>
    %cst_50 = arith.constant 3.200000e+01 : f32
    %116 = vector.broadcast %cst_50 : f32 to vector<8x1xf32>
    %117 = arith.divf %115, %116 : vector<8x1xf32>
    %118 = vector.broadcast %117 : vector<8x1xf32> to vector<8x32xf32>
    %119 = arith.subf %111, %118 : vector<8x32xf32>
    %120 = arith.mulf %119, %119 : vector<8x32xf32>
    %cst_51 = arith.constant dense<0.000000e+00> : vector<8xf32>
    %121 = vector.multi_reduction <add>, %120, %cst_51 [1] : vector<8x32xf32> to vector<8xf32>
    %122 = vector.shape_cast %121 : vector<8xf32> to vector<8x1xf32>
    %cst_52 = arith.constant 3.200000e+01 : f32
    %123 = vector.broadcast %cst_52 : f32 to vector<8x1xf32>
    %124 = arith.divf %122, %123 : vector<8x1xf32>
    %125 = vector.broadcast %117 : vector<8x1xf32> to vector<8x32xf32>
    %126 = arith.subf %111, %125 : vector<8x32xf32>
    %cst_53 = arith.constant 9.99999974E-6 : f32
    %127 = vector.broadcast %cst_53 : f32 to vector<8x1xf32>
    %128 = arith.addf %124, %127 : vector<8x1xf32>
    %129 = math.rsqrt %128 : vector<8x1xf32>
    %130 = vector.broadcast %129 : vector<8x1xf32> to vector<8x32xf32>
    %131 = arith.mulf %126, %130 : vector<8x32xf32>
    %132 = vector.broadcast %112 : vector<1x32xf32> to vector<8x32xf32>
    %133 = arith.mulf %131, %132 : vector<8x32xf32>
    %134 = vector.broadcast %113 : vector<1x32xf32> to vector<8x32xf32>
    %135 = arith.addf %133, %134 : vector<8x32xf32>
    %136 = arith.truncf %135 : vector<8x32xf32> to vector<8x32xbf16>
    %c0_54 = arith.constant 0 : index
    %c0_55 = arith.constant 0 : index
    %137 = vector.load %arg14[%c0_54, %c0_55] : memref<32x64xbf16, #tpu.memory_space<vmem>>, vector<32x64xbf16>
    %cst_56 = arith.constant dense<0.000000e+00> : vector<8x64xf32>
    %138 = tpu.matmul %136, %137, %cst_56 {dimension_numbers = #tpu.dot_dimension_numbers<[1], [0], [0], [1], [0, 0, 1, 1], [], []>} : vector<8x32xbf16>, vector<32x64xbf16>, vector<8x64xf32> -> vector<8x64xf32>
    %c0_57 = arith.constant 0 : index
    %c0_58 = arith.constant 0 : index
    %139 = vector.load %arg15[%c0_57, %c0_58] : memref<1x64xf32, #tpu.memory_space<vmem>>, vector<1x64xf32>
    %140 = vector.broadcast %139 : vector<1x64xf32> to vector<8x64xf32>
    %141 = arith.addf %138, %140 : vector<8x64xf32>
    %cst_59 = arith.constant 0.000000e+00 : f32
    %142 = vector.broadcast %cst_59 : f32 to vector<8x64xf32>
    %143 = arith.maximumf %141, %142 : vector<8x64xf32>
    %144 = arith.truncf %143 : vector<8x64xf32> to vector<8x64xbf16>
    %c0_60 = arith.constant 0 : index
    %c0_61 = arith.constant 0 : index
    %145 = vector.load %arg16[%c0_60, %c0_61] : memref<64x32xbf16, #tpu.memory_space<vmem>>, vector<64x32xbf16>
    %cst_62 = arith.constant dense<0.000000e+00> : vector<8x32xf32>
    %146 = tpu.matmul %144, %145, %cst_62 {dimension_numbers = #tpu.dot_dimension_numbers<[1], [0], [0], [1], [0, 0, 1, 1], [], []>} : vector<8x64xbf16>, vector<64x32xbf16>, vector<8x32xf32> -> vector<8x32xf32>
    %c0_63 = arith.constant 0 : index
    %c0_64 = arith.constant 0 : index
    %147 = vector.load %arg17[%c0_63, %c0_64] : memref<1x32xf32, #tpu.memory_space<vmem>>, vector<1x32xf32>
    %148 = vector.broadcast %147 : vector<1x32xf32> to vector<8x32xf32>
    %149 = arith.addf %146, %148 : vector<8x32xf32>
    %150 = arith.addf %135, %149 : vector<8x32xf32>
    %c0_65 = arith.constant 0 : index
    %c0_66 = arith.constant 0 : index
    %151 = vector.load %arg18[%c0_65, %c0_66] : memref<1x32xf32, #tpu.memory_space<vmem>>, vector<1x32xf32>
    %c0_67 = arith.constant 0 : index
    %c0_68 = arith.constant 0 : index
    %152 = vector.load %arg19[%c0_67, %c0_68] : memref<1x32xf32, #tpu.memory_space<vmem>>, vector<1x32xf32>
    %cst_69 = arith.constant dense<0.000000e+00> : vector<8xf32>
    %153 = vector.multi_reduction <add>, %150, %cst_69 [1] : vector<8x32xf32> to vector<8xf32>
    %154 = vector.shape_cast %153 : vector<8xf32> to vector<8x1xf32>
    %cst_70 = arith.constant 3.200000e+01 : f32
    %155 = vector.broadcast %cst_70 : f32 to vector<8x1xf32>
    %156 = arith.divf %154, %155 : vector<8x1xf32>
    %157 = vector.broadcast %156 : vector<8x1xf32> to vector<8x32xf32>
    %158 = arith.subf %150, %157 : vector<8x32xf32>
    %159 = arith.mulf %158, %158 : vector<8x32xf32>
    %cst_71 = arith.constant dense<0.000000e+00> : vector<8xf32>
    %160 = vector.multi_reduction <add>, %159, %cst_71 [1] : vector<8x32xf32> to vector<8xf32>
    %161 = vector.shape_cast %160 : vector<8xf32> to vector<8x1xf32>
    %cst_72 = arith.constant 3.200000e+01 : f32
    %162 = vector.broadcast %cst_72 : f32 to vector<8x1xf32>
    %163 = arith.divf %161, %162 : vector<8x1xf32>
    %164 = vector.broadcast %156 : vector<8x1xf32> to vector<8x32xf32>
    %165 = arith.subf %150, %164 : vector<8x32xf32>
    %cst_73 = arith.constant 9.99999974E-6 : f32
    %166 = vector.broadcast %cst_73 : f32 to vector<8x1xf32>
    %167 = arith.addf %163, %166 : vector<8x1xf32>
    %168 = math.rsqrt %167 : vector<8x1xf32>
    %169 = vector.broadcast %168 : vector<8x1xf32> to vector<8x32xf32>
    %170 = arith.mulf %165, %169 : vector<8x32xf32>
    %171 = vector.broadcast %151 : vector<1x32xf32> to vector<8x32xf32>
    %172 = arith.mulf %170, %171 : vector<8x32xf32>
    %173 = vector.broadcast %152 : vector<1x32xf32> to vector<8x32xf32>
    %174 = arith.addf %172, %173 : vector<8x32xf32>
    %175 = vector.broadcast %5 : vector<8x1xf32> to vector<8x32xf32>
    %176 = arith.mulf %174, %175 : vector<8x32xf32>
    %177 = arith.truncf %176 : vector<8x32xf32> to vector<8x32xbf16>
    %c0_74 = arith.constant 0 : index
    %c0_75 = arith.constant 0 : index
    %c0_76 = arith.constant 0 : index
    %178 = vector.load %arg20[%c0_74, %c0_75, %c0_76] : memref<1x8x32xbf16, #tpu.memory_space<vmem>>, vector<1x8x32xbf16>
    %179 = vector.shape_cast %178 : vector<1x8x32xbf16> to vector<8x32xbf16>
    %180 = vector.shape_cast %177 : vector<8x32xbf16> to vector<1x8x32xbf16>
    tpu.vector_store %arg20[%c0_74, %c0_75, %c0_76], %180 {strides = array<i32>} : memref<1x8x32xbf16, #tpu.memory_space<vmem>>, vector<1x8x32xbf16>,
    %cst_77 = arith.constant dense<0.000000e+00> : vector<32xf32>
    %181 = vector.multi_reduction <add>, %176, %cst_77 [0] : vector<8x32xf32> to vector<32xf32>
    %182 = vector.shape_cast %181 : vector<32xf32> to vector<1x32xf32>
    %c0_78 = arith.constant 0 : index
    %c0_79 = arith.constant 0 : index
    %c0_80 = arith.constant 0 : index
    %183 = vector.load %arg21[%c0_78, %c0_79, %c0_80] : memref<1x1x32xf32, #tpu.memory_space<vmem>>, vector<1x1x32xf32>
    %184 = vector.shape_cast %183 : vector<1x1x32xf32> to vector<1x32xf32>
    %185 = vector.shape_cast %182 : vector<1x32xf32> to vector<1x1x32xf32>
    tpu.vector_store %arg21[%c0_78, %c0_79, %c0_80], %185 {strides = array<i32>} : memref<1x1x32xf32, #tpu.memory_space<vmem>>, vector<1x1x32xf32>,
    return
  }
  func.func @transform_0(%arg0: i32) -> (i32, i32, i32) {
    %c0_i32 = arith.constant 0 : i32
    %c0_i32_0 = arith.constant 0 : i32
    %c0_i32_1 = arith.constant 0 : i32
    return %arg0, %c0_i32, %c0_i32_0 : i32, i32, i32
  }
  func.func @transform_1(%arg0: i32) -> (i32, i32, i32) {
    %c0_i32 = arith.constant 0 : i32
    %c0_i32_0 = arith.constant 0 : i32
    %c0_i32_1 = arith.constant 0 : i32
    return %arg0, %c0_i32, %c0_i32_0 : i32, i32, i32
  }
  func.func @transform_2(%arg0: i32) -> (i32, i32, i32) {
    %c0_i32 = arith.constant 0 : i32
    %c0_i32_0 = arith.constant 0 : i32
    %c0_i32_1 = arith.constant 0 : i32
    return %arg0, %c0_i32, %c0_i32_0 : i32, i32, i32
  }
  func.func @transform_3(%arg0: i32) -> (i32, i32) {
    %c0_i32 = arith.constant 0 : i32
    %c0_i32_0 = arith.constant 0 : i32
    %c0_i32_1 = arith.constant 0 : i32
    return %c0_i32, %c0_i32_0 : i32, i32
  }
  func.func @transform_4(%arg0: i32) -> (i32, i32) {
    %c0_i32 = arith.constant 0 : i32
    %c0_i32_0 = arith.constant 0 : i32
    %c0_i32_1 = arith.constant 0 : i32
    return %c0_i32, %c0_i32_0 : i32, i32
  }
  func.func @transform_5(%arg0: i32) -> (i32, i32) {
    %c0_i32 = arith.constant 0 : i32
    %c0_i32_0 = arith.constant 0 : i32
    %c0_i32_1 = arith.constant 0 : i32
    return %c0_i32, %c0_i32_0 : i32, i32
  }
  func.func @transform_6(%arg0: i32) -> (i32, i32) {
    %c0_i32 = arith.constant 0 : i32
    %c0_i32_0 = arith.constant 0 : i32
    %c0_i32_1 = arith.constant 0 : i32
    return %c0_i32, %c0_i32_0 : i32, i32
  }
  func.func @transform_7(%arg0: i32) -> (i32, i32) {
    %c0_i32 = arith.constant 0 : i32
    %c0_i32_0 = arith.constant 0 : i32
    %c0_i32_1 = arith.constant 0 : i32
    return %c0_i32, %c0_i32_0 : i32, i32
  }
  func.func @transform_8(%arg0: i32) -> (i32, i32) {
    %c0_i32 = arith.constant 0 : i32
    %c0_i32_0 = arith.constant 0 : i32
    %c0_i32_1 = arith.constant 0 : i32
    return %c0_i32, %c0_i32_0 : i32, i32
  }
  func.func @transform_9(%arg0: i32) -> (i32, i32) {
    %c0_i32 = arith.constant 0 : i32
    %c0_i32_0 = arith.constant 0 : i32
    %c0_i32_1 = arith.constant 0 : i32
    return %c0_i32, %c0_i32_0 : i32, i32
  }
  func.func @transform_10(%arg0: i32) -> (i32, i32) {
    %c0_i32 = arith.constant 0 : i32
    %c0_i32_0 = arith.constant 0 : i32
    %c0_i32_1 = arith.constant 0 : i32
    return %c0_i32, %c0_i32_0 : i32, i32
  }
  func.func @transform_11(%arg0: i32) -> (i32, i32) {
    %c0_i32 = arith.constant 0 : i32
    %c0_i32_0 = arith.constant 0 : i32
    %c0_i32_1 = arith.constant 0 : i32
    return %c0_i32, %c0_i32_0 : i32, i32
  }
  func.func @transform_12(%arg0: i32) -> (i32, i32) {
    %c0_i32 = arith.constant 0 : i32
    %c0_i32_0 = arith.constant 0 : i32
    %c0_i32_1 = arith.constant 0 : i32
    return %c0_i32, %c0_i32_0 : i32, i32
  }
  func.func @transform_13(%arg0: i32) -> (i32, i32) {
    %c0_i32 = arith.constant 0 : i32
    %c0_i32_0 = arith.constant 0 : i32
    %c0_i32_1 = arith.constant 0 : i32
    return %c0_i32, %c0_i32_0 : i32, i32
  }
  func.func @transform_14(%arg0: i32) -> (i32, i32) {
    %c0_i32 = arith.constant 0 : i32
    %c0_i32_0 = arith.constant 0 : i32
    %c0_i32_1 = arith.constant 0 : i32
    return %c0_i32, %c0_i32_0 : i32, i32
  }
  func.func @transform_15(%arg0: i32) -> (i32, i32) {
    %c0_i32 = arith.constant 0 : i32
    %c0_i32_0 = arith.constant 0 : i32
    %c0_i32_1 = arith.constant 0 : i32
    return %c0_i32, %c0_i32_0 : i32, i32
  }
  func.func @transform_16(%arg0: i32) -> (i32, i32) {
    %c0_i32 = arith.constant 0 : i32
    %c0_i32_0 = arith.constant 0 : i32
    %c0_i32_1 = arith.constant 0 : i32
    return %c0_i32, %c0_i32_0 : i32, i32
  }
  func.func @transform_17(%arg0: i32) -> (i32, i32) {
    %c0_i32 = arith.constant 0 : i32
    %c0_i32_0 = arith.constant 0 : i32
    %c0_i32_1 = arith.constant 0 : i32
    return %c0_i32, %c0_i32_0 : i32, i32
  }
  func.func @transform_18(%arg0: i32) -> (i32, i32) {
    %c0_i32 = arith.constant 0 : i32
    %c0_i32_0 = arith.constant 0 : i32
    %c0_i32_1 = arith.constant 0 : i32
    return %c0_i32, %c0_i32_0 : i32, i32
  }
  func.func @transform_19(%arg0: i32) -> (i32, i32, i32) {
    %c0_i32 = arith.constant 0 : i32
    %c0_i32_0 = arith.constant 0 : i32
    %c0_i32_1 = arith.constant 0 : i32
    return %arg0, %c0_i32, %c0_i32_0 : i32, i32, i32
  }
  func.func @transform_20(%arg0: i32) -> (i32, i32, i32) {
    %c0_i32 = arith.constant 0 : i32
    %c0_i32_0 = arith.constant 0 : i32
    %c0_i32_1 = arith.constant 0 : i32
    return %arg0, %c0_i32, %c0_i32_0 : i32, i32, i32
  }
}

</mosaic_0001>

<bundles_post_ra>
// kernel: tpu_custom_call.1
= control target key start
LH: loop header
LB: loop body
LE: loop exit
PB: predicated region body
PF: predicated region fallthrough
CT: control target
= control target key end

     0   :  { %s3022_s0 = inlined_call_operand.hbm [shape: bf16[2,8,32], index: 0, kind: input, shape index: {}]   ;;  %s3023_s1 = inlined_call_operand.hbm [shape: f32[2,1,8], index: 1, kind: input, shape index: {}]   ;;  %s3024_s2 = inlined_call_operand.vmem [shape: f32[2,8,1], index: 2, kind: input, shape index: {}]   ;;  %s3025_s3 = inlined_call_operand.vmem [shape: bf16[32,32], index: 3, kind: input, shape index: {}]   ;;  %s3026_s4 = inlined_call_operand.hbm [shape: f32[1,32], index: 4, kind: input, shape index: {}]   ;;  %s3027_s5 = inlined_call_operand.vmem [shape: bf16[32,32], index: 5, kind: input, shape index: {}]   ;;  %s3028_s6 = inlined_call_operand.hbm [shape: f32[1,32], index: 6, kind: input, shape index: {}]   ;;  %s3029_s7 = inlined_call_operand.vmem [shape: bf16[32,32], index: 7, kind: input, shape index: {}]   ;;  %s3030_s8 = inlined_call_operand.hbm [shape: f32[1,32], index: 8, kind: input, shape index: {}]   ;;  %s3031_s9 = inlined_call_operand.vmem [shape: bf16[32,32], index: 9, kind: input, shape index: {}]   ;;  %s3032_s10 = inlined_call_operand.vmem [shape: f32[1,32], index: 10, kind: input, shape index: {}]   ;;  %s3033_s11 = inlined_call_operand.vmem [shape: f32[1,32], index: 11, kind: input, shape index: {}]   ;;  %s3034_s12 = inlined_call_operand.vmem [shape: f32[1,32], index: 12, kind: input, shape index: {}]   ;;  %s3035_s13 = inlined_call_operand.vmem [shape: bf16[32,64], index: 13, kind: input, shape index: {}]   ;;  %s3036_s14 = inlined_call_operand.vmem [shape: f32[1,64], index: 14, kind: input, shape index: {}]   ;;  %s3037_s15 = inlined_call_operand.vmem [shape: bf16[64,32], index: 15, kind: input, shape index: {}]   ;;  %s3038_s16 = inlined_call_operand.vmem [shape: f32[1,32], index: 16, kind: input, shape index: {}]   ;;  %s3039_s17 = inlined_call_operand.vmem [shape: f32[1,32], index: 17, kind: input, shape index: {}]   ;;  %s3040_s18 = inlined_call_operand.vmem [shape: f32[1,32], index: 18, kind: input, shape index: {}]   ;;  %s3041_s19 = inlined_call_operand.hbm [shape: bf16[2,8,32], index: 19, kind: output, shape index: {0}]   ;;  %s3042_s20 = inlined_call_operand.hbm [shape: f32[2,1,32], index: 20, kind: output, shape index: {1}]  }
   0x1   :  { %3060 = sst [smem:[#allocation26_spill]] %s3022_s0 }
   0x2   :  { %3061 = sst [smem:[#allocation27_spill]] %s3023_s1 }
   0x3   :  { %3062 = sst [smem:[#allocation28_spill]] %s3024_s2 }
   0x4   :  { %3063 = sst [smem:[#allocation29_spill]] %s3025_s3 }
   0x5   :  { %3064 = sst [smem:[#allocation30_spill]] %s3026_s4 }
   0x6   :  { %3065 = sst [smem:[#allocation31_spill]] %s3028_s6 }
   0x7   :  { %3066 = sst [smem:[#allocation32_spill]] %s3030_s8 }
   0x8   :  { %3067 = sst [smem:[#allocation33_spill]] %s3040_s18 }
   0x9   :  { %3068 = sst [smem:[#allocation34_spill]] %s3041_s19 }
   0xa   :  { %3069 = sst [smem:[#allocation35_spill]] %s3042_s20 }
   0xb   :  { %26 = vsyncpa [#allocation3], 0 }
   0xc   :  { %28 = vsyncpa [#allocation3 + $0x1], 0 }
   0xd   :  { %29 = vsyncpa [#allocation6], 0 }
   0xe   :  { %31 = vsyncpa [#allocation6 + $0x1], 0 }
   0xf   :  { %32 = vsyncpa [#allocation9], 0 }
  0x10   :  { %33 = vsyncpa [#allocation4], 0 }
  0x11   :  { %35 = vsyncpa [#allocation4 + $0x1], 0 }
  0x12   :  { %36 = vsyncpa [#allocation13], 0 }
  0x13   :  { %38 = vsyncpa [#allocation13 + $0x1], 0  ;;  %s2589_s1 = smov 0   ;;  %s2591_s22 = smov 0  }
  0x14   :  { %s2593_s23 = smov 0   ;;  %s2595_s24 = smov 0  }
  0x15 LB: > { %3070 = sst [smem:[#allocation20_spill]] %s2454_s1  ;;  %s2610_s2 = sadd.s32 4294967295, %s2466_s24   ;;  %s2466_s24 = sphi %s2595_s24, %s3107_s24   ;;  %s2462_s23 = sphi %s2593_s23, %s3109_s23   ;;  %s2458_s22 = sphi %s2591_s22, %s3111_s22   ;;  %s2454_s1 = sphi %s2589_s1, %s3110_s1  }
  0x16   : > { %3071 = sst [smem:[#allocation21_spill]] %s2462_s23  ;;  %s1898_s25 = sadd.s32 4294967294, %s2466_s24  }
  0x17   : > { %p64_p0 = scmp.ne.s32.totalorder %s2458_s22, %s2454_s1  ;;  %p3049_p1 = scmp.eq.s32.totalorder %s2610_s2, 0 }
  0x18   : > { %p482_p3 = scmp.eq.s32.totalorder %s1898_s25, 1  ;;  %p1899_p5 = scmp.ge.s32.totalorder %s2466_s24, 1 }
  0x19   : > { %p2619_p4 = por %p3049_p1, %p64_p0  ;;  %p515_p7 = scmp.lt.s32.totalorder %s2466_s24, 3 }
  0x1a   : > { %p2624_p6 = por %p482_p3, %p64_p0  ;;  %s2468_s28 = smov [#allocation7]  }
  0x1b   : > { %s3072_s3 = scalar_select %p2619_p4, 1, 0 }
  0x1c   : > { %s3073_s26 = scalar_select %p2624_p6, 1, 0 }
  0x1d   : > { %p2629_p8 = pnand %p1899_p5, %p515_p7  ;;  %s531_s4 = sshll.u32 %s2468_s28, 4  ;;  %s532_s4 = int_to_ptr.vmem [resolvable:$true] %s531_s4 }
  0x1e   : > { %3074 = sst [smem:[#allocation22_spill]] %s3073_s26  ;;  %s2469_s29 = smov [#allocation8]  }
  0x1f   : > { %s3075_s27 = scalar_select %p2629_p8, 1, 0 }
  0x20   : > { %p2114_p10 = pneg %p2629_p8  ;;  %s545_s30 = sshll.u32 %s2469_s29, 4  ;;  %s546_s30 = int_to_ptr.vmem [resolvable:$true] %s545_s30 }
  0x21   : > { %s2470_s21 = smov [#allocation10]   ;;  %s2237_s28 = scalar_lea.vmem %s532_s4, 16 }
  0x22   : > { %p2638_p11 = pnand %p2114_p10, %p3049_p1  ;;  %s559_s25 = sshll.u32 %s2470_s21, 4  ;;  %s2642_s25 = int_to_ptr.vmem [resolvable:$true] %s559_s25 }
  0x23   : > { %p2238_p13 = scmp.ne.s32.totalorder %s532_s4, %s2237_s28  ;;  %s2244_s29 = scalar_lea.vmem %s532_s4, 32 }
  0x24   : > { %p2228_p12 = pneg %p2638_p11  ;;  %p2245_p5 = scmp.lt.s32.totalorder %s532_s4, %s532_s4 }
  0x25   : > { %p2246_p7 = scmp.lt.s32.totalorder %s2244_s29, %s2237_s28 }
  0x26   : > { %p2240_p0 = pnand %p2238_p13, %p2228_p12 }
  0x27   : > { %p2247_p10 = por %p2246_p7, %p2245_p5 }
  0x28   : > { %p2241_p3 = pneg %p2240_p0 }
  0x2a   : > { %p2248_p9 = pnand %p2247_p10, %p2241_p3 }
  0x2c   : > { %2251 = shalt.err (!%p2248_p9)
}
  0x2d   : > { %s3077_s1 = sld [smem:[#allocation30_spill]]  ;;  %s2263_s20 = scalar_lea.vmem %s546_s30, 16 }
  0x2e   : > { %p2264_p1 = scmp.ne.s32.totalorder %s546_s30, %s2263_s20  ;;  %s2270_s19 = scalar_lea.vmem %s546_s30, 32 }
  0x2f   : > { %p2271_p0 = scmp.lt.s32.totalorder %s546_s30, %s546_s30  ;;  %p2272_p6 = scmp.lt.s32.totalorder %s2270_s19, %s2263_s20 }
  0x30   : > { %p2266_p2 = pnand %p2264_p1, %p2228_p12 }
  0x31   : > { %p2273_p4 = por %p2272_p6, %p2271_p0 }
  0x32   : > { %p2267_p13 = pneg %p2266_p2 }
  0x33   : > { %2117 = dma.hbm_to_vmem [thread:$0]  (!%p2638_p11), %s3077_s1, 16, %s532_s4, [#allocation6]  }
  0x34   : > { %p2274_p5 = pnand %p2273_p4, %p2267_p13 }
  0x36   : > { %2277 = shalt.err (!%p2274_p5)
}
  0x37   : > { %s3078_s6 = sld [smem:[#allocation31_spill]]  ;;  %s2289_s1 = scalar_lea.vmem %s2642_s25, 16 }
  0x38   : > { %p2290_p1 = scmp.ne.s32.totalorder %s2642_s25, %s2289_s1  ;;  %s2296_s19 = scalar_lea.vmem %s2642_s25, 32 }
  0x39   : > { %p2297_p4 = scmp.lt.s32.totalorder %s2642_s25, %s2642_s25  ;;  %p2298_p6 = scmp.lt.s32.totalorder %s2296_s19, %s2289_s1 }
  0x3a   : > { %p2292_p2 = pnand %p2290_p1, %p2228_p12 }
  0x3b   : > { %p2299_p3 = por %p2298_p6, %p2297_p4 }
  0x3c   : > { %p2293_p9 = pneg %p2292_p2 }
  0x3d   : > { %2120 = dma.hbm_to_vmem [thread:$0]  (!%p2638_p11), %s3078_s6, 16, %s546_s30, [#allocation9]  }
  0x3e   : > { %p2300_p7 = pnand %p2299_p3, %p2293_p9 }
  0x40   : > { %2303 = shalt.err (!%p2300_p7)
}
  0x41   : > { %s3079_s8 = sld [smem:[#allocation32_spill]]  ;;  %s2677_s4 = sadd.s32 1, %s2466_s24  }
  0x42   : > { %3080 = sst [smem:[#allocation23_spill]] %s2677_s4  ;;  %s48_s30 = ssub.s32 %s2466_s24, %s2677_s4 }
  0x43   : > { %s51_s0 = sadd.s32 1, %s2462_s23  ;;  %p49_p12 = scmp.eq.s32.totalorder %s48_s30, 0 }
  0x44   : > { %p58_p10 = scmp.ne.s32.totalorder %s2462_s23, %s2458_s22  ;;  %p59_p13 = scmp.eq.s32.totalorder %s2466_s24, 0 }
  0x45   : > { %p2141_p0 = scmp.lt.s32.totalorder %s2466_s24, 2  ;;  %p3082_p1 = scmp.eq.s32.totalorder %s2610_s2, 1 }
  0x46   : > { %s2687_s21 = scalar_select %p49_p12, %s2462_s23, %s51_s0  }
  0x47   : > { %2123 = dma.hbm_to_vmem [thread:$0]  (!%p2638_p11), %s3079_s8, 16, %s2642_s25, [#allocation9]  }
  0x48   : > { %3081 = sst [smem:[#allocation24_spill]] %s2687_s21  ;;  %p60_p5 = por %p59_p13, %p58_p10 }
  0x49   : > { %p2691_p2 = por %p3082_p1, %p58_p10  ;;  %s2696_s29 = sand.u32 1, %s2462_s23  }
  0x4a   : > { %s1905_s25 = sshll.u32 %s2466_s24, 6  ;;  %s1904_s1 = sshll.u32 %s2696_s29, 2 }
  0x4b   : > { %s3083_s28 = scalar_select %p2691_p2, 1, 0 }
  0x4c   : > { %s3085_s26 = sld [smem:[#allocation26_spill]]  ;;  %s604_s0 = scalar_lea.vmem [#allocation2], %s1904_s1 }
  0x4d   : > { %3084 = sst [smem:[#allocation25_spill]] %s3083_s28  ;;  %s611_s6 = sshll.u32 %s604_s0, 4  ;;  %s612_s6 = int_to_ptr.vmem [resolvable:$true] %s611_s6 }
  0x4e   : > { %p2705_p11 = pnand %p2141_p0, %p60_p5  ;;  %s601_s23 = scalar_lea.sflag [#allocation3], %s2696_s29 }
  0x50   : > { %p2306_p4 = pneg %p2705_p11 }
  0x52   : > { %s2703_s30 = scalar_lea.hbm %s3085_s26, %s1905_s25  ;;  %s2309_s19 = scalar_lea.hbm %s3085_s26, 128 }
  0x53   : > { %s2304_s4 = scalar_lea.hbm %s2703_s30, 64  ;;  %p2310_p7 = scmp.lt.s32.totalorder %s2703_s30, %s3085_s26 }
  0x54   : > { %p2305_p9 = scmp.ne.s32.totalorder %s2703_s30, %s2304_s4  ;;  %p2311_p12 = scmp.lt.s32.totalorder %s2309_s19, %s2304_s4 }
  0x56   : > { %p2307_p6 = pnand %p2306_p4, %p2305_p9  ;;  %p2312_p10 = por %p2311_p12, %p2310_p7 }
  0x58   : > { %p2308_p3 = pneg %p2307_p6 }
  0x5a   : > { %p2313_p13 = pnand %p2312_p10, %p2308_p3 }
  0x5c   : > { %2316 = shalt.err (!%p2313_p13)
}
  0x5d   : > { %s2317_s21 = scalar_lea.vmem %s612_s6, 64  ;;  %s2471_s28 = smov [#allocation2]  }
  0x5e   : > { %p2318_p0 = scmp.ne.s32.totalorder %s612_s6, %s2317_s21  ;;  %s2322_s18 = sshll.u32 %s2471_s28, 4  ;;  %s2323_s18 = int_to_ptr.vmem [resolvable:$false] %s2322_s18 }
  0x5f   : > { %s2324_s25 = scalar_lea.vmem %s2323_s18, 128  ;;  %p2325_p9 = scmp.lt.s32.totalorder %s612_s6, %s2323_s18 }
  0x60   : > { %p2320_p5 = pnand %p2318_p0, %p2306_p4  ;;  %p2326_p6 = scmp.lt.s32.totalorder %s2324_s25, %s2317_s21 }
  0x62   : > { %p2321_p1 = pneg %p2320_p5  ;;  %p2327_p2 = por %p2326_p6, %p2325_p9 }
  0x64   : > { %p2328_p8 = pnand %p2327_p2, %p2321_p1 }
  0x66   : > { %2331 = shalt.err (!%p2328_p8)
}
  0x67   : > { %2127 = dma.hbm_to_vmem [thread:$0]  (!%p2705_p11), %s2703_s30, 64, %s612_s6, %s601_s23  }
  0x68   : > { %s1906_s4 = sshll.u32 %s2466_s24, 4  ;;  %s3087_s20 = sld [smem:[#allocation27_spill]] }
  0x69   : > { %s621_s18 = scalar_lea.vmem [#allocation5], %s2696_s29  ;;  %s3088_s0 = sand.u32 1, %s2466_s24  }
  0x6a   : > { %s628_s21 = sshll.u32 %s621_s18, 4  ;;  %s619_s25 = scalar_lea.sflag [#allocation6], %s3088_s0  ;;  %s629_s21 = int_to_ptr.vmem [resolvable:$true] %s628_s21 }
  0x6e   : > { %s2735_s28 = scalar_lea.hbm %s3087_s20, %s1906_s4  ;;  %s2337_s30 = scalar_lea.hbm %s3087_s20, 32 }
  0x6f   : > { %s2332_s26 = scalar_lea.hbm %s2735_s28, 16  ;;  %p2338_p7 = scmp.lt.s32.totalorder %s2735_s28, %s3087_s20 }
  0x70   : > { %p2333_p8 = scmp.ne.s32.totalorder %s2735_s28, %s2332_s26  ;;  %p2339_p12 = scmp.lt.s32.totalorder %s2337_s30, %s2332_s26 }
  0x72   : > { %p2335_p2 = pnand %p2333_p8, %p2306_p4  ;;  %p2340_p10 = por %p2339_p12, %p2338_p7 }
  0x74   : > { %p2336_p3 = pneg %p2335_p2 }
  0x76   : > { %p2341_p13 = pnand %p2340_p10, %p2336_p3 }
  0x78   : > { %2344 = shalt.err (!%p2341_p13)
}
  0x79   : > { %s2345_s29 = scalar_lea.vmem %s629_s21, 16  ;;  %s2472_s19 = smov [#allocation5]  }
  0x7a   : > { %p2346_p0 = scmp.ne.s32.totalorder %s629_s21, %s2345_s29  ;;  %s2350_s18 = sshll.u32 %s2472_s19, 4  ;;  %s2351_s18 = int_to_ptr.vmem [resolvable:$false] %s2350_s18 }
  0x7b   : > { %s2352_s0 = scalar_lea.vmem %s2351_s18, 32  ;;  %p2353_p9 = scmp.lt.s32.totalorder %s629_s21, %s2351_s18 }
  0x7c   : > { %p2348_p5 = pnand %p2346_p0, %p2306_p4  ;;  %p2354_p6 = scmp.lt.s32.totalorder %s2352_s0, %s2345_s29 }
  0x7e   : > { %p2349_p1 = pneg %p2348_p5  ;;  %p2355_p8 = por %p2354_p6, %p2353_p9 }
  0x80   : > { %p2356_p2 = pnand %p2355_p8, %p2349_p1 }
  0x82   : > { %2359 = shalt.err (!%p2356_p2)
}
  0x83   : > { %2130 = dma.hbm_to_vmem [thread:$0]  (!%p2705_p11), %s2735_s28, 16, %s629_s21, %s619_s25  }
  0x84   : > { %p3089_p3 = scmp.ne.s32.totalorder %s3075_s27, 0 }
  0x85   : > { %s2761_s26 = sand.u32 (!%p3089_p3), 1, %s2458_s22   ;;  %p3090_p4 = scmp.ne.s32.totalorder (!%p3089_p3), %s3072_s3, 0 }
  0x86   : > { %644 = sbr.rel (%p3089_p3) target bundleno = 2569 (0xa09), region = 96  ;;  %s1908_s6 = sshll.u32 (!%p3089_p3), %s2761_s26, 2 }
  0x87   : > { %s647_s23 = scalar_lea.sflag (!%p3089_p3), [#allocation3], %s2761_s26  ;;  %s650_s30 = scalar_lea.vmem (!%p3089_p3), [#allocation2], %s1908_s6 }
  0x8b   : > { %2429 = dma.done.wait (%p3090_p4), %s647_s23, 64  }
  0x8c   : > { %2431 = vsyncadd (%p3090_p4), %s647_s23, 4294967232  ;;  %s655_s8 = sand.u32 1, %s2610_s2   ;;  %s658_s28 = scalar_lea.vmem [#allocation5], %s2761_s26 }
  0x8d   : > { %s656_s27 = scalar_lea.sflag [#allocation6], %s655_s8 }
  0x8e   : > { %2433 = dma.done.wait (%p3090_p4), %s656_s27, 16  }
  0x8f   : > { %2435 = vsyncadd (%p3090_p4), %s656_s27, 4294967280  ;;  %p3091_p11 = scmp.eq.s32.totalorder %s2610_s2, 0 }
  0x91   : > { %2437 = dma.done.wait (%p3091_p11), [#allocation6], 16   ;;  %p3092_p7 = pmov %p3091_p11 }
  0x93   : > { %2439 = vsyncadd (%p3092_p7), [#allocation6], 4294967280  ;;  %p3093_p12 = pmov %p3092_p7 }
  0x94   : > { %p3094_p10 = pmov %p3092_p7 }
  0x95   : > { %2441 = dma.done.wait (%p3093_p12), [#allocation9], 32  }
  0x96   : > { %2443 = vsyncadd (%p3094_p10), [#allocation9], 4294967264  ;;  %v2473_v0 = vmov 0.0   ;;  %vm2474_vm0 = vmmov 0   ;;  %v2192_v1 = vld [vmem:[%s3027_s5 + $0x8] sm:$0xff]   ;;  %s3095_s1 = sld [smem:[#allocation29_spill]]  ;;  %v946_v32 = vlaneseq }
  0x97   : > { %2002 = vmatprep.subr.bf16.mxu1 %v2473_v0  ;;  %1994 = vmatprep.subr.bf16.mxu0 %v2473_v0  ;;  %v2194_v3 = vld [vmem:[%s3027_s5] sm:$0xff]   ;;  %vm770_vm1 = vcmask 261120   ;;  %v1918_v6 = vld [vmem:[#allocation8] ss:$0 sm:$0xff]  ;;  %v1914_v7 = vld [vmem:[#allocation7] ss:$0 sm:$0xff] }
  0x98   : > { %2006 = vmatprep.mubr.msk.bf16.mxu1 %vm2474_vm0, %v2473_v0  ;;  %1998 = vmatprep.mubr.msk.bf16.mxu0 %vm2474_vm0, %v2473_v0  ;;  %v2805_v5 = vld [vmem:[%s650_s30] sm:$0xf]  ;;  %vm951_vm2 = vcmask 64512   ;;  %s2475_s30 = smov 112   ;;  %s2476_s8 = smov 120   ;;  %v2196_v21 = vld [vmem:[%s3029_s7 + $0x8] sm:$0xff]  }
  0x99   : > { %2003 = vmatpush3.bf16.msra.mxu1 %v2192_v1  ;;  %s2477_s27 = smov 104   ;;  %v2197_v22 = vld [vmem:[%s3029_s7] sm:$0xff]   ;;  %v947_v35 = vshrl.u32 %v946_v32, 7  ;;  %v1922_v45 = vld [vmem:[#allocation10] ss:$0 sm:$0xff]  ;;  %vm1013_vm3 = vcmask 1043456  }
  0x9a   : > { %2004 = vmatprep.subr.bf16.mxu1 %v2473_v0  ;;  %v745_v33 = vld [vmem:[%s658_s28] sm:$0x1]  ;;  %s2478_s0 = smov 8   ;;  %s2479_s23 = smov 16   ;;  %vm1406_vm4 = vcmask 130048   ;;  %vm1409_vm5 = vcmask 195584  }
  0x9b   : > { %v1926_v34 = vadd.f32 -1.0, %v745_v33  ;;  %v948_v37 = vsub.s32 0, %v947_v35  ;;  %vm1617_vm6 = vcmask 523264   ;;  %p739_p13 = scmp.lt.s32.totalorder %s2610_s2, 1  ;;  %s3098_s28 = sld [smem:[#allocation33_spill]]  ;;  %vm1698_vm7 = vcmask 257024  }
  0x9c   : > { %s3096_s29 = smov %s3095_s1  ;;  %v2193_v2 = vld [vmem:[%s3095_s1 + $0x8] sm:$0xff]   ;;  %s3099_s1 = sld [smem:[#allocation25_spill]] }
  0x9d   : > { %1995 = vmatpush3.bf16.msra.mxu0 %v2193_v2  ;;  %v2195_v4 = vld [vmem:[%s3096_s29] sm:$0xff]   ;;  %2005 = vmatpush3.bf16.msra.mxu1 %v2194_v3  ;;  %v944_v36 = vmul.f32 1e+20, %v1926_v34  ;;  %s740_s18 = scalar_select %p739_p13, %s2610_s2, 1 }
  0x9e   : > { %1996 = vmatprep.subr.bf16.mxu0 %v2473_v0  ;;  %2018 = vmatprep.subr.bf16.mxu1 %v2473_v0  ;;  %s1954_s19 = sshll.u32 %s2610_s2, 6  ;;  %s2482_s21 = smov [#allocation11]  }
  0x9f   : > { %v949_v38 = vrot.slane %v944_v36, %v948_v37  ;;  %s2364_s25 = sshll.u32 %s2482_s21, 4  ;;  %s2365_s25 = int_to_ptr.vmem [resolvable:$false] %s2364_s25 }
  0xa0   : > { %2007 = vmatmul.mubr.msk.bf16.vlgmr.msra.gmra.mxu1 %vm770_vm1, %v2805_v5  ;;  %s2366_s4 = scalar_lea.vmem %s2365_s25, 128 }
  0xa1   : > { %1997 = vmatpush3.bf16.msra.mxu0 %v2195_v4  ;;  %2020 = vmatprep.mubr.msk.bf16.mxu1 %vm2474_vm0, %v2473_v0 }
  0xa2   : > { %2010 = vmatprep.subr.bf16.mxu0 %v2473_v0  ;;  %p3101_p5 = scmp.ne.s32.totalorder %s3099_s1, 0 }
  0xa4   : > { %1999 = vmatmul.mubr.msk.bf16.vlgmr.msra.gmra.mxu0 %vm770_vm1, %v2805_v5 }
  0xa5   : > { %2014 = vmatprep.mubr.msk.bf16.mxu0 %vm2474_vm0, %v2473_v0  ;;  %2011 = vmatpush3.bf16.msra.mxu0 %v2196_v21 }
  0xa6   : > { %2012 = vmatprep.subr.bf16.mxu0 %v2473_v0 }
  0xa9   : > { %2013 = vmatpush3.bf16.msra.mxu0 %v2197_v22 }
  0xaa   : > { %2024 = vmatprep.subr.bf16.mxu0 %v2473_v0 }
  0xac   : > { %2015 = vmatmul.mubr.msk.bf16.vlgmr.msra.gmra.mxu0 %vm770_vm1, %v2805_v5 }
  0xad   : > { %2026 = vmatprep.mubr.msk.bf16.mxu0 %vm2474_vm0, %v2473_v0 }
 0x160   : > { %v871_v8 = vpop.f32.mrf.mxu1 }
 0x161   : > { %v872_v9 = vadd.f32 %v1918_v6, %v871_v8 }
 0x162   : > { %v2008_v12 = vpop.f32.mrf.mxu1 }
 0x163   : > { %v941_v13 = vpack.c.bf16 %v872_v9, %v872_v9 }
 0x164   : > { %v808_v10 = vpop.f32.mrf.mxu0  ;;  %v874_v15 = vpop.f32.mrf.mxu1 }
 0x165   : > { %v809_v11 = vadd.f32 %v1914_v7, %v808_v10  ;;  %1174 = vrot.lane.b32.xlu1 %v941_v13, %s2475_s30  ;;  %1062 = vrot.lane.b32.xlu0 %v941_v13, %s2476_s8  ;;  %v956_v18 = vsel %vm951_vm2, %v941_v13, 0 }
 0x166   : > { %v2000_v14 = vpop.f32.mrf.mxu0  ;;  %v2009_v19 = vpop.f32.mrf.mxu1  ;;  %2019 = vmatpush3.bf16.xpose.msra.mxu1 %v956_v18 }
 0x167   : > { %v940_v16 = vpack.c.bf16 %v809_v11, %v809_v11  ;;  %2030 = vmatprep.subr.bf16.mxu1 %v2473_v0 }
 0x168   : > { %v811_v17 = vpop.f32.mrf.mxu0 }
 0x169   : > { %1172 = vrot.lane.b32.xlu1 %v940_v16, %s2475_s30  ;;  %1059 = vrot.lane.b32.xlu0 %v940_v16, %s2476_s8 }
 0x16a   : > { %v2001_v20 = vpop.f32.mrf.mxu0 }
 0x16c   : > { %v934_v46 = vpop.f32.mrf.mxu0 }
 0x16d   : > { %1283 = vrot.lane.b32.xlu1 %v940_v16, %s2477_s27  ;;  %1285 = vrot.lane.b32.xlu0 %v941_v13, %s2477_s27  ;;  %v935_v47 = vadd.f32 %v1922_v45, %v934_v46 }
 0x16e   : > { %2021 = vmatmul.mubr.msk.bf16.vlgmr.msra.gmra.mxu1 %vm951_vm2, %v940_v16  ;;  %v2016_v48 = vpop.f32.mrf.mxu0 }
 0x16f   : > { %2032 = vmatprep.mubr.msk.bf16.mxu1 %vm2474_vm0, %v2473_v0  ;;  %v942_v49 = vpack.c.bf16 %v935_v47, %v935_v47 }
 0x170   : > { %v937_v50 = vpop.f32.mrf.mxu0 }
 0x171   : > { %v1015_v51 = vsel %vm1013_vm3, %v942_v49, 0 }
 0x172   : > { %v2017_v52 = vpop.f32.mrf.mxu0  ;;  %2025 = vmatpush3.bf16.msra.mxu0 %v1015_v51 }
 0x173   : > { %2036 = vmatprep.subr.bf16.mxu0 %v2473_v0 }
 0x1d7   : > { %v1063_v23 = vpop.permute.xlu0 %1062  ;;  %v1175_v25 = vpop.permute.xlu1 %1174 }
 0x1d8   : > { %v1068_v24 = vsel %vm951_vm2, %v1063_v23, 0  ;;  %v1180_v27 = vsel %vm951_vm2, %v1175_v25, 0 }
 0x1d9   : > { %2031 = vmatpush3.bf16.xpose.msra.mxu1 %v1068_v24 }
 0x1da   : > { %2042 = vmatprep.subr.bf16.mxu1 %v2473_v0 }
 0x1db   : > { %v1060_v26 = vpop.permute.xlu0 %1059  ;;  %v1173_v29 = vpop.permute.xlu1 %1172 }
 0x1df   : > { %v1286_v28 = vpop.permute.xlu0 %1285  ;;  %v1284_v31 = vpop.permute.xlu1 %1283 }
 0x1e0   : > { %2033 = vmatmul.mubr.msk.bf16.vlgmr.msra.gmra.mxu1 %vm951_vm2, %v1060_v26  ;;  %v1291_v30 = vsel %vm951_vm2, %v1286_v28, 0 }
 0x1e1   : > { %2043 = vmatpush3.bf16.xpose.msra.mxu1 %v1180_v27  ;;  %2044 = vmatprep.mubr.msk.bf16.mxu1 %vm2474_vm0, %v2473_v0 }
 0x1e2   : > { %2054 = vmatprep.subr.bf16.mxu1 %v2473_v0 }
 0x1e8   : > { %2045 = vmatmul.mubr.msk.bf16.vlgmr.msra.gmra.mxu1 %vm951_vm2, %v1173_v29 }
 0x1e9   : > { %2055 = vmatpush3.bf16.xpose.msra.mxu1 %v1291_v30  ;;  %2056 = vmatprep.mubr.msk.bf16.mxu1 %vm2474_vm0, %v2473_v0 }
 0x1ea   : > { %2066 = vmatprep.subr.bf16.mxu1 %v2473_v0 }
 0x1f0   : > { %2057 = vmatmul.mubr.msk.bf16.vlgmr.msra.gmra.mxu1 %vm951_vm2, %v1284_v31 }
 0x1f1   : > { %2070 = vmatprep.mubr.msk.bf16.mxu1 %vm2474_vm0, %v2473_v0 }
 0x22e   : > { %v992_v39 = vpop.f32.mrf.mxu1 }
 0x22f   : > { %v993_v40 = vadd.f32 %v992_v39, %v949_v38 }
 0x230   : > { %v2022_v41 = vpop.f32.mrf.mxu1 }
 0x231   : > { %v998_v42 = vsel %vm951_vm2, %v993_v40, -inf }
 0x232   : > { %999 = vmax.xlane.f32.xlu0 %v998_v42  ;;  %v995_v43 = vpop.f32.mrf.mxu1 }
 0x234   : > { %v2023_v44 = vpop.f32.mrf.mxu1 }
 0x2a0   : > { %v1104_v53 = vpop.f32.mrf.mxu1 }
 0x2a1   : > { %v1105_v54 = vadd.f32 %v1104_v53, %v949_v38 }
 0x2a2   : > { %v2034_v55 = vpop.f32.mrf.mxu1 }
 0x2a3   : > { %v1110_v56 = vsel %vm951_vm2, %v1105_v54, -inf  ;;  %v2198_v55 = vld [vmem:[%s3031_s9 + $0x8] sm:$0xff]  }
 0x2a4   : > { %1111 = vmax.xlane.f32.xlu1 %v1110_v56  ;;  %v1107_v57 = vpop.f32.mrf.mxu1  ;;  %2067 = vmatpush3.bf16.msra.mxu1 %v2198_v55 }
 0x2a5   : > { %v2199_v57 = vld [vmem:[%s3031_s9] sm:$0xff]   ;;  %2068 = vmatprep.subr.bf16.mxu1 %v2473_v0 }
 0x2a6   : > { %v2035_v58 = vpop.f32.mrf.mxu1 }
 0x2a8   : > { %v1216_v59 = vpop.f32.mrf.mxu1  ;;  %2069 = vmatpush3.bf16.msra.mxu1 %v2199_v57 }
 0x2a9   : > { %v1217_v60 = vadd.f32 %v1216_v59, %v949_v38  ;;  %2082 = vmatprep.subr.bf16.mxu1 %v2473_v0 }
 0x2aa   : > { %v2046_v61 = vpop.f32.mrf.mxu1 }
 0x2ab   : > { %v1222_v62 = vsel %vm951_vm2, %v1217_v60, -inf }
 0x2ac   : > { %1223 = vmax.xlane.f32.xlu0 %v1222_v62  ;;  %v1219_v63 = vpop.f32.mrf.mxu1 }
 0x2ae   : > { %v2047_v1 = vpop.f32.mrf.mxu1 }
 0x2b0   : > { %v1327_v2 = vpop.f32.mrf.mxu1 }
 0x2b1   : > { %v1328_v3 = vadd.f32 %v1327_v2, %v949_v38 }
 0x2b2   : > { %v2058_v4 = vpop.f32.mrf.mxu1 }
 0x2b3   : > { %v1333_v6 = vsel %vm951_vm2, %v1328_v3, -inf }
 0x2b4   : > { %1334 = vmax.xlane.f32.xlu0 %v1333_v6  ;;  %v1330_v7 = vpop.f32.mrf.mxu1 }
 0x2b6   : > { %v2059_v8 = vpop.f32.mrf.mxu1 }
 0x2bb   : > { %v1000_v9 = vpop.xlane.xlu0 %999 }
 0x2bc   : > { %v1001_v10 = vsub.f32 %v993_v40, %v1000_v9 }
 0x2be   : > { %v1002_v11 = vmul.f32 1.442695, %v1001_v10 }
 0x2c0   : > { %2206 = vpow2.f32 %v1002_v11 }
 0x2cd   : > { %v2207_v12 = vpop.eup %2206 }
 0x2ce   : > { %v1004_v13 = vsel %vm951_vm2, %v2207_v12, 0.0 }
 0x2cf   : > { %1005 = vadd.xlane.f32.xlu1 %v1004_v13 }
 0x2e0   : > { %1123 = vrot.lane.b32.xlu1 %v942_v49, %s2476_s8  ;;  %s3097_s8 = sld [smem:[#allocation28_spill]] }
 0x32d   : > { %v1112_v14 = vpop.xlane.xlu1 %1111 }
 0x32e   : > { %v1113_v15 = vsub.f32 %v1105_v54, %v1112_v14 }
 0x330   : > { %v1114_v16 = vmul.f32 1.442695, %v1113_v15 }
 0x332   : > { %2208 = vpow2.f32 %v1114_v16 }
 0x335   : > { %v1224_v17 = vpop.xlane.xlu0 %1223 }
 0x336   : > { %v1225_v18 = vsub.f32 %v1217_v60, %v1224_v17  ;;  %v1935_v17 = vld [vmem:[%s3032_s10] ss:$0 sm:$0xff] }
 0x338   : > { %v1226_v19 = vmul.f32 1.442695, %v1225_v18  ;;  %v1477_v18 = vunpack.c.l.bf16 %v2805_v5  ;;  %v2200_v5 = vld [vmem:[%s3035_s13 + $0x8] sm:$0xff]  }
 0x33a   : > { %2210 = vpow2.f32 %v1226_v19 }
 0x33d   : > { %v1335_v20 = vpop.xlane.xlu0 %1334 }
 0x33e   : > { %v1336_v21 = vsub.f32 %v1328_v3, %v1335_v20 }
 0x33f   : > { %v2209_v22 = vpop.eup %2208 }
 0x340   : > { %v1337_v23 = vmul.f32 1.442695, %v1336_v21  ;;  %v1116_v24 = vsel %vm951_vm2, %v2209_v22, 0.0 }
 0x341   : > { %1117 = vadd.xlane.f32.xlu0 %v1116_v24 }
 0x342   : > { %2212 = vpow2.f32 %v1337_v23 }
 0x347   : > { %v2211_v25 = vpop.eup %2210 }
 0x348   : > { %v1228_v26 = vsel %vm951_vm2, %v2211_v25, 0.0 }
 0x349   : > { %1229 = vadd.xlane.f32.xlu1 %v1228_v26 }
 0x34f   : > { %v2213_v27 = vpop.eup %2212 }
 0x350   : > { %v1339_v28 = vsel %vm951_vm2, %v2213_v27, 0.0 }
 0x351   : > { %1340 = vadd.xlane.f32.xlu0 %v1339_v28 }
 0x358   : > { %v1006_v29 = vpop.xlane.xlu1 %1005 }
 0x359   : > { %2214 = vrcp.f32 %v1006_v29 }
 0x35a   : > { %1345 = vrot.lane.b32.xlu1 %v942_v49, %s2477_s27 }
 0x35c   : > { %v1124_v31 = vpop.permute.xlu1 %1123 }
 0x35d   : > { %v1129_v34 = vsel %vm1013_vm3, %v1124_v31, 0  ;;  %v2201_v31 = vld [vmem:[%s3035_s13] sm:$0xff]  }
 0x366   : > { %v2215_v30 = vpop.eup %2214 }
 0x367   : > { %1234 = vrot.lane.b32.xlu0 %v942_v49, %s2475_s30  ;;  %v1008_v32 = vmul.f32 %v2215_v30, %v2207_v12  ;;  %s2480_s30 = smov 24  }
 0x369   : > { %v1009_v33 = vpack.c.bf16 %v1008_v32, %v1008_v32  ;;  %v2202_v32 = vld [vmem:[%s3037_s15 + $0x18] sm:$0xff]  }
 0x36b   : > { %2027 = vmatmul.mubr.msk.bf16.vlgmr.msra.gmra.mxu0 %vm951_vm2, %v1009_v33  ;;  %v2203_v33 = vld [vmem:[%s3037_s15 + $0x10] sm:$0xff]  }
 0x36c   : > { %2037 = vmatpush3.bf16.msra.mxu0 %v1129_v34  ;;  %2038 = vmatprep.mubr.msk.bf16.mxu0 %vm2474_vm0, %v2473_v0 }
 0x36d   : > { %2048 = vmatprep.subr.bf16.mxu0 %v2473_v0 }
 0x3ca   : > { %v1118_v35 = vpop.xlane.xlu0 %1117 }
 0x3cb   : > { %2216 = vrcp.f32 %v1118_v35 }
 0x3d2   : > { %v1230_v36 = vpop.xlane.xlu1 %1229 }
 0x3d3   : > { %2218 = vrcp.f32 %v1230_v36 }
 0x3d6   : > { %v1346_v45 = vpop.permute.xlu1 %1345 }
 0x3d7   : > { %v1351_v47 = vsel %vm1013_vm3, %v1346_v45, 0  ;;  %v2205_v45 = vld [vmem:[%s3037_s15] sm:$0xff]  }
 0x3d8   : > { %v2217_v37 = vpop.eup %2216 }
 0x3d9   : > { %v1120_v38 = vmul.f32 %v2217_v37, %v2209_v22 }
 0x3da   : > { %v1341_v39 = vpop.xlane.xlu0 %1340 }
 0x3db   : > { %2220 = vrcp.f32 %v1341_v39  ;;  %v1121_v40 = vpack.c.bf16 %v1120_v38, %v1120_v38  ;;  %v1939_v38 = vld [vmem:[%s3033_s11] ss:$0 sm:$0xff] }
 0x3dd   : > { %2039 = vmatmul.mubr.msk.bf16.vlgmr.msra.gmra.mxu0 %vm951_vm2, %v1121_v40  ;;  %v1940_v40 = vld [vmem:[%s3034_s12] ss:$0 sm:$0xff] }
 0x3de   : > { %v1235_v41 = vpop.permute.xlu0 %1234  ;;  %2050 = vmatprep.mubr.msk.bf16.mxu0 %vm2474_vm0, %v2473_v0 }
 0x3df   : > { %v1240_v42 = vsel %vm1013_vm3, %v1235_v41, 0 }
 0x3e0   : > { %v2219_v43 = vpop.eup %2218  ;;  %2049 = vmatpush3.bf16.msra.mxu0 %v1240_v42 }
 0x3e1   : > { %2060 = vmatprep.subr.bf16.mxu0 %v2473_v0  ;;  %v1232_v44 = vmul.f32 %v2219_v43, %v2211_v25 }
 0x3e3   : > { %v1233_v46 = vpack.c.bf16 %v1232_v44, %v1232_v44  ;;  %v2204_v44 = vld [vmem:[%s3037_s15 + $0x8] sm:$0xff]  }
 0x3e5   : > { %2051 = vmatmul.mubr.msk.bf16.vlgmr.msra.gmra.mxu0 %vm951_vm2, %v1233_v46  ;;  %v1941_v46 = vld [vmem:[%s3036_s14] ss:$0 sm:$0xff] }
 0x3e6   : > { %2061 = vmatpush3.bf16.msra.mxu0 %v1351_v47  ;;  %2062 = vmatprep.mubr.msk.bf16.mxu0 %vm2474_vm0, %v2473_v0 }
 0x3e7   : > { %2074 = vmatprep.subr.bf16.mxu0 %v2473_v0 }
 0x3e8   : > { %v2221_v48 = vpop.eup %2220 }
 0x3e9   : > { %v1343_v49 = vmul.f32 %v2221_v48, %v2213_v27 }
 0x3eb   : > { %v1344_v50 = vpack.c.bf16 %v1343_v49, %v1343_v49 }
 0x3ed   : > { %2063 = vmatmul.mubr.msk.bf16.vlgmr.msra.gmra.mxu0 %vm951_vm2, %v1344_v50 }
 0x3ee   : > { %2078 = vmatprep.mubr.msk.bf16.mxu0 %vm2474_vm0, %v2473_v0  ;;  %2075 = vmatpush3.bf16.msra.mxu0 %v2200_v5 }
 0x3ef   : > { %2076 = vmatprep.subr.bf16.mxu0 %v2473_v0 }
 0x3f2   : > { %2077 = vmatpush3.bf16.msra.mxu0 %v2201_v31 }
 0x42b   : > { %v1051_v51 = vpop.f32.mrf.mxu0 }
 0x42c   : > { %v1057_v11 = vpack.c.bf16 %v1051_v51, %v1051_v51 }
 0x42d   : > { %v2028_v52 = vpop.f32.mrf.mxu0 }
 0x42f   : > { %v1054_v53 = vpop.f32.mrf.mxu0 }
 0x431   : > { %v2029_v54 = vpop.f32.mrf.mxu0 }
 0x49d   : > { %v1165_v56 = vpop.f32.mrf.mxu0 }
 0x49e   : > { %v1171_v58 = vpack.c.bf16 %v1165_v56, %v1165_v56 }
 0x49f   : > { %v2040_v59 = vpop.f32.mrf.mxu0 }
 0x4a0   : > { %1395 = vrot.lane.b32.xlu1 %v1171_v58, %s2478_s0  ;;  %s1913_s0 = sshll.u32 %s740_s18, 3  ;;  %s732_s18 = scalar_lea.vmem [#allocation11], %s1908_s6 }
 0x4a1   : > { %v1168_v60 = vpop.f32.mrf.mxu0  ;;  %s742_s27 = scalar_lea.vmem %s3097_s8, %s1913_s0  ;;  %s1727_s0 = sshll.u32 %s732_s18, 4  ;;  %s2963_s0 = int_to_ptr.vmem [resolvable:$true] %s1727_s0 }
 0x4a2   : > { %s3100_s8 = sld [smem:[#allocation34_spill]]  ;;  %s1710_s6 = scalar_lea.sflag [#allocation4], %s2761_s26 }
 0x4a3   : > { %v2041_v61 = vpop.f32.mrf.mxu0  ;;  %s2360_s3 = scalar_lea.vmem %s2963_s0, 64  ;;  %p2367_p6 = scmp.lt.s32.totalorder %s2963_s0, %s2365_s25 }
 0x4a4   : > { %v2481_v61 = vmov 0   ;;  %p2361_p0 = scmp.ne.s32.totalorder %s2963_s0, %s2360_s3  ;;  %p2368_p8 = scmp.lt.s32.totalorder %s2366_s4, %s2360_s3 }
 0x4a5   : > { %v1276_v62 = vpop.f32.mrf.mxu0  ;;  %2190 = vset.pattern.permute.xlu1 %v2481_v61  ;;  %2191 = vset.pattern.permute.xlu0 %v2481_v61 }
 0x4a6   : > { %v1282_v63 = vpack.c.bf16 %v1276_v62, %v1276_v62  ;;  %v746_v62 = vld [vmem:[%s742_s27] sm:$0xff]  ;;  %p2362_p1 = pnand %p2361_p0, %p3101_p5  ;;  %p2369_p2 = por %p2368_p8, %p2367_p6 }
 0x4a7   : > { %v2052_v1 = vpop.f32.mrf.mxu0 }
 0x4a8   : > { %1398 = vrot.lane.b32.xlu0 %v1282_v63, %s2479_s23  ;;  %s2961_s27 = scalar_lea.hbm %s3100_s8, %s1954_s19  ;;  %p2363_p9 = pneg %p2362_p1 }
 0x4a9   : > { %v1279_v2 = vpop.f32.mrf.mxu0 }
 0x4aa   : > { %p2370_p3 = pnand %p2369_p2, %p2363_p9 }
 0x4ab   : > { %v2053_v3 = vpop.f32.mrf.mxu0 }
 0x4ad   : > { %v1387_v4 = vpop.f32.mrf.mxu0 }
 0x4ae   : > { %v1393_v6 = vpack.c.bf16 %v1387_v4, %v1387_v4 }
 0x4af   : > { %v2064_v7 = vpop.f32.mrf.mxu0 }
 0x4b0   : > { %1401 = vrot.lane.b32.xlu1 %v1393_v6, %s2480_s30 }
 0x4b1   : > { %v1390_v8 = vpop.f32.mrf.mxu0 }
 0x4b3   : > { %v2065_v9 = vpop.f32.mrf.mxu0 }
 0x512   : > { %v1396_v10 = vpop.permute.xlu1 %1395 }
 0x513   : > { %v1405_v13 = vsel %vm951_vm2, %v1057_v11, %v1396_v10  ;;  %v1951_v10 = vld [vmem:[%s3039_s17] ss:$0 sm:$0xff] }
 0x51a   : > { %v1399_v12 = vpop.permute.xlu0 %1398 }
 0x51b   : > { %v1408_v14 = vsel %vm1406_vm4, %v1405_v13, %v1399_v12  ;;  %v1952_v12 = vld [vmem:[%s3098_s28] ss:$0 sm:$0xff] }
 0x522   : > { %v1402_v15 = vpop.permute.xlu1 %1401 }
 0x523   : > { %v1411_v16 = vsel %vm1409_vm5, %v1408_v14, %v1402_v15 }
 0x524   : > { %2071 = vmatmul.mubr.msk.bf16.vlgmr.msra.gmra.mxu1 %vm770_vm1, %v1411_v16 }
 0x525   : > { %2090 = vmatprep.mubr.msk.bf16.mxu1 %vm2474_vm0, %v2473_v0  ;;  %2083 = vmatpush3.bf16.msra.mxu1 %v2202_v32 }
 0x526   : > { %2084 = vmatprep.subr.bf16.mxu1 %v2473_v0 }
 0x529   : > { %2085 = vmatpush3.bf16.msra.mxu1 %v2203_v33 }
 0x52a   : > { %2086 = vmatprep.subr.bf16.mxu1 %v2473_v0 }
 0x52d   : > { %2087 = vmatpush3.bf16.msra.mxu1 %v2204_v44 }
 0x52e   : > { %2088 = vmatprep.subr.bf16.mxu1 %v2473_v0  ;;  %v1945_v0 = vld [vmem:[%s3038_s16] ss:$0 sm:$0xff] }
 0x531   : > { %2089 = vmatpush3.bf16.msra.mxu1 %v2205_v45 }
 0x5e4   : > { %v1471_v19 = vpop.f32.mrf.mxu1 }
 0x5e5   : > { %v1472_v20 = vadd.f32 %v1935_v17, %v1471_v19 }
 0x5e6   : > { %v2072_v21 = vpop.f32.mrf.mxu1 }
 0x5e7   : > { %v1478_v22 = vadd.f32 %v1477_v18, %v1472_v20 }
 0x5e8   : > { %v1474_v23 = vpop.f32.mrf.mxu1 }
 0x5e9   : > { %v1481_v24 = vsel %vm770_vm1, %v1478_v22, 0.0 }
 0x5ea   : > { %1482 = vadd.xlane.f32.xlu0 %v1481_v24  ;;  %v2073_v25 = vpop.f32.mrf.mxu1 }
 0x673   : > { %v1483_v26 = vpop.xlane.xlu0 %1482 }
 0x674   : > { %v1485_v27 = vmul.f32 0.03125, %v1483_v26 }
 0x676   : > { %v1486_v28 = vsub.f32 %v1478_v22, %v1485_v27 }
 0x678   : > { %v1487_v29 = vmul.f32 %v1486_v28, %v1486_v28 }
 0x67a   : > { %v1488_v30 = vsel %vm770_vm1, %v1487_v29, 0.0 }
 0x67b   : > { %1489 = vadd.xlane.f32.xlu1 %v1488_v30 }
 0x68c   : > { %1693 = vperm.xlu1 %2190, %v746_v62  }
 0x704   : > { %v1490_v34 = vpop.xlane.xlu1 %1489 }
 0x705   : > { %v1491_v35 = vmul.f32 0.03125, %v1490_v34 }
 0x707   : > { %v1492_v36 = vadd.f32 1e-05, %v1491_v35 }
 0x708   : > { %v1694_v14 = vpop.permute.xlu1 %1693 }
 0x709   : > { %2222 = vrsqrt.f32 %v1492_v36 }
 0x716   : > { %v2223_v37 = vpop.eup %2222 }
 0x717   : > { %v1494_v39 = vmul.f32 %v2223_v37, %v1486_v28 }
 0x719   : > { %v1501_v41 = vmul.f32 %v1939_v38, %v1494_v39 }
 0x71b   : > { %v1508_v42 = vadd.f32 %v1940_v40, %v1501_v41 }
 0x71d   : > { %v1509_v43 = vpack.c.bf16 %v1508_v42, %v1508_v42 }
 0x71f   : > { %2079 = vmatmul.mubr.msk.bf16.vlgmr.msra.gmra.mxu0 %vm770_vm1, %v1509_v43 }
 0x7df   : > { %v1570_v47 = vpop.f32.mrf.mxu0 }
 0x7e0   : > { %v1571_v48 = vadd.f32 %v1941_v46, %v1570_v47 }
 0x7e1   : > { %v2080_v49 = vpop.f32.mrf.mxu0 }
 0x7e2   : > { %v1576_v50 = vmax.f32 %v1571_v48, 0.0 }
 0x7e3   : > { %v1573_v51 = vpop.f32.mrf.mxu0 }
 0x7e4   : > { %v1577_v52 = vpack.c.bf16 %v1576_v50, %v1576_v50 }
 0x7e5   : > { %v2081_v53 = vpop.f32.mrf.mxu0 }
 0x7e6   : > { %2091 = vmatmul.mubr.msk.bf16.vlgmr.msra.gmra.mxu1 %vm1617_vm6, %v1577_v52 }
 0x8a6   : > { %v1655_v54 = vpop.f32.mrf.mxu1 }
 0x8a7   : > { %v1656_v55 = vadd.f32 %v1945_v0, %v1655_v54 }
 0x8a8   : > { %v2092_v56 = vpop.f32.mrf.mxu1 }
 0x8a9   : > { %v1661_v57 = vadd.f32 %v1656_v55, %v1508_v42 }
 0x8aa   : > { %v1658_v58 = vpop.f32.mrf.mxu1 }
 0x8ab   : > { %v1664_v59 = vsel %vm770_vm1, %v1661_v57, 0.0 }
 0x8ac   : > { %1665 = vadd.xlane.f32.xlu0 %v1664_v59  ;;  %v2093_v60 = vpop.f32.mrf.mxu1 }
 0x935   : > { %v1666_v63 = vpop.xlane.xlu0 %1665 }
 0x936   : > { %v1667_v1 = vmul.f32 0.03125, %v1666_v63 }
 0x938   : > { %v1668_v2 = vsub.f32 %v1661_v57, %v1667_v1 }
 0x93a   : > { %v1669_v3 = vmul.f32 %v1668_v2, %v1668_v2 }
 0x93c   : > { %v1670_v4 = vsel %vm770_vm1, %v1669_v3, 0.0 }
 0x93d   : > { %1671 = vadd.xlane.f32.xlu0 %v1670_v4 }
 0x9c6   : > { %v1672_v6 = vpop.xlane.xlu0 %1671 }
 0x9c7   : > { %v1673_v7 = vmul.f32 0.03125, %v1672_v6 }
 0x9c9   : > { %v1674_v8 = vadd.f32 1e-05, %v1673_v7 }
 0x9cb   : > { %2224 = vrsqrt.f32 %v1674_v8 }
 0x9d8   : > { %v2225_v9 = vpop.eup %2224 }
 0x9d9   : > { %v1676_v11 = vmul.f32 %v2225_v9, %v1668_v2 }
 0x9db   : > { %v1683_v13 = vmul.f32 %v1951_v10, %v1676_v11 }
 0x9dd   : > { %v1690_v15 = vadd.f32 %v1952_v12, %v1683_v13 }
 0x9df   : > { %v1696_v16 = vmul.f32 %v1694_v14, %v1690_v15 }
 0x9e1   : > { %v1697_v17 = vpack.c.bf16 %v1696_v16, %v1696_v16  ;;  %v1700_v18 = vsel %vm770_vm1, %v1696_v16, 0.0 }
 0x9e2   : > { %v1701_v19 = vrot.slane %v1700_v18, 4 }
 0x9e3   : > { %1699 = vst.msk [vmem:[%s732_s18] sm:$0xf] %vm1698_vm7, %v1697_v17 }
 0x9e4   : > { %v1702_v20 = vadd.f32 %v1701_v19, %v1700_v18 }
 0x9e5   : > { %2373 = shalt.err (!%p2370_p3)
}
 0x9e6   : > { %s2374_s28 = scalar_lea.hbm %s2961_s27, 64  ;;  %s2378_s23 = scalar_lea.hbm %s3100_s8, 128 }
 0x9e7   : > { %p2375_p4 = scmp.ne.s32.totalorder %s2961_s27, %s2374_s28  ;;  %p2379_p12 = scmp.lt.s32.totalorder %s2961_s27, %s3100_s8 }
 0x9e8   : > { %p2380_p10 = scmp.lt.s32.totalorder %s2378_s23, %s2374_s28 }
 0x9e9   : > { %p2376_p11 = pnand %p2375_p4, %p3101_p5 }
 0x9ea   : > { %p2381_p13 = por %p2380_p10, %p2379_p12 }
 0x9eb   : > { %p2377_p7 = pneg %p2376_p11 }
 0x9ed   : > { %p2382_p0 = pnand %p2381_p13, %p2377_p7 }
 0x9ef   : > { %2385 = shalt.err (!%p2382_p0)
}
 0x9f0   : > { %2110 = dma.vmem_to_hbm [thread:$0]  (%p3101_p5), %s2963_s0, 64, %s2961_s27, %s1710_s6   ;;  %v1703_v21 = vrot.slane %v1702_v20, 2  ;;  %vm1707_vm8 = vcmask 253952  }
 0x9f1   : > { %s1955_s3 = sshll.u32 %s2610_s2, 4  ;;  %s738_s25 = scalar_lea.vmem [#allocation12], %s2761_s26 }
 0x9f2   : > { %v1704_v22 = vadd.f32 %v1703_v21, %v1702_v20  ;;  %s1740_s4 = sshll.u32 %s738_s25, 4  ;;  %s3102_s18 = sld [smem:[#allocation35_spill]]  ;;  %s1741_s4 = int_to_ptr.vmem [resolvable:$true] %s1740_s4 }
 0x9f3   : > { %s1715_s30 = scalar_lea.sflag [#allocation13], %s2761_s26  ;;  %s2386_s21 = scalar_lea.vmem %s1741_s4, 16 }
 0x9f4   : > { %v1705_v23 = vrot.slane %v1704_v22, 1  ;;  %p2387_p1 = scmp.ne.s32.totalorder %s1741_s4, %s2386_s21  ;;  %s2483_s0 = smov [#allocation12]  }
 0x9f5   : > { %s2390_s27 = sshll.u32 %s2483_s0, 4  ;;  %s2391_s27 = int_to_ptr.vmem [resolvable:$false] %s2390_s27 }
 0x9f6   : > { %v1706_v24 = vadd.f32 %v1705_v23, %v1704_v22  ;;  %p2388_p9 = pnand %p2387_p1, %p3101_p5  ;;  %s2392_s2 = scalar_lea.vmem %s2391_s27, 32 }
 0x9f7   : > { %p2393_p8 = scmp.lt.s32.totalorder %s1741_s4, %s2391_s27  ;;  %p2394_p2 = scmp.lt.s32.totalorder %s2392_s2, %s2386_s21 }
 0x9f8   : > { %s1738_s23 = scalar_lea.hbm %s3102_s18, %s1955_s3  ;;  %1708 = vst.msk [vmem:[%s738_s25] sm:$0x1] %vm1707_vm8, %v1706_v24  ;;  %p2389_p6 = pneg %p2388_p9 }
 0x9f9   : > { %p2395_p3 = por %p2394_p2, %p2393_p8 }
 0x9fb   : > { %p2396_p4 = pnand %p2395_p3, %p2389_p6 }
 0x9fd   : > { %2399 = shalt.err (!%p2396_p4)
}
 0x9fe   : > { %s2400_s6 = scalar_lea.hbm %s1738_s23, 16  ;;  %s2404_s25 = scalar_lea.hbm %s3102_s18, 32 }
 0x9ff   : > { %p2401_p11 = scmp.ne.s32.totalorder %s1738_s23, %s2400_s6  ;;  %p2405_p10 = scmp.lt.s32.totalorder %s1738_s23, %s3102_s18 }
 0xa00   : > { %p2406_p13 = scmp.lt.s32.totalorder %s2404_s25, %s2400_s6 }
 0xa01   : > { %p2402_p7 = pnand %p2401_p11, %p3101_p5 }
 0xa02   : > { %p2407_p0 = por %p2406_p13, %p2405_p10 }
 0xa03   : > { %p2403_p12 = pneg %p2402_p7 }
 0xa05   : > { %p2408_p1 = pnand %p2407_p0, %p2403_p12 }
 0xa07   : > { %2411 = shalt.err (!%p2408_p1)
}
 0xa08   : > { %2111 = dma.vmem_to_hbm [thread:$0]  (%p3101_p5), %s1741_s4, 16, %s1738_s23, %s1715_s30  }
 0xa09 PF: > { %s3103_s21 = sld [smem:[#allocation20_spill]]  ;;  %p3106_p6 = scmp.ge.s32.totalorder %s2466_s24, 2 }
 0xa0a   : > { %s3104_s0 = sld [smem:[#allocation22_spill]] }
 0xa0f   : > { %s1752_s27 = sand.u32 1, %s3103_s21  }
 0xa10   : > { %p3105_p9 = scmp.ne.s32.totalorder %s3104_s0, 0  ;;  %s1753_s2 = scalar_lea.sflag [#allocation4], %s1752_s27 }
 0xa12   : > { %p2132_p8 = pnand %p3106_p6, %p3105_p9 }
 0xa14   : > { %p2133_p2 = pneg %p2132_p8 }
 0xa16   : > { %2445 = dma.done.wait (%p2133_p2), %s1753_s2, 64  }
 0xa17   : > { %2447 = vsyncadd (%p2133_p2), %s1753_s2, 4294967232  ;;  %s1762_s26 = scalar_lea.sflag [#allocation13], %s1752_s27 }
 0xa18   : > { %2449 = dma.done.wait (%p2133_p2), %s1762_s26, 16  }
 0xa19   : > { %2451 = vsyncadd (%p2133_p2), %s1762_s26, 4294967280  ;;  %s3107_s24 = sld [smem:[#allocation23_spill]]  ;;  %s3110_s1 = smov %s2458_s22 }
 0xa1a   : > { %s3108_s6 = sld [smem:[#allocation21_spill]] }
 0xa1b   : > { %s3109_s23 = sld [smem:[#allocation24_spill]] }
 0xa1f   : > { %p41_p5 = scmp.ge.s32.totalorder %s3107_s24, 4  }
 0xa20   : > { %s3111_s22 = smov %s3108_s6 }
 0xa21   :  { %43 = sbr.rel (!%p41_p5) target bundleno = 21 (0x15), region = 186 }
 0xa26   :  { %1766 = vsyncpa [#allocation3], 1 }
 0xa27   :  { %1768 = vsyncpa [#allocation3 + $0x1], 1 }
 0xa28   :  { %1769 = vsyncpa [#allocation6], 1 }
 0xa29   :  { %1771 = vsyncpa [#allocation6 + $0x1], 1 }
 0xa2a   :  { %1772 = vsyncpa [#allocation9], 1 }
 0xa2b   :  { %1773 = vsyncpa [#allocation4], 1 }
 0xa2c   :  { %1775 = vsyncpa [#allocation4 + $0x1], 1 }
 0xa2d   :  { %1776 = vsyncpa [#allocation13], 1 }
 0xa2e   :  { %1778 = vsyncpa [#allocation13 + $0x1], 1 }

// kernel: tpu_custom_call.1
= control target key start
LH: loop header
LB: loop body
LE: loop exit
PB: predicated region body
PF: predicated region fallthrough
CT: control target
= control target key end

     0   :  { %s3022_s0 = inlined_call_operand.hbm [shape: bf16[2,8,32], index: 0, kind: input, shape index: {}]   ;;  %s3023_s1 = inlined_call_operand.hbm [shape: f32[2,1,8], index: 1, kind: input, shape index: {}]   ;;  %s3024_s2 = inlined_call_operand.vmem [shape: f32[2,8,1], index: 2, kind: input, shape index: {}]   ;;  %s3025_s3 = inlined_call_operand.vmem [shape: bf16[32,32], index: 3, kind: input, shape index: {}]   ;;  %s3026_s4 = inlined_call_operand.hbm [shape: f32[1,32], index: 4, kind: input, shape index: {}]   ;;  %s3027_s5 = inlined_call_operand.vmem [shape: bf16[32,32], index: 5, kind: input, shape index: {}]   ;;  %s3028_s6 = inlined_call_operand.hbm [shape: f32[1,32], index: 6, kind: input, shape index: {}]   ;;  %s3029_s7 = inlined_call_operand.vmem [shape: bf16[32,32], index: 7, kind: input, shape index: {}]   ;;  %s3030_s8 = inlined_call_operand.hbm [shape: f32[1,32], index: 8, kind: input, shape index: {}]   ;;  %s3031_s9 = inlined_call_operand.vmem [shape: bf16[32,32], index: 9, kind: input, shape index: {}]   ;;  %s3032_s10 = inlined_call_operand.vmem [shape: f32[1,32], index: 10, kind: input, shape index: {}]   ;;  %s3033_s11 = inlined_call_operand.vmem [shape: f32[1,32], index: 11, kind: input, shape index: {}]   ;;  %s3034_s12 = inlined_call_operand.vmem [shape: f32[1,32], index: 12, kind: input, shape index: {}]   ;;  %s3035_s13 = inlined_call_operand.vmem [shape: bf16[32,64], index: 13, kind: input, shape index: {}]   ;;  %s3036_s14 = inlined_call_operand.vmem [shape: f32[1,64], index: 14, kind: input, shape index: {}]   ;;  %s3037_s15 = inlined_call_operand.vmem [shape: bf16[64,32], index: 15, kind: input, shape index: {}]   ;;  %s3038_s16 = inlined_call_operand.vmem [shape: f32[1,32], index: 16, kind: input, shape index: {}]   ;;  %s3039_s17 = inlined_call_operand.vmem [shape: f32[1,32], index: 17, kind: input, shape index: {}]   ;;  %s3040_s18 = inlined_call_operand.vmem [shape: f32[1,32], index: 18, kind: input, shape index: {}]   ;;  %s3041_s19 = inlined_call_operand.hbm [shape: bf16[2,8,32], index: 19, kind: output, shape index: {0}]   ;;  %s3042_s20 = inlined_call_operand.hbm [shape: f32[2,1,32], index: 20, kind: output, shape index: {1}]  }
   0x1   :  { %3060 = sst [smem:[#allocation26_spill]] %s3022_s0 }
   0x2   :  { %3061 = sst [smem:[#allocation27_spill]] %s3023_s1 }
   0x3   :  { %3062 = sst [smem:[#allocation28_spill]] %s3024_s2 }
   0x4   :  { %3063 = sst [smem:[#allocation29_spill]] %s3025_s3 }
   0x5   :  { %3064 = sst [smem:[#allocation30_spill]] %s3026_s4 }
   0x6   :  { %3065 = sst [smem:[#allocation31_spill]] %s3028_s6 }
   0x7   :  { %3066 = sst [smem:[#allocation32_spill]] %s3030_s8 }
   0x8   :  { %3067 = sst [smem:[#allocation33_spill]] %s3040_s18 }
   0x9   :  { %3068 = sst [smem:[#allocation34_spill]] %s3041_s19 }
   0xa   :  { %3069 = sst [smem:[#allocation35_spill]] %s3042_s20 }
   0xb   :  { %26 = vsyncpa [#allocation3], 0 }
   0xc   :  { %28 = vsyncpa [#allocation3 + $0x1], 0 }
   0xd   :  { %29 = vsyncpa [#allocation6], 0 }
   0xe   :  { %31 = vsyncpa [#allocation6 + $0x1], 0 }
   0xf   :  { %32 = vsyncpa [#allocation9], 0 }
  0x10   :  { %33 = vsyncpa [#allocation4], 0 }
  0x11   :  { %35 = vsyncpa [#allocation4 + $0x1], 0 }
  0x12   :  { %36 = vsyncpa [#allocation13], 0 }
  0x13   :  { %38 = vsyncpa [#allocation13 + $0x1], 0  ;;  %s2589_s1 = smov 0   ;;  %s2591_s22 = smov 0  }
  0x14   :  { %s2593_s23 = smov 0   ;;  %s2595_s24 = smov 0  }
  0x15 LB: > { %3070 = sst [smem:[#allocation20_spill]] %s2454_s1  ;;  %s2610_s2 = sadd.s32 4294967295, %s2466_s24   ;;  %s2466_s24 = sphi %s2595_s24, %s3107_s24   ;;  %s2462_s23 = sphi %s2593_s23, %s3109_s23   ;;  %s2458_s22 = sphi %s2591_s22, %s3111_s22   ;;  %s2454_s1 = sphi %s2589_s1, %s3110_s1  }
  0x16   : > { %3071 = sst [smem:[#allocation21_spill]] %s2462_s23  ;;  %s1898_s25 = sadd.s32 4294967294, %s2466_s24  }
  0x17   : > { %p64_p0 = scmp.ne.s32.totalorder %s2458_s22, %s2454_s1  ;;  %p3049_p1 = scmp.eq.s32.totalorder %s2610_s2, 0 }
  0x18   : > { %p482_p3 = scmp.eq.s32.totalorder %s1898_s25, 1  ;;  %p1899_p5 = scmp.ge.s32.totalorder %s2466_s24, 1 }
  0x19   : > { %p2619_p4 = por %p3049_p1, %p64_p0  ;;  %p515_p7 = scmp.lt.s32.totalorder %s2466_s24, 3 }
  0x1a   : > { %p2624_p6 = por %p482_p3, %p64_p0  ;;  %s2468_s28 = smov [#allocation7]  }
  0x1b   : > { %s3072_s3 = scalar_select %p2619_p4, 1, 0 }
  0x1c   : > { %s3073_s26 = scalar_select %p2624_p6, 1, 0 }
  0x1d   : > { %p2629_p8 = pnand %p1899_p5, %p515_p7  ;;  %s531_s4 = sshll.u32 %s2468_s28, 4  ;;  %s532_s4 = int_to_ptr.vmem [resolvable:$true] %s531_s4 }
  0x1e   : > { %3074 = sst [smem:[#allocation22_spill]] %s3073_s26  ;;  %s2469_s29 = smov [#allocation8]  }
  0x1f   : > { %s3075_s27 = scalar_select %p2629_p8, 1, 0 }
  0x20   : > { %p2114_p10 = pneg %p2629_p8  ;;  %s545_s30 = sshll.u32 %s2469_s29, 4  ;;  %s546_s30 = int_to_ptr.vmem [resolvable:$true] %s545_s30 }
  0x21   : > { %s2470_s21 = smov [#allocation10]   ;;  %s2237_s28 = scalar_lea.vmem %s532_s4, 16 }
  0x22   : > { %p2638_p11 = pnand %p2114_p10, %p3049_p1  ;;  %s559_s25 = sshll.u32 %s2470_s21, 4  ;;  %s2642_s25 = int_to_ptr.vmem [resolvable:$true] %s559_s25 }
  0x23   : > { %p2238_p13 = scmp.ne.s32.totalorder %s532_s4, %s2237_s28  ;;  %s2244_s29 = scalar_lea.vmem %s532_s4, 32 }
  0x24   : > { %p2228_p12 = pneg %p2638_p11  ;;  %p2245_p5 = scmp.lt.s32.totalorder %s532_s4, %s532_s4 }
  0x25   : > { %p2246_p7 = scmp.lt.s32.totalorder %s2244_s29, %s2237_s28 }
  0x26   : > { %p2240_p0 = pnand %p2238_p13, %p2228_p12 }
  0x27   : > { %p2247_p10 = por %p2246_p7, %p2245_p5 }
  0x28   : > { %p2241_p3 = pneg %p2240_p0 }
  0x2a   : > { %p2248_p9 = pnand %p2247_p10, %p2241_p3 }
  0x2c   : > { %2251 = shalt.err (!%p2248_p9)
}
  0x2d   : > { %s3077_s1 = sld [smem:[#allocation30_spill]]  ;;  %s2263_s20 = scalar_lea.vmem %s546_s30, 16 }
  0x2e   : > { %p2264_p1 = scmp.ne.s32.totalorder %s546_s30, %s2263_s20  ;;  %s2270_s19 = scalar_lea.vmem %s546_s30, 32 }
  0x2f   : > { %p2271_p0 = scmp.lt.s32.totalorder %s546_s30, %s546_s30  ;;  %p2272_p6 = scmp.lt.s32.totalorder %s2270_s19, %s2263_s20 }
  0x30   : > { %p2266_p2 = pnand %p2264_p1, %p2228_p12 }
  0x31   : > { %p2273_p4 = por %p2272_p6, %p2271_p0 }
  0x32   : > { %p2267_p13 = pneg %p2266_p2 }
  0x33   : > { %2117 = dma.hbm_to_vmem [thread:$0]  (!%p2638_p11), %s3077_s1, 16, %s532_s4, [#allocation6]  }
  0x34   : > { %p2274_p5 = pnand %p2273_p4, %p2267_p13 }
  0x36   : > { %2277 = shalt.err (!%p2274_p5)
}
  0x37   : > { %s3078_s6 = sld [smem:[#allocation31_spill]]  ;;  %s2289_s1 = scalar_lea.vmem %s2642_s25, 16 }
  0x38   : > { %p2290_p1 = scmp.ne.s32.totalorder %s2642_s25, %s2289_s1  ;;  %s2296_s19 = scalar_lea.vmem %s2642_s25, 32 }
  0x39   : > { %p2297_p4 = scmp.lt.s32.totalorder %s2642_s25, %s2642_s25  ;;  %p2298_p6 = scmp.lt.s32.totalorder %s2296_s19, %s2289_s1 }
  0x3a   : > { %p2292_p2 = pnand %p2290_p1, %p2228_p12 }
  0x3b   : > { %p2299_p3 = por %p2298_p6, %p2297_p4 }
  0x3c   : > { %p2293_p9 = pneg %p2292_p2 }
  0x3d   : > { %2120 = dma.hbm_to_vmem [thread:$0]  (!%p2638_p11), %s3078_s6, 16, %s546_s30, [#allocation9]  }
  0x3e   : > { %p2300_p7 = pnand %p2299_p3, %p2293_p9 }
  0x40   : > { %2303 = shalt.err (!%p2300_p7)
}
  0x41   : > { %s3079_s8 = sld [smem:[#allocation32_spill]]  ;;  %s2677_s4 = sadd.s32 1, %s2466_s24  }
  0x42   : > { %3080 = sst [smem:[#allocation23_spill]] %s2677_s4  ;;  %s48_s30 = ssub.s32 %s2466_s24, %s2677_s4 }
  0x43   : > { %s51_s0 = sadd.s32 1, %s2462_s23  ;;  %p49_p12 = scmp.eq.s32.totalorder %s48_s30, 0 }
  0x44   : > { %p58_p10 = scmp.ne.s32.totalorder %s2462_s23, %s2458_s22  ;;  %p59_p13 = scmp.eq.s32.totalorder %s2466_s24, 0 }
  0x45   : > { %p2141_p0 = scmp.lt.s32.totalorder %s2466_s24, 2  ;;  %p3082_p1 = scmp.eq.s32.totalorder %s2610_s2, 1 }
  0x46   : > { %s2687_s21 = scalar_select %p49_p12, %s2462_s23, %s51_s0  }
  0x47   : > { %2123 = dma.hbm_to_vmem [thread:$0]  (!%p2638_p11), %s3079_s8, 16, %s2642_s25, [#allocation9]  }
  0x48   : > { %3081 = sst [smem:[#allocation24_spill]] %s2687_s21  ;;  %p60_p5 = por %p59_p13, %p58_p10 }
  0x49   : > { %p2691_p2 = por %p3082_p1, %p58_p10  ;;  %s2696_s29 = sand.u32 1, %s2462_s23  }
  0x4a   : > { %s1905_s25 = sshll.u32 %s2466_s24, 6  ;;  %s1904_s1 = sshll.u32 %s2696_s29, 2 }
  0x4b   : > { %s3083_s28 = scalar_select %p2691_p2, 1, 0 }
  0x4c   : > { %s3085_s26 = sld [smem:[#allocation26_spill]]  ;;  %s604_s0 = scalar_lea.vmem [#allocation2], %s1904_s1 }
  0x4d   : > { %3084 = sst [smem:[#allocation25_spill]] %s3083_s28  ;;  %s611_s6 = sshll.u32 %s604_s0, 4  ;;  %s612_s6 = int_to_ptr.vmem [resolvable:$true] %s611_s6 }
  0x4e   : > { %p2705_p11 = pnand %p2141_p0, %p60_p5  ;;  %s601_s23 = scalar_lea.sflag [#allocation3], %s2696_s29 }
  0x50   : > { %p2306_p4 = pneg %p2705_p11 }
  0x52   : > { %s2703_s30 = scalar_lea.hbm %s3085_s26, %s1905_s25  ;;  %s2309_s19 = scalar_lea.hbm %s3085_s26, 128 }
  0x53   : > { %s2304_s4 = scalar_lea.hbm %s2703_s30, 64  ;;  %p2310_p7 = scmp.lt.s32.totalorder %s2703_s30, %s3085_s26 }
  0x54   : > { %p2305_p9 = scmp.ne.s32.totalorder %s2703_s30, %s2304_s4  ;;  %p2311_p12 = scmp.lt.s32.totalorder %s2309_s19, %s2304_s4 }
  0x56   : > { %p2307_p6 = pnand %p2306_p4, %p2305_p9  ;;  %p2312_p10 = por %p2311_p12, %p2310_p7 }
  0x58   : > { %p2308_p3 = pneg %p2307_p6 }
  0x5a   : > { %p2313_p13 = pnand %p2312_p10, %p2308_p3 }
  0x5c   : > { %2316 = shalt.err (!%p2313_p13)
}
  0x5d   : > { %s2317_s21 = scalar_lea.vmem %s612_s6, 64  ;;  %s2471_s28 = smov [#allocation2]  }
  0x5e   : > { %p2318_p0 = scmp.ne.s32.totalorder %s612_s6, %s2317_s21  ;;  %s2322_s18 = sshll.u32 %s2471_s28, 4  ;;  %s2323_s18 = int_to_ptr.vmem [resolvable:$false] %s2322_s18 }
  0x5f   : > { %s2324_s25 = scalar_lea.vmem %s2323_s18, 128  ;;  %p2325_p9 = scmp.lt.s32.totalorder %s612_s6, %s2323_s18 }
  0x60   : > { %p2320_p5 = pnand %p2318_p0, %p2306_p4  ;;  %p2326_p6 = scmp.lt.s32.totalorder %s2324_s25, %s2317_s21 }
  0x62   : > { %p2321_p1 = pneg %p2320_p5  ;;  %p2327_p2 = por %p2326_p6, %p2325_p9 }
  0x64   : > { %p2328_p8 = pnand %p2327_p2, %p2321_p1 }
  0x66   : > { %2331 = shalt.err (!%p2328_p8)
}
  0x67   : > { %2127 = dma.hbm_to_vmem [thread:$0]  (!%p2705_p11), %s2703_s30, 64, %s612_s6, %s601_s23  }
  0x68   : > { %s1906_s4 = sshll.u32 %s2466_s24, 4  ;;  %s3087_s20 = sld [smem:[#allocation27_spill]] }
  0x69   : > { %s621_s18 = scalar_lea.vmem [#allocation5], %s2696_s29  ;;  %s3088_s0 = sand.u32 1, %s2466_s24  }
  0x6a   : > { %s628_s21 = sshll.u32 %s621_s18, 4  ;;  %s619_s25 = scalar_lea.sflag [#allocation6], %s3088_s0  ;;  %s629_s21 = int_to_ptr.vmem [resolvable:$true] %s628_s21 }
  0x6e   : > { %s2735_s28 = scalar_lea.hbm %s3087_s20, %s1906_s4  ;;  %s2337_s30 = scalar_lea.hbm %s3087_s20, 32 }
  0x6f   : > { %s2332_s26 = scalar_lea.hbm %s2735_s28, 16  ;;  %p2338_p7 = scmp.lt.s32.totalorder %s2735_s28, %s3087_s20 }
  0x70   : > { %p2333_p8 = scmp.ne.s32.totalorder %s2735_s28, %s2332_s26  ;;  %p2339_p12 = scmp.lt.s32.totalorder %s2337_s30, %s2332_s26 }
  0x72   : > { %p2335_p2 = pnand %p2333_p8, %p2306_p4  ;;  %p2340_p10 = por %p2339_p12, %p2338_p7 }
  0x74   : > { %p2336_p3 = pneg %p2335_p2 }
  0x76   : > { %p2341_p13 = pnand %p2340_p10, %p2336_p3 }
  0x78   : > { %2344 = shalt.err (!%p2341_p13)
}
  0x79   : > { %s2345_s29 = scalar_lea.vmem %s629_s21, 16  ;;  %s2472_s19 = smov [#allocation5]  }
  0x7a   : > { %p2346_p0 = scmp.ne.s32.totalorder %s629_s21, %s2345_s29  ;;  %s2350_s18 = sshll.u32 %s2472_s19, 4  ;;  %s2351_s18 = int_to_ptr.vmem [resolvable:$false] %s2350_s18 }
  0x7b   : > { %s2352_s0 = scalar_lea.vmem %s2351_s18, 32  ;;  %p2353_p9 = scmp.lt.s32.totalorder %s629_s21, %s2351_s18 }
  0x7c   : > { %p2348_p5 = pnand %p2346_p0, %p2306_p4  ;;  %p2354_p6 = scmp.lt.s32.totalorder %s2352_s0, %s2345_s29 }
  0x7e   : > { %p2349_p1 = pneg %p2348_p5  ;;  %p2355_p8 = por %p2354_p6, %p2353_p9 }
  0x80   : > { %p2356_p2 = pnand %p2355_p8, %p2349_p1 }
  0x82   : > { %2359 = shalt.err (!%p2356_p2)
}
  0x83   : > { %2130 = dma.hbm_to_vmem [thread:$0]  (!%p2705_p11), %s2735_s28, 16, %s629_s21, %s619_s25  }
  0x84   : > { %p3089_p3 = scmp.ne.s32.totalorder %s3075_s27, 0 }
  0x85   : > { %s2761_s26 = sand.u32 (!%p3089_p3), 1, %s2458_s22   ;;  %p3090_p4 = scmp.ne.s32.totalorder (!%p3089_p3), %s3072_s3, 0 }
  0x86   : > { %644 = sbr.rel (%p3089_p3) target bundleno = 2569 (0xa09), region = 96  ;;  %s1908_s6 = sshll.u32 (!%p3089_p3), %s2761_s26, 2 }
  0x87   : > { %s647_s23 = scalar_lea.sflag (!%p3089_p3), [#allocation3], %s2761_s26  ;;  %s650_s30 = scalar_lea.vmem (!%p3089_p3), [#allocation2], %s1908_s6 }
  0x8b   : > { %2429 = dma.done.wait (%p3090_p4), %s647_s23, 64  }
  0x8c   : > { %2431 = vsyncadd (%p3090_p4), %s647_s23, 4294967232  ;;  %s655_s8 = sand.u32 1, %s2610_s2   ;;  %s658_s28 = scalar_lea.vmem [#allocation5], %s2761_s26 }
  0x8d   : > { %s656_s27 = scalar_lea.sflag [#allocation6], %s655_s8 }
  0x8e   : > { %2433 = dma.done.wait (%p3090_p4), %s656_s27, 16  }
  0x8f   : > { %2435 = vsyncadd (%p3090_p4), %s656_s27, 4294967280  ;;  %p3091_p11 = scmp.eq.s32.totalorder %s2610_s2, 0 }
  0x91   : > { %2437 = dma.done.wait (%p3091_p11), [#allocation6], 16   ;;  %p3092_p7 = pmov %p3091_p11 }
  0x93   : > { %2439 = vsyncadd (%p3092_p7), [#allocation6], 4294967280  ;;  %p3093_p12 = pmov %p3092_p7 }
  0x94   : > { %p3094_p10 = pmov %p3092_p7 }
  0x95   : > { %2441 = dma.done.wait (%p3093_p12), [#allocation9], 32  }
  0x96   : > { %2443 = vsyncadd (%p3094_p10), [#allocation9], 4294967264  ;;  %v2473_v0 = vmov 0.0   ;;  %vm2474_vm0 = vmmov 0   ;;  %v2192_v1 = vld [vmem:[%s3027_s5 + $0x8] sm:$0xff]   ;;  %s3095_s1 = sld [smem:[#allocation29_spill]]  ;;  %v946_v32 = vlaneseq }
  0x97   : > { %2002 = vmatprep.subr.bf16.mxu1 %v2473_v0  ;;  %1994 = vmatprep.subr.bf16.mxu0 %v2473_v0  ;;  %v2194_v3 = vld [vmem:[%s3027_s5] sm:$0xff]   ;;  %vm770_vm1 = vcmask 261120   ;;  %v1918_v6 = vld [vmem:[#allocation8] ss:$0 sm:$0xff]  ;;  %v1914_v7 = vld [vmem:[#allocation7] ss:$0 sm:$0xff] }
  0x98   : > { %2006 = vmatprep.mubr.msk.bf16.mxu1 %vm2474_vm0, %v2473_v0  ;;  %1998 = vmatprep.mubr.msk.bf16.mxu0 %vm2474_vm0, %v2473_v0  ;;  %v2805_v5 = vld [vmem:[%s650_s30] sm:$0xf]  ;;  %vm951_vm2 = vcmask 64512   ;;  %s2475_s30 = smov 112   ;;  %s2476_s8 = smov 120   ;;  %v2196_v21 = vld [vmem:[%s3029_s7 + $0x8] sm:$0xff]  }
  0x99   : > { %2003 = vmatpush3.bf16.msra.mxu1 %v2192_v1  ;;  %s2477_s27 = smov 104   ;;  %v2197_v22 = vld [vmem:[%s3029_s7] sm:$0xff]   ;;  %v947_v35 = vshrl.u32 %v946_v32, 7  ;;  %v1922_v45 = vld [vmem:[#allocation10] ss:$0 sm:$0xff]  ;;  %vm1013_vm3 = vcmask 1043456  }
  0x9a   : > { %2004 = vmatprep.subr.bf16.mxu1 %v2473_v0  ;;  %v745_v33 = vld [vmem:[%s658_s28] sm:$0x1]  ;;  %s2478_s0 = smov 8   ;;  %s2479_s23 = smov 16   ;;  %vm1406_vm4 = vcmask 130048   ;;  %vm1409_vm5 = vcmask 195584  }
  0x9b   : > { %v1926_v34 = vadd.f32 -1.0, %v745_v33  ;;  %v948_v37 = vsub.s32 0, %v947_v35  ;;  %vm1617_vm6 = vcmask 523264   ;;  %p739_p13 = scmp.lt.s32.totalorder %s2610_s2, 1  ;;  %s3098_s28 = sld [smem:[#allocation33_spill]]  ;;  %vm1698_vm7 = vcmask 257024  }
  0x9c   : > { %s3096_s29 = smov %s3095_s1  ;;  %v2193_v2 = vld [vmem:[%s3095_s1 + $0x8] sm:$0xff]   ;;  %s3099_s1 = sld [smem:[#allocation25_spill]] }
  0x9d   : > { %1995 = vmatpush3.bf16.msra.mxu0 %v2193_v2  ;;  %v2195_v4 = vld [vmem:[%s3096_s29] sm:$0xff]   ;;  %2005 = vmatpush3.bf16.msra.mxu1 %v2194_v3  ;;  %v944_v36 = vmul.f32 1e+20, %v1926_v34  ;;  %s740_s18 = scalar_select %p739_p13, %s2610_s2, 1 }
  0x9e   : > { %1996 = vmatprep.subr.bf16.mxu0 %v2473_v0  ;;  %2018 = vmatprep.subr.bf16.mxu1 %v2473_v0  ;;  %s1954_s19 = sshll.u32 %s2610_s2, 6  ;;  %s2482_s21 = smov [#allocation11]  }
  0x9f   : > { %v949_v38 = vrot.slane %v944_v36, %v948_v37  ;;  %s2364_s25 = sshll.u32 %s2482_s21, 4  ;;  %s2365_s25 = int_to_ptr.vmem [resolvable:$false] %s2364_s25 }
  0xa0   : > { %2007 = vmatmul.mubr.msk.bf16.vlgmr.msra.gmra.mxu1 %vm770_vm1, %v2805_v5  ;;  %s2366_s4 = scalar_lea.vmem %s2365_s25, 128 }
  0xa1   : > { %1997 = vmatpush3.bf16.msra.mxu0 %v2195_v4  ;;  %2020 = vmatprep.mubr.msk.bf16.mxu1 %vm2474_vm0, %v2473_v0 }
  0xa2   : > { %2010 = vmatprep.subr.bf16.mxu0 %v2473_v0  ;;  %p3101_p5 = scmp.ne.s32.totalorder %s3099_s1, 0 }
  0xa4   : > { %1999 = vmatmul.mubr.msk.bf16.vlgmr.msra.gmra.mxu0 %vm770_vm1, %v2805_v5 }
  0xa5   : > { %2014 = vmatprep.mubr.msk.bf16.mxu0 %vm2474_vm0, %v2473_v0  ;;  %2011 = vmatpush3.bf16.msra.mxu0 %v2196_v21 }
  0xa6   : > { %2012 = vmatprep.subr.bf16.mxu0 %v2473_v0 }
  0xa9   : > { %2013 = vmatpush3.bf16.msra.mxu0 %v2197_v22 }
  0xaa   : > { %2024 = vmatprep.subr.bf16.mxu0 %v2473_v0 }
  0xac   : > { %2015 = vmatmul.mubr.msk.bf16.vlgmr.msra.gmra.mxu0 %vm770_vm1, %v2805_v5 }
  0xad   : > { %2026 = vmatprep.mubr.msk.bf16.mxu0 %vm2474_vm0, %v2473_v0 }
 0x160   : > { %v871_v8 = vpop.f32.mrf.mxu1 }
 0x161   : > { %v872_v9 = vadd.f32 %v1918_v6, %v871_v8 }
 0x162   : > { %v2008_v12 = vpop.f32.mrf.mxu1 }
 0x163   : > { %v941_v13 = vpack.c.bf16 %v872_v9, %v872_v9 }
 0x164   : > { %v808_v10 = vpop.f32.mrf.mxu0  ;;  %v874_v15 = vpop.f32.mrf.mxu1 }
 0x165   : > { %v809_v11 = vadd.f32 %v1914_v7, %v808_v10  ;;  %1174 = vrot.lane.b32.xlu1 %v941_v13, %s2475_s30  ;;  %1062 = vrot.lane.b32.xlu0 %v941_v13, %s2476_s8  ;;  %v956_v18 = vsel %vm951_vm2, %v941_v13, 0 }
 0x166   : > { %v2000_v14 = vpop.f32.mrf.mxu0  ;;  %v2009_v19 = vpop.f32.mrf.mxu1  ;;  %2019 = vmatpush3.bf16.xpose.msra.mxu1 %v956_v18 }
 0x167   : > { %v940_v16 = vpack.c.bf16 %v809_v11, %v809_v11  ;;  %2030 = vmatprep.subr.bf16.mxu1 %v2473_v0 }
 0x168   : > { %v811_v17 = vpop.f32.mrf.mxu0 }
 0x169   : > { %1172 = vrot.lane.b32.xlu1 %v940_v16, %s2475_s30  ;;  %1059 = vrot.lane.b32.xlu0 %v940_v16, %s2476_s8 }
 0x16a   : > { %v2001_v20 = vpop.f32.mrf.mxu0 }
 0x16c   : > { %v934_v46 = vpop.f32.mrf.mxu0 }
 0x16d   : > { %1283 = vrot.lane.b32.xlu1 %v940_v16, %s2477_s27  ;;  %1285 = vrot.lane.b32.xlu0 %v941_v13, %s2477_s27  ;;  %v935_v47 = vadd.f32 %v1922_v45, %v934_v46 }
 0x16e   : > { %2021 = vmatmul.mubr.msk.bf16.vlgmr.msra.gmra.mxu1 %vm951_vm2, %v940_v16  ;;  %v2016_v48 = vpop.f32.mrf.mxu0 }
 0x16f   : > { %2032 = vmatprep.mubr.msk.bf16.mxu1 %vm2474_vm0, %v2473_v0  ;;  %v942_v49 = vpack.c.bf16 %v935_v47, %v935_v47 }
 0x170   : > { %v937_v50 = vpop.f32.mrf.mxu0 }
 0x171   : > { %v1015_v51 = vsel %vm1013_vm3, %v942_v49, 0 }
 0x172   : > { %v2017_v52 = vpop.f32.mrf.mxu0  ;;  %2025 = vmatpush3.bf16.msra.mxu0 %v1015_v51 }
 0x173   : > { %2036 = vmatprep.subr.bf16.mxu0 %v2473_v0 }
 0x1d7   : > { %v1063_v23 = vpop.permute.xlu0 %1062  ;;  %v1175_v25 = vpop.permute.xlu1 %1174 }
 0x1d8   : > { %v1068_v24 = vsel %vm951_vm2, %v1063_v23, 0  ;;  %v1180_v27 = vsel %vm951_vm2, %v1175_v25, 0 }
 0x1d9   : > { %2031 = vmatpush3.bf16.xpose.msra.mxu1 %v1068_v24 }
 0x1da   : > { %2042 = vmatprep.subr.bf16.mxu1 %v2473_v0 }
 0x1db   : > { %v1060_v26 = vpop.permute.xlu0 %1059  ;;  %v1173_v29 = vpop.permute.xlu1 %1172 }
 0x1df   : > { %v1286_v28 = vpop.permute.xlu0 %1285  ;;  %v1284_v31 = vpop.permute.xlu1 %1283 }
 0x1e0   : > { %2033 = vmatmul.mubr.msk.bf16.vlgmr.msra.gmra.mxu1 %vm951_vm2, %v1060_v26  ;;  %v1291_v30 = vsel %vm951_vm2, %v1286_v28, 0 }
 0x1e1   : > { %2043 = vmatpush3.bf16.xpose.msra.mxu1 %v1180_v27  ;;  %2044 = vmatprep.mubr.msk.bf16.mxu1 %vm2474_vm0, %v2473_v0 }
 0x1e2   : > { %2054 = vmatprep.subr.bf16.mxu1 %v2473_v0 }
 0x1e8   : > { %2045 = vmatmul.mubr.msk.bf16.vlgmr.msra.gmra.mxu1 %vm951_vm2, %v1173_v29 }
 0x1e9   : > { %2055 = vmatpush3.bf16.xpose.msra.mxu1 %v1291_v30  ;;  %2056 = vmatprep.mubr.msk.bf16.mxu1 %vm2474_vm0, %v2473_v0 }
 0x1ea   : > { %2066 = vmatprep.subr.bf16.mxu1 %v2473_v0 }
 0x1f0   : > { %2057 = vmatmul.mubr.msk.bf16.vlgmr.msra.gmra.mxu1 %vm951_vm2, %v1284_v31 }
 0x1f1   : > { %2070 = vmatprep.mubr.msk.bf16.mxu1 %vm2474_vm0, %v2473_v0 }
 0x22e   : > { %v992_v39 = vpop.f32.mrf.mxu1 }
 0x22f   : > { %v993_v40 = vadd.f32 %v992_v39, %v949_v38 }
 0x230   : > { %v2022_v41 = vpop.f32.mrf.mxu1 }
 0x231   : > { %v998_v42 = vsel %vm951_vm2, %v993_v40, -inf }
 0x232   : > { %999 = vmax.xlane.f32.xlu0 %v998_v42  ;;  %v995_v43 = vpop.f32.mrf.mxu1 }
 0x234   : > { %v2023_v44 = vpop.f32.mrf.mxu1 }
 0x2a0   : > { %v1104_v53 = vpop.f32.mrf.mxu1 }
 0x2a1   : > { %v1105_v54 = vadd.f32 %v1104_v53, %v949_v38 }
 0x2a2   : > { %v2034_v55 = vpop.f32.mrf.mxu1 }
 0x2a3   : > { %v1110_v56 = vsel %vm951_vm2, %v1105_v54, -inf  ;;  %v2198_v55 = vld [vmem:[%s3031_s9 + $0x8] sm:$0xff]  }
 0x2a4   : > { %1111 = vmax.xlane.f32.xlu1 %v1110_v56  ;;  %v1107_v57 = vpop.f32.mrf.mxu1  ;;  %2067 = vmatpush3.bf16.msra.mxu1 %v2198_v55 }
 0x2a5   : > { %v2199_v57 = vld [vmem:[%s3031_s9] sm:$0xff]   ;;  %2068 = vmatprep.subr.bf16.mxu1 %v2473_v0 }
 0x2a6   : > { %v2035_v58 = vpop.f32.mrf.mxu1 }
 0x2a8   : > { %v1216_v59 = vpop.f32.mrf.mxu1  ;;  %2069 = vmatpush3.bf16.msra.mxu1 %v2199_v57 }
 0x2a9   : > { %v1217_v60 = vadd.f32 %v1216_v59, %v949_v38  ;;  %2082 = vmatprep.subr.bf16.mxu1 %v2473_v0 }
 0x2aa   : > { %v2046_v61 = vpop.f32.mrf.mxu1 }
 0x2ab   : > { %v1222_v62 = vsel %vm951_vm2, %v1217_v60, -inf }
 0x2ac   : > { %1223 = vmax.xlane.f32.xlu0 %v1222_v62  ;;  %v1219_v63 = vpop.f32.mrf.mxu1 }
 0x2ae   : > { %v2047_v1 = vpop.f32.mrf.mxu1 }
 0x2b0   : > { %v1327_v2 = vpop.f32.mrf.mxu1 }
 0x2b1   : > { %v1328_v3 = vadd.f32 %v1327_v2, %v949_v38 }
 0x2b2   : > { %v2058_v4 = vpop.f32.mrf.mxu1 }
 0x2b3   : > { %v1333_v6 = vsel %vm951_vm2, %v1328_v3, -inf }
 0x2b4   : > { %1334 = vmax.xlane.f32.xlu0 %v1333_v6  ;;  %v1330_v7 = vpop.f32.mrf.mxu1 }
 0x2b6   : > { %v2059_v8 = vpop.f32.mrf.mxu1 }
 0x2bb   : > { %v1000_v9 = vpop.xlane.xlu0 %999 }
 0x2bc   : > { %v1001_v10 = vsub.f32 %v993_v40, %v1000_v9 }
 0x2be   : > { %v1002_v11 = vmul.f32 1.442695, %v1001_v10 }
 0x2c0   : > { %2206 = vpow2.f32 %v1002_v11 }
 0x2cd   : > { %v2207_v12 = vpop.eup %2206 }
 0x2ce   : > { %v1004_v13 = vsel %vm951_vm2, %v2207_v12, 0.0 }
 0x2cf   : > { %1005 = vadd.xlane.f32.xlu1 %v1004_v13 }
 0x2e0   : > { %1123 = vrot.lane.b32.xlu1 %v942_v49, %s2476_s8  ;;  %s3097_s8 = sld [smem:[#allocation28_spill]] }
 0x32d   : > { %v1112_v14 = vpop.xlane.xlu1 %1111 }
 0x32e   : > { %v1113_v15 = vsub.f32 %v1105_v54, %v1112_v14 }
 0x330   : > { %v1114_v16 = vmul.f32 1.442695, %v1113_v15 }
 0x332   : > { %2208 = vpow2.f32 %v1114_v16 }
 0x335   : > { %v1224_v17 = vpop.xlane.xlu0 %1223 }
 0x336   : > { %v1225_v18 = vsub.f32 %v1217_v60, %v1224_v17  ;;  %v1935_v17 = vld [vmem:[%s3032_s10] ss:$0 sm:$0xff] }
 0x338   : > { %v1226_v19 = vmul.f32 1.442695, %v1225_v18  ;;  %v1477_v18 = vunpack.c.l.bf16 %v2805_v5  ;;  %v2200_v5 = vld [vmem:[%s3035_s13 + $0x8] sm:$0xff]  }
 0x33a   : > { %2210 = vpow2.f32 %v1226_v19 }
 0x33d   : > { %v1335_v20 = vpop.xlane.xlu0 %1334 }
 0x33e   : > { %v1336_v21 = vsub.f32 %v1328_v3, %v1335_v20 }
 0x33f   : > { %v2209_v22 = vpop.eup %2208 }
 0x340   : > { %v1337_v23 = vmul.f32 1.442695, %v1336_v21  ;;  %v1116_v24 = vsel %vm951_vm2, %v2209_v22, 0.0 }
 0x341   : > { %1117 = vadd.xlane.f32.xlu0 %v1116_v24 }
 0x342   : > { %2212 = vpow2.f32 %v1337_v23 }
 0x347   : > { %v2211_v25 = vpop.eup %2210 }
 0x348   : > { %v1228_v26 = vsel %vm951_vm2, %v2211_v25, 0.0 }
 0x349   : > { %1229 = vadd.xlane.f32.xlu1 %v1228_v26 }
 0x34f   : > { %v2213_v27 = vpop.eup %2212 }
 0x350   : > { %v1339_v28 = vsel %vm951_vm2, %v2213_v27, 0.0 }
 0x351   : > { %1340 = vadd.xlane.f32.xlu0 %v1339_v28 }
 0x358   : > { %v1006_v29 = vpop.xlane.xlu1 %1005 }
 0x359   : > { %2214 = vrcp.f32 %v1006_v29 }
 0x35a   : > { %1345 = vrot.lane.b32.xlu1 %v942_v49, %s2477_s27 }
 0x35c   : > { %v1124_v31 = vpop.permute.xlu1 %1123 }
 0x35d   : > { %v1129_v34 = vsel %vm1013_vm3, %v1124_v31, 0  ;;  %v2201_v31 = vld [vmem:[%s3035_s13] sm:$0xff]  }
 0x366   : > { %v2215_v30 = vpop.eup %2214 }
 0x367   : > { %1234 = vrot.lane.b32.xlu0 %v942_v49, %s2475_s30  ;;  %v1008_v32 = vmul.f32 %v2215_v30, %v2207_v12  ;;  %s2480_s30 = smov 24  }
 0x369   : > { %v1009_v33 = vpack.c.bf16 %v1008_v32, %v1008_v32  ;;  %v2202_v32 = vld [vmem:[%s3037_s15 + $0x18] sm:$0xff]  }
 0x36b   : > { %2027 = vmatmul.mubr.msk.bf16.vlgmr.msra.gmra.mxu0 %vm951_vm2, %v1009_v33  ;;  %v2203_v33 = vld [vmem:[%s3037_s15 + $0x10] sm:$0xff]  }
 0x36c   : > { %2037 = vmatpush3.bf16.msra.mxu0 %v1129_v34  ;;  %2038 = vmatprep.mubr.msk.bf16.mxu0 %vm2474_vm0, %v2473_v0 }
 0x36d   : > { %2048 = vmatprep.subr.bf16.mxu0 %v2473_v0 }
 0x3ca   : > { %v1118_v35 = vpop.xlane.xlu0 %1117 }
 0x3cb   : > { %2216 = vrcp.f32 %v1118_v35 }
 0x3d2   : > { %v1230_v36 = vpop.xlane.xlu1 %1229 }
 0x3d3   : > { %2218 = vrcp.f32 %v1230_v36 }
 0x3d6   : > { %v1346_v45 = vpop.permute.xlu1 %1345 }
 0x3d7   : > { %v1351_v47 = vsel %vm1013_vm3, %v1346_v45, 0  ;;  %v2205_v45 = vld [vmem:[%s3037_s15] sm:$0xff]  }
 0x3d8   : > { %v2217_v37 = vpop.eup %2216 }
 0x3d9   : > { %v1120_v38 = vmul.f32 %v2217_v37, %v2209_v22 }
 0x3da   : > { %v1341_v39 = vpop.xlane.xlu0 %1340 }
 0x3db   : > { %2220 = vrcp.f32 %v1341_v39  ;;  %v1121_v40 = vpack.c.bf16 %v1120_v38, %v1120_v38  ;;  %v1939_v38 = vld [vmem:[%s3033_s11] ss:$0 sm:$0xff] }
 0x3dd   : > { %2039 = vmatmul.mubr.msk.bf16.vlgmr.msra.gmra.mxu0 %vm951_vm2, %v1121_v40  ;;  %v1940_v40 = vld [vmem:[%s3034_s12] ss:$0 sm:$0xff] }
 0x3de   : > { %v1235_v41 = vpop.permute.xlu0 %1234  ;;  %2050 = vmatprep.mubr.msk.bf16.mxu0 %vm2474_vm0, %v2473_v0 }
 0x3df   : > { %v1240_v42 = vsel %vm1013_vm3, %v1235_v41, 0 }
 0x3e0   : > { %v2219_v43 = vpop.eup %2218  ;;  %2049 = vmatpush3.bf16.msra.mxu0 %v1240_v42 }
 0x3e1   : > { %2060 = vmatprep.subr.bf16.mxu0 %v2473_v0  ;;  %v1232_v44 = vmul.f32 %v2219_v43, %v2211_v25 }
 0x3e3   : > { %v1233_v46 = vpack.c.bf16 %v1232_v44, %v1232_v44  ;;  %v2204_v44 = vld [vmem:[%s3037_s15 + $0x8] sm:$0xff]  }
 0x3e5   : > { %2051 = vmatmul.mubr.msk.bf16.vlgmr.msra.gmra.mxu0 %vm951_vm2, %v1233_v46  ;;  %v1941_v46 = vld [vmem:[%s3036_s14] ss:$0 sm:$0xff] }
 0x3e6   : > { %2061 = vmatpush3.bf16.msra.mxu0 %v1351_v47  ;;  %2062 = vmatprep.mubr.msk.bf16.mxu0 %vm2474_vm0, %v2473_v0 }
 0x3e7   : > { %2074 = vmatprep.subr.bf16.mxu0 %v2473_v0 }
 0x3e8   : > { %v2221_v48 = vpop.eup %2220 }
 0x3e9   : > { %v1343_v49 = vmul.f32 %v2221_v48, %v2213_v27 }
 0x3eb   : > { %v1344_v50 = vpack.c.bf16 %v1343_v49, %v1343_v49 }
 0x3ed   : > { %2063 = vmatmul.mubr.msk.bf16.vlgmr.msra.gmra.mxu0 %vm951_vm2, %v1344_v50 }
 0x3ee   : > { %2078 = vmatprep.mubr.msk.bf16.mxu0 %vm2474_vm0, %v2473_v0  ;;  %2075 = vmatpush3.bf16.msra.mxu0 %v2200_v5 }
 0x3ef   : > { %2076 = vmatprep.subr.bf16.mxu0 %v2473_v0 }
 0x3f2   : > { %2077 = vmatpush3.bf16.msra.mxu0 %v2201_v31 }
 0x42b   : > { %v1051_v51 = vpop.f32.mrf.mxu0 }
 0x42c   : > { %v1057_v11 = vpack.c.bf16 %v1051_v51, %v1051_v51 }
 0x42d   : > { %v2028_v52 = vpop.f32.mrf.mxu0 }
 0x42f   : > { %v1054_v53 = vpop.f32.mrf.mxu0 }
 0x431   : > { %v2029_v54 = vpop.f32.mrf.mxu0 }
 0x49d   : > { %v1165_v56 = vpop.f32.mrf.mxu0 }
 0x49e   : > { %v1171_v58 = vpack.c.bf16 %v1165_v56, %v1165_v56 }
 0x49f   : > { %v2040_v59 = vpop.f32.mrf.mxu0 }
 0x4a0   : > { %1395 = vrot.lane.b32.xlu1 %v1171_v58, %s2478_s0  ;;  %s1913_s0 = sshll.u32 %s740_s18, 3  ;;  %s732_s18 = scalar_lea.vmem [#allocation11], %s1908_s6 }
 0x4a1   : > { %v1168_v60 = vpop.f32.mrf.mxu0  ;;  %s742_s27 = scalar_lea.vmem %s3097_s8, %s1913_s0  ;;  %s1727_s0 = sshll.u32 %s732_s18, 4  ;;  %s2963_s0 = int_to_ptr.vmem [resolvable:$true] %s1727_s0 }
 0x4a2   : > { %s3100_s8 = sld [smem:[#allocation34_spill]]  ;;  %s1710_s6 = scalar_lea.sflag [#allocation4], %s2761_s26 }
 0x4a3   : > { %v2041_v61 = vpop.f32.mrf.mxu0  ;;  %s2360_s3 = scalar_lea.vmem %s2963_s0, 64  ;;  %p2367_p6 = scmp.lt.s32.totalorder %s2963_s0, %s2365_s25 }
 0x4a4   : > { %v2481_v61 = vmov 0   ;;  %p2361_p0 = scmp.ne.s32.totalorder %s2963_s0, %s2360_s3  ;;  %p2368_p8 = scmp.lt.s32.totalorder %s2366_s4, %s2360_s3 }
 0x4a5   : > { %v1276_v62 = vpop.f32.mrf.mxu0  ;;  %2190 = vset.pattern.permute.xlu1 %v2481_v61  ;;  %2191 = vset.pattern.permute.xlu0 %v2481_v61 }
 0x4a6   : > { %v1282_v63 = vpack.c.bf16 %v1276_v62, %v1276_v62  ;;  %v746_v62 = vld [vmem:[%s742_s27] sm:$0xff]  ;;  %p2362_p1 = pnand %p2361_p0, %p3101_p5  ;;  %p2369_p2 = por %p2368_p8, %p2367_p6 }
 0x4a7   : > { %v2052_v1 = vpop.f32.mrf.mxu0 }
 0x4a8   : > { %1398 = vrot.lane.b32.xlu0 %v1282_v63, %s2479_s23  ;;  %s2961_s27 = scalar_lea.hbm %s3100_s8, %s1954_s19  ;;  %p2363_p9 = pneg %p2362_p1 }
 0x4a9   : > { %v1279_v2 = vpop.f32.mrf.mxu0 }
 0x4aa   : > { %p2370_p3 = pnand %p2369_p2, %p2363_p9 }
 0x4ab   : > { %v2053_v3 = vpop.f32.mrf.mxu0 }
 0x4ad   : > { %v1387_v4 = vpop.f32.mrf.mxu0 }
 0x4ae   : > { %v1393_v6 = vpack.c.bf16 %v1387_v4, %v1387_v4 }
 0x4af   : > { %v2064_v7 = vpop.f32.mrf.mxu0 }
 0x4b0   : > { %1401 = vrot.lane.b32.xlu1 %v1393_v6, %s2480_s30 }
 0x4b1   : > { %v1390_v8 = vpop.f32.mrf.mxu0 }
 0x4b3   : > { %v2065_v9 = vpop.f32.mrf.mxu0 }
 0x512   : > { %v1396_v10 = vpop.permute.xlu1 %1395 }
 0x513   : > { %v1405_v13 = vsel %vm951_vm2, %v1057_v11, %v1396_v10  ;;  %v1951_v10 = vld [vmem:[%s3039_s17] ss:$0 sm:$0xff] }
 0x51a   : > { %v1399_v12 = vpop.permute.xlu0 %1398 }
 0x51b   : > { %v1408_v14 = vsel %vm1406_vm4, %v1405_v13, %v1399_v12  ;;  %v1952_v12 = vld [vmem:[%s3098_s28] ss:$0 sm:$0xff] }
 0x522   : > { %v1402_v15 = vpop.permute.xlu1 %1401 }
 0x523   : > { %v1411_v16 = vsel %vm1409_vm5, %v1408_v14, %v1402_v15 }
 0x524   : > { %2071 = vmatmul.mubr.msk.bf16.vlgmr.msra.gmra.mxu1 %vm770_vm1, %v1411_v16 }
 0x525   : > { %2090 = vmatprep.mubr.msk.bf16.mxu1 %vm2474_vm0, %v2473_v0  ;;  %2083 = vmatpush3.bf16.msra.mxu1 %v2202_v32 }
 0x526   : > { %2084 = vmatprep.subr.bf16.mxu1 %v2473_v0 }
 0x529   : > { %2085 = vmatpush3.bf16.msra.mxu1 %v2203_v33 }
 0x52a   : > { %2086 = vmatprep.subr.bf16.mxu1 %v2473_v0 }
 0x52d   : > { %2087 = vmatpush3.bf16.msra.mxu1 %v2204_v44 }
 0x52e   : > { %2088 = vmatprep.subr.bf16.mxu1 %v2473_v0  ;;  %v1945_v0 = vld [vmem:[%s3038_s16] ss:$0 sm:$0xff] }
 0x531   : > { %2089 = vmatpush3.bf16.msra.mxu1 %v2205_v45 }
 0x5e4   : > { %v1471_v19 = vpop.f32.mrf.mxu1 }
 0x5e5   : > { %v1472_v20 = vadd.f32 %v1935_v17, %v1471_v19 }
 0x5e6   : > { %v2072_v21 = vpop.f32.mrf.mxu1 }
 0x5e7   : > { %v1478_v22 = vadd.f32 %v1477_v18, %v1472_v20 }
 0x5e8   : > { %v1474_v23 = vpop.f32.mrf.mxu1 }
 0x5e9   : > { %v1481_v24 = vsel %vm770_vm1, %v1478_v22, 0.0 }
 0x5ea   : > { %1482 = vadd.xlane.f32.xlu0 %v1481_v24  ;;  %v2073_v25 = vpop.f32.mrf.mxu1 }
 0x673   : > { %v1483_v26 = vpop.xlane.xlu0 %1482 }
 0x674   : > { %v1485_v27 = vmul.f32 0.03125, %v1483_v26 }
 0x676   : > { %v1486_v28 = vsub.f32 %v1478_v22, %v1485_v27 }
 0x678   : > { %v1487_v29 = vmul.f32 %v1486_v28, %v1486_v28 }
 0x67a   : > { %v1488_v30 = vsel %vm770_vm1, %v1487_v29, 0.0 }
 0x67b   : > { %1489 = vadd.xlane.f32.xlu1 %v1488_v30 }
 0x68c   : > { %1693 = vperm.xlu1 %2190, %v746_v62  }
 0x704   : > { %v1490_v34 = vpop.xlane.xlu1 %1489 }
 0x705   : > { %v1491_v35 = vmul.f32 0.03125, %v1490_v34 }
 0x707   : > { %v1492_v36 = vadd.f32 1e-05, %v1491_v35 }
 0x708   : > { %v1694_v14 = vpop.permute.xlu1 %1693 }
 0x709   : > { %2222 = vrsqrt.f32 %v1492_v36 }
 0x716   : > { %v2223_v37 = vpop.eup %2222 }
 0x717   : > { %v1494_v39 = vmul.f32 %v2223_v37, %v1486_v28 }
 0x719   : > { %v1501_v41 = vmul.f32 %v1939_v38, %v1494_v39 }
 0x71b   : > { %v1508_v42 = vadd.f32 %v1940_v40, %v1501_v41 }
 0x71d   : > { %v1509_v43 = vpack.c.bf16 %v1508_v42, %v1508_v42 }
 0x71f   : > { %2079 = vmatmul.mubr.msk.bf16.vlgmr.msra.gmra.mxu0 %vm770_vm1, %v1509_v43 }
 0x7df   : > { %v1570_v47 = vpop.f32.mrf.mxu0 }
 0x7e0   : > { %v1571_v48 = vadd.f32 %v1941_v46, %v1570_v47 }
 0x7e1   : > { %v2080_v49 = vpop.f32.mrf.mxu0 }
 0x7e2   : > { %v1576_v50 = vmax.f32 %v1571_v48, 0.0 }
 0x7e3   : > { %v1573_v51 = vpop.f32.mrf.mxu0 }
 0x7e4   : > { %v1577_v52 = vpack.c.bf16 %v1576_v50, %v1576_v50 }
 0x7e5   : > { %v2081_v53 = vpop.f32.mrf.mxu0 }
 0x7e6   : > { %2091 = vmatmul.mubr.msk.bf16.vlgmr.msra.gmra.mxu1 %vm1617_vm6, %v1577_v52 }
 0x8a6   : > { %v1655_v54 = vpop.f32.mrf.mxu1 }
 0x8a7   : > { %v1656_v55 = vadd.f32 %v1945_v0, %v1655_v54 }
 0x8a8   : > { %v2092_v56 = vpop.f32.mrf.mxu1 }
 0x8a9   : > { %v1661_v57 = vadd.f32 %v1656_v55, %v1508_v42 }
 0x8aa   : > { %v1658_v58 = vpop.f32.mrf.mxu1 }
 0x8ab   : > { %v1664_v59 = vsel %vm770_vm1, %v1661_v57, 0.0 }
 0x8ac   : > { %1665 = vadd.xlane.f32.xlu0 %v1664_v59  ;;  %v2093_v60 = vpop.f32.mrf.mxu1 }
 0x935   : > { %v1666_v63 = vpop.xlane.xlu0 %1665 }
 0x936   : > { %v1667_v1 = vmul.f32 0.03125, %v1666_v63 }
 0x938   : > { %v1668_v2 = vsub.f32 %v1661_v57, %v1667_v1 }
 0x93a   : > { %v1669_v3 = vmul.f32 %v1668_v2, %v1668_v2 }
 0x93c   : > { %v1670_v4 = vsel %vm770_vm1, %v1669_v3, 0.0 }
 0x93d   : > { %1671 = vadd.xlane.f32.xlu0 %v1670_v4 }
 0x9c6   : > { %v1672_v6 = vpop.xlane.xlu0 %1671 }
 0x9c7   : > { %v1673_v7 = vmul.f32 0.03125, %v1672_v6 }
 0x9c9   : > { %v1674_v8 = vadd.f32 1e-05, %v1673_v7 }
 0x9cb   : > { %2224 = vrsqrt.f32 %v1674_v8 }
 0x9d8   : > { %v2225_v9 = vpop.eup %2224 }
 0x9d9   : > { %v1676_v11 = vmul.f32 %v2225_v9, %v1668_v2 }
 0x9db   : > { %v1683_v13 = vmul.f32 %v1951_v10, %v1676_v11 }
 0x9dd   : > { %v1690_v15 = vadd.f32 %v1952_v12, %v1683_v13 }
 0x9df   : > { %v1696_v16 = vmul.f32 %v1694_v14, %v1690_v15 }
 0x9e1   : > { %v1697_v17 = vpack.c.bf16 %v1696_v16, %v1696_v16  ;;  %v1700_v18 = vsel %vm770_vm1, %v1696_v16, 0.0 }
 0x9e2   : > { %v1701_v19 = vrot.slane %v1700_v18, 4 }
 0x9e3   : > { %1699 = vst.msk [vmem:[%s732_s18] sm:$0xf] %vm1698_vm7, %v1697_v17 }
 0x9e4   : > { %v1702_v20 = vadd.f32 %v1701_v19, %v1700_v18 }
 0x9e5   : > { %2373 = shalt.err (!%p2370_p3)
}
 0x9e6   : > { %s2374_s28 = scalar_lea.hbm %s2961_s27, 64  ;;  %s2378_s23 = scalar_lea.hbm %s3100_s8, 128 }
 0x9e7   : > { %p2375_p4 = scmp.ne.s32.totalorder %s2961_s27, %s2374_s28  ;;  %p2379_p12 = scmp.lt.s32.totalorder %s2961_s27, %s3100_s8 }
 0x9e8   : > { %p2380_p10 = scmp.lt.s32.totalorder %s2378_s23, %s2374_s28 }
 0x9e9   : > { %p2376_p11 = pnand %p2375_p4, %p3101_p5 }
 0x9ea   : > { %p2381_p13 = por %p2380_p10, %p2379_p12 }
 0x9eb   : > { %p2377_p7 = pneg %p2376_p11 }
 0x9ed   : > { %p2382_p0 = pnand %p2381_p13, %p2377_p7 }
 0x9ef   : > { %2385 = shalt.err (!%p2382_p0)
}
 0x9f0   : > { %2110 = dma.vmem_to_hbm [thread:$0]  (%p3101_p5), %s2963_s0, 64, %s2961_s27, %s1710_s6   ;;  %v1703_v21 = vrot.slane %v1702_v20, 2  ;;  %vm1707_vm8 = vcmask 253952  }
 0x9f1   : > { %s1955_s3 = sshll.u32 %s2610_s2, 4  ;;  %s738_s25 = scalar_lea.vmem [#allocation12], %s2761_s26 }
 0x9f2   : > { %v1704_v22 = vadd.f32 %v1703_v21, %v1702_v20  ;;  %s1740_s4 = sshll.u32 %s738_s25, 4  ;;  %s3102_s18 = sld [smem:[#allocation35_spill]]  ;;  %s1741_s4 = int_to_ptr.vmem [resolvable:$true] %s1740_s4 }
 0x9f3   : > { %s1715_s30 = scalar_lea.sflag [#allocation13], %s2761_s26  ;;  %s2386_s21 = scalar_lea.vmem %s1741_s4, 16 }
 0x9f4   : > { %v1705_v23 = vrot.slane %v1704_v22, 1  ;;  %p2387_p1 = scmp.ne.s32.totalorder %s1741_s4, %s2386_s21  ;;  %s2483_s0 = smov [#allocation12]  }
 0x9f5   : > { %s2390_s27 = sshll.u32 %s2483_s0, 4  ;;  %s2391_s27 = int_to_ptr.vmem [resolvable:$false] %s2390_s27 }
 0x9f6   : > { %v1706_v24 = vadd.f32 %v1705_v23, %v1704_v22  ;;  %p2388_p9 = pnand %p2387_p1, %p3101_p5  ;;  %s2392_s2 = scalar_lea.vmem %s2391_s27, 32 }
 0x9f7   : > { %p2393_p8 = scmp.lt.s32.totalorder %s1741_s4, %s2391_s27  ;;  %p2394_p2 = scmp.lt.s32.totalorder %s2392_s2, %s2386_s21 }
 0x9f8   : > { %s1738_s23 = scalar_lea.hbm %s3102_s18, %s1955_s3  ;;  %1708 = vst.msk [vmem:[%s738_s25] sm:$0x1] %vm1707_vm8, %v1706_v24  ;;  %p2389_p6 = pneg %p2388_p9 }
 0x9f9   : > { %p2395_p3 = por %p2394_p2, %p2393_p8 }
 0x9fb   : > { %p2396_p4 = pnand %p2395_p3, %p2389_p6 }
 0x9fd   : > { %2399 = shalt.err (!%p2396_p4)
}
 0x9fe   : > { %s2400_s6 = scalar_lea.hbm %s1738_s23, 16  ;;  %s2404_s25 = scalar_lea.hbm %s3102_s18, 32 }
 0x9ff   : > { %p2401_p11 = scmp.ne.s32.totalorder %s1738_s23, %s2400_s6  ;;  %p2405_p10 = scmp.lt.s32.totalorder %s1738_s23, %s3102_s18 }
 0xa00   : > { %p2406_p13 = scmp.lt.s32.totalorder %s2404_s25, %s2400_s6 }
 0xa01   : > { %p2402_p7 = pnand %p2401_p11, %p3101_p5 }
 0xa02   : > { %p2407_p0 = por %p2406_p13, %p2405_p10 }
 0xa03   : > { %p2403_p12 = pneg %p2402_p7 }
 0xa05   : > { %p2408_p1 = pnand %p2407_p0, %p2403_p12 }
 0xa07   : > { %2411 = shalt.err (!%p2408_p1)
}
 0xa08   : > { %2111 = dma.vmem_to_hbm [thread:$0]  (%p3101_p5), %s1741_s4, 16, %s1738_s23, %s1715_s30  }
 0xa09 PF: > { %s3103_s21 = sld [smem:[#allocation20_spill]]  ;;  %p3106_p6 = scmp.ge.s32.totalorder %s2466_s24, 2 }
 0xa0a   : > { %s3104_s0 = sld [smem:[#allocation22_spill]] }
 0xa0f   : > { %s1752_s27 = sand.u32 1, %s3103_s21  }
 0xa10   : > { %p3105_p9 = scmp.ne.s32.totalorder %s3104_s0, 0  ;;  %s1753_s2 = scalar_lea.sflag [#allocation4], %s1752_s27 }
 0xa12   : > { %p2132_p8 = pnand %p3106_p6, %p3105_p9 }
 0xa14   : > { %p2133_p2 = pneg %p2132_p8 }
 0xa16   : > { %2445 = dma.done.wait (%p2133_p2), %s1753_s2, 64  }
 0xa17   : > { %2447 = vsyncadd (%p2133_p2), %s1753_s2, 4294967232  ;;  %s1762_s26 = scalar_lea.sflag [#allocation13], %s1752_s27 }
 0xa18   : > { %2449 = dma.done.wait (%p2133_p2), %s1762_s26, 16  }
 0xa19   : > { %2451 = vsyncadd (%p2133_p2), %s1762_s26, 4294967280  ;;  %s3107_s24 = sld [smem:[#allocation23_spill]]  ;;  %s3110_s1 = smov %s2458_s22 }
 0xa1a   : > { %s3108_s6 = sld [smem:[#allocation21_spill]] }
 0xa1b   : > { %s3109_s23 = sld [smem:[#allocation24_spill]] }
 0xa1f   : > { %p41_p5 = scmp.ge.s32.totalorder %s3107_s24, 4  }
 0xa20   : > { %s3111_s22 = smov %s3108_s6 }
 0xa21   :  { %43 = sbr.rel (!%p41_p5) target bundleno = 21 (0x15), region = 186 }
 0xa26   :  { %1766 = vsyncpa [#allocation3], 1 }
 0xa27   :  { %1768 = vsyncpa [#allocation3 + $0x1], 1 }
 0xa28   :  { %1769 = vsyncpa [#allocation6], 1 }
 0xa29   :  { %1771 = vsyncpa [#allocation6 + $0x1], 1 }
 0xa2a   :  { %1772 = vsyncpa [#allocation9], 1 }
 0xa2b   :  { %1773 = vsyncpa [#allocation4], 1 }
 0xa2c   :  { %1775 = vsyncpa [#allocation4 + $0x1], 1 }
 0xa2d   :  { %1776 = vsyncpa [#allocation13], 1 }
 0xa2e   :  { %1778 = vsyncpa [#allocation13 + $0x1], 1 }

</bundles_post_ra>
